<compile_context>
chip_gen: v6e
topology: v6e:2x2x1
jax: 0.10.0
libtpu: 0.0.40
codegen_flags: <defaults>
</compile_context>

<pallas_src>
import jax
import jax.numpy as jnp
from jax.experimental import pallas as pl
from jax.experimental.pallas import tpu as pltpu


def _round_up(a, m):
    return pl.cdiv(a, m) * m


def _geom(H, W, NB):
    WP = W + 2                       # padded row width (flat layout row stride)
    R = WP + 1                       # halo reach of one 3x3 conv in flat layout
    SPAN = (H - 1) * WP + W          # lane span covering all real pixels
    S = (H + 2) * WP                 # flattened zero-padded image size
    SEG = SPAN + 6 * R               # per-sample lane stride (constant across stages)
    # Output width: last sample's H*WP window must fit; round to 128 lanes so the
    # final store is unmasked / lane-dense.
    W3 = _round_up((NB - 1) * SEG + H * WP, 128)
    W2 = W3 + 2 * R                  # conv2 output width
    W1 = W3 + 4 * R                  # conv1 output width
    W0 = W3 + 6 * R                  # x-buffer width (>= NB*SEG by construction)
    return WP, R, SPAN, S, SEG, W0, W1, W2, W3


def _make_kernel(WP, W1, W2, W3):
    def conv3x3(src_bf, w_ref, b_ref, w_out, mask=None):
        # 9-tap accumulation, register-resident f32 accumulator (no im2col scratch).
        acc = jnp.dot(w_ref[0], src_bf[:, 0:w_out],
                      preferred_element_type=jnp.float32)
        for t in range(1, 9):
            dy, dx = divmod(t, 3)
            off = dy * WP + dx                      # static lane shift, 0..2*WP+2
            acc = acc + jnp.dot(w_ref[t], src_bf[:, off:off + w_out],
                                preferred_element_type=jnp.float32)
        acc = acc + b_ref[...]
        if mask is not None:
            # Every off-pixel column becomes an exact zero, so the result is a
            # valid zero-padded flat input for the next 3x3 conv.
            acc = acc * mask
        return acc

    def kernel(x_ref, xres_ref, m1_ref, m2_ref,
               w1_ref, b1_ref, w2_ref, b2_ref,
               w3_ref, b3_ref, w4_ref, b4_ref, o_ref):
        x_bf = x_ref[...].astype(jnp.bfloat16)                        # (C, W0)
        h1 = conv3x3(x_bf, w1_ref, b1_ref, W1, m1_ref[...])           # (C,  W1) f32
        h2 = conv3x3(h1.astype(jnp.bfloat16), w2_ref, b2_ref, W2,
                     m2_ref[...])                                     # (2C, W2) f32
        # No mask needed after conv3: the 1x1 conv is pointwise and the wrapper
        # only reads back real-pixel columns of the output.
        h3 = conv3x3(h2.astype(jnp.bfloat16), w3_ref, b3_ref, W3)     # (C,  W3) f32
        h4 = jnp.dot(w4_ref[...], h3.astype(jnp.bfloat16),
                     preferred_element_type=jnp.float32) + b4_ref[...]
        # Residual view arrives pre-aligned to the output layout.
        o_ref[...] = xres_ref[...] + h4

    return kernel


def _fit_lanes(a, width):
    cur = a.shape[-1]
    if cur < width:
        return jnp.pad(a, [(0, 0)] * (a.ndim - 1) + [(0, width - cur)])
    return a[..., :width]


def resblock_forward(x_nchw, kernel_params, samples_per_step=None):
    """x_nchw: (N, C, H, W) float32; kernel_params from init_params()[1]."""
    w1, b1, w2, b2, w3, b3, w4, b4 = kernel_params
    N, C, H, W = x_nchw.shape

    if samples_per_step is None:
        if N >= 16:
            samples_per_step = 8          # many even steps; good lane width
        elif N >= 4 and N % 2 == 0:
            samples_per_step = N // 2     # exactly 2 steps -> both v7x TCs busy
        else:
            samples_per_step = N          # tiny batch: one step, amortize overhead
    NB = samples_per_step
    G = pl.cdiv(N, NB)
    NP = G * NB

    WP, R, SPAN, S, SEG, W0, W1, W2, W3 = _geom(H, W, NB)

    x = x_nchw.astype(jnp.float32)
    if NP > N:                            # pad batch to a multiple of NB
        x = jnp.pad(x, ((0, NP - N), (0, 0), (0, 0), (0, 0)))

    # Flattened zero-padded image: pixel (y, x) at column y*WP + x + R.
    xflat = jnp.pad(x, ((0, 0), (0, 0), (1, 1), (1, 1))).reshape(NP, C, S)

    def lane_concat(per_sample, width):
        # (NP, C, SEG) -> NB samples side by side on lanes -> (G, C, width)
        a = per_sample.reshape(G, NB, C, SEG).transpose(0, 2, 1, 3)
        return _fit_lanes(a.reshape(G, C, NB * SEG), width)

    # Conv input: sample j's pixel (y,x) at lane j*SEG + 3*R + y*WP + x.
    x_buf = lane_concat(jnp.pad(xflat, ((0, 0), (0, 0), (2 * R, SEG - 2 * R - S))), W0)
    # Residual view, laid out exactly like the kernel output (pixel origin at 0).
    x_res = lane_concat(jnp.pad(xflat[:, :, R:],
                                ((0, 0), (0, 0), (0, SEG - (S - R)))), W3)

    # 0/1 masks of real-pixel columns in the conv1 / conv2 output layouts
    # (pre-sliced here so the kernel never does lane-unaligned value slices).
    mimg = jnp.zeros((H + 2, WP), jnp.float32).at[1:H + 1, 1:W + 1].set(1.0).reshape(S)
    m1 = _fit_lanes(jnp.tile(jnp.pad(mimg, (R, SEG - R - S)), NB), W1).reshape(1, W1)
    m2 = _fit_lanes(jnp.tile(jnp.pad(mimg, (0, SEG - S)), NB), W2).reshape(1, W2)

    kernel = _make_kernel(WP, W1, W2, W3)
    out_steps = pl.pallas_call(
        kernel,
        out_shape=jax.ShapeDtypeStruct((G, C, W3), jnp.float32),
        grid=(G,),
        in_specs=[
            pl.BlockSpec((None, C, W0), lambda g: (g, 0, 0)),   # x (NB samples, lane-concat)
            pl.BlockSpec((None, C, W3), lambda g: (g, 0, 0)),   # residual view
            pl.BlockSpec((1, W1), lambda g: (0, 0)),            # mask after conv1
            pl.BlockSpec((1, W2), lambda g: (0, 0)),            # mask after conv2
            pl.BlockSpec((9, C, C), lambda g: (0, 0, 0)),       # w1 taps (bf16)
            pl.BlockSpec((C, 1), lambda g: (0, 0)),             # b1
            pl.BlockSpec((9, 2 * C, C), lambda g: (0, 0, 0)),   # w2 taps (bf16)
            pl.BlockSpec((2 * C, 1), lambda g: (0, 0)),         # b2
            pl.BlockSpec((9, C, 2 * C), lambda g: (0, 0, 0)),   # w3 taps (bf16)
            pl.BlockSpec((C, 1), lambda g: (0, 0)),             # b3
            pl.BlockSpec((C, C), lambda g: (0, 0)),             # w4 (1x1, bf16)
            pl.BlockSpec((C, 1), lambda g: (0, 0)),             # b4
        ],
        out_specs=pl.BlockSpec((None, C, W3), lambda g: (g, 0, 0)),
        compiler_params=pltpu.CompilerParams(
            dimension_semantics=("parallel",)),                 # v7x: split steps over TCs
    )(x_buf, x_res, m1, m2, w1, b1, w2, b2, w3, b3, w4, b4)

    # Column j*SEG + y*WP + x of step g holds pixel (y, x) of sample g*NB + j.
    segs = [out_steps[:, :, j * SEG: j * SEG + H * WP] for j in range(NB)]
    out = jnp.stack(segs, axis=1).reshape(NP, C, H, WP)[..., :W]
    return out[:N]


def _w3x3_to_taps(w_oihw):
    """PyTorch OIHW (Cout,Cin,3,3) -> (9, Cout, Cin), tap t = ky*3+kx (kernel order)."""
    cout, cin = w_oihw.shape[0], w_oihw.shape[1]
    return jnp.transpose(w_oihw, (2, 3, 0, 1)).reshape(9, cout, cin)


def prepare_kernel_params(torch_params):
    """bf16 matmul operands (native MXU rate), f32 biases for the VPU path."""
    w1, b1, w2, b2, w3, b3, w4, b4 = torch_params
    bf = jnp.bfloat16
    return (_w3x3_to_taps(w1).astype(bf), b1.reshape(-1, 1),
            _w3x3_to_taps(w2).astype(bf), b2.reshape(-1, 1),
            _w3x3_to_taps(w3).astype(bf), b3.reshape(-1, 1),
            w4[:, :, 0, 0].astype(bf),    b4.reshape(-1, 1))


def init_params(key, C):
    """Deterministic synthetic parameters with PyTorch Conv2d shapes."""
    ks = jax.random.split(key, 8)

    def w(k, cout, cin, ksz):
        return 0.1 * jax.random.normal(k, (cout, cin, ksz, ksz), jnp.float32)

    def b(k, cout):
        return 0.1 * jax.random.normal(k, (cout,), jnp.float32)

    torch_params = (w(ks[0], C, C, 3),     b(ks[1], C),
                    w(ks[2], 2 * C, C, 3), b(ks[3], 2 * C),
                    w(ks[4], C, 2 * C, 3), b(ks[5], C),
                    w(ks[6], C, C, 1),     b(ks[7], C))
    return torch_params, prepare_kernel_params(torch_params)


def _ref_conv(x, w, b, pad):
    y = jax.lax.conv_general_dilated(
        x, w, window_strides=(1, 1), padding=[(pad, pad), (pad, pad)],
        dimension_numbers=("NCHW", "OIHW", "NCHW"),
        precision=jax.lax.Precision.HIGHEST)
    return y + b.reshape(1, -1, 1, 1)


def resblock_reference(x, torch_params):
    w1, b1, w2, b2, w3, b3, w4, b4 = torch_params
    h = _ref_conv(x, w1, b1, 1)
    h = _ref_conv(h, w2, b2, 1)
    h = _ref_conv(h, w3, b3, 1)
    h = _ref_conv(h, w4, b4, 0)
    return x + h


if __name__ == "__main__":
    key = jax.random.PRNGKey(0)
    kx, kp = jax.random.split(key)

    N, C, H, W = 2, 4, 16, 16            # observation_shape[-1] == C == 4
    x = jax.random.normal(kx, (N, C, H, W), jnp.float32)

    torch_params, kernel_params = init_params(kp, C)

    fwd = jax.jit(resblock_forward)
    out = jax.block_until_ready(fwd(x, kernel_params))

    ref = resblock_reference(x, torch_params)
    assert out.shape == (N, C, H, W)
    # bf16 matmul operands (f32 accumulation) leave ~1e-3 absolute rounding noise
    # over the 3-conv chain; real layout/indexing bugs produce O(0.1-1) errors.
    assert jnp.allclose(out, ref, rtol=2e-2, atol=5e-3), "mismatch vs reference"

    print("KERNEL_OK")
</pallas_src>

<mosaic_0001>
module attributes {stable_mosaic.version = 11 : i64} {
  func.func @kernel(%arg0: i32, %arg1: memref<1x4x882xf32, #tpu.memory_space<vmem>>, %arg2: memref<1x4x768xf32, #tpu.memory_space<vmem>>, %arg3: memref<1x844xf32, #tpu.memory_space<vmem>>, %arg4: memref<1x806xf32, #tpu.memory_space<vmem>>, %arg5: memref<9x4x4xbf16, #tpu.memory_space<vmem>>, %arg6: memref<4x1xf32, #tpu.memory_space<vmem>>, %arg7: memref<9x8x4xbf16, #tpu.memory_space<vmem>>, %arg8: memref<8x1xf32, #tpu.memory_space<vmem>>, %arg9: memref<9x4x8xbf16, #tpu.memory_space<vmem>>, %arg10: memref<4x1xf32, #tpu.memory_space<vmem>>, %arg11: memref<4x4xbf16, #tpu.memory_space<vmem>>, %arg12: memref<4x1xf32, #tpu.memory_space<vmem>>, %arg13: memref<1x4x768xf32, #tpu.memory_space<vmem>>) attributes {dimension_semantics = [#tpu.dimension_semantics<parallel>], iteration_bounds = array<i64: 1>, scalar_prefetch = 0 : i64, scratch_operands = 0 : i64, tpu.core_type = #tpu.core_type<tc>, window_params = [{transform_indices = @transform_0, window_bounds = array<i64: 1, 4, 882>}, {transform_indices = @transform_1, window_bounds = array<i64: 1, 4, 768>}, {pipeline_mode = #tpu.pipeline_mode<synchronous>, transform_indices = @transform_2, window_bounds = array<i64: 1, 844>}, {pipeline_mode = #tpu.pipeline_mode<synchronous>, transform_indices = @transform_3, window_bounds = array<i64: 1, 806>}, {pipeline_mode = #tpu.pipeline_mode<synchronous>, transform_indices = @transform_4, window_bounds = array<i64: 9, 4, 4>}, {pipeline_mode = #tpu.pipeline_mode<synchronous>, transform_indices = @transform_5, window_bounds = array<i64: 4, 1>}, {pipeline_mode = #tpu.pipeline_mode<synchronous>, transform_indices = @transform_6, window_bounds = array<i64: 9, 8, 4>}, {pipeline_mode = #tpu.pipeline_mode<synchronous>, transform_indices = @transform_7, window_bounds = array<i64: 8, 1>}, {pipeline_mode = #tpu.pipeline_mode<synchronous>, transform_indices = @transform_8, window_bounds = array<i64: 9, 4, 8>}, {pipeline_mode = #tpu.pipeline_mode<synchronous>, transform_indices = @transform_9, window_bounds = array<i64: 4, 1>}, {pipeline_mode = #tpu.pipeline_mode<synchronous>, transform_indices = @transform_10, window_bounds = array<i64: 4, 4>}, {pipeline_mode = #tpu.pipeline_mode<synchronous>, transform_indices = @transform_11, window_bounds = array<i64: 4, 1>}, {transform_indices = @transform_12, window_bounds = array<i64: 1, 4, 768>}]} {
    %c0 = arith.constant 0 : index
    %c0_0 = arith.constant 0 : index
    %c0_1 = arith.constant 0 : index
    %0 = vector.load %arg1[%c0, %c0_0, %c0_1] : memref<1x4x882xf32, #tpu.memory_space<vmem>>, vector<1x4x882xf32>
    %1 = vector.shape_cast %0 : vector<1x4x882xf32> to vector<4x882xf32>
    %2 = arith.truncf %1 : vector<4x882xf32> to vector<4x882xbf16>
    %c0_2 = arith.constant 0 : index
    %c0_3 = arith.constant 0 : index
    %3 = vector.load %arg3[%c0_2, %c0_3] : memref<1x844xf32, #tpu.memory_space<vmem>>, vector<1x844xf32>
    %c0_4 = arith.constant 0 : index
    %c0_5 = arith.constant 0 : index
    %c0_6 = arith.constant 0 : index
    %4 = vector.load %arg5[%c0_4, %c0_5, %c0_6] : memref<9x4x4xbf16, #tpu.memory_space<vmem>>, vector<1x4x4xbf16>
    %5 = vector.shape_cast %4 : vector<1x4x4xbf16> to vector<4x4xbf16>
    %6 = vector.extract_strided_slice %2 {offsets = [0, 0], sizes = [4, 844], strides = [1, 1]} : vector<4x882xbf16> to vector<4x844xbf16>
    %cst = arith.constant dense<0.000000e+00> : vector<4x844xf32>
    %7 = tpu.matmul %5, %6, %cst {dimension_numbers = #tpu.dot_dimension_numbers<[1], [0], [0], [1], [0, 0, 1, 1], [], []>} : vector<4x4xbf16>, vector<4x844xbf16>, vector<4x844xf32> -> vector<4x844xf32>
    %c1 = arith.constant 1 : index
    %c0_7 = arith.constant 0 : index
    %c0_8 = arith.constant 0 : index
    %8 = vector.load %arg5[%c1, %c0_7, %c0_8] : memref<9x4x4xbf16, #tpu.memory_space<vmem>>, vector<1x4x4xbf16>
    %9 = vector.shape_cast %8 : vector<1x4x4xbf16> to vector<4x4xbf16>
    %10 = vector.extract_strided_slice %2 {offsets = [0, 1], sizes = [4, 844], strides = [1, 1]} : vector<4x882xbf16> to vector<4x844xbf16>
    %cst_9 = arith.constant dense<0.000000e+00> : vector<4x844xf32>
    %11 = tpu.matmul %9, %10, %cst_9 {dimension_numbers = #tpu.dot_dimension_numbers<[1], [0], [0], [1], [0, 0, 1, 1], [], []>} : vector<4x4xbf16>, vector<4x844xbf16>, vector<4x844xf32> -> vector<4x844xf32>
    %12 = arith.addf %7, %11 : vector<4x844xf32>
    %c2 = arith.constant 2 : index
    %c0_10 = arith.constant 0 : index
    %c0_11 = arith.constant 0 : index
    %13 = vector.load %arg5[%c2, %c0_10, %c0_11] : memref<9x4x4xbf16, #tpu.memory_space<vmem>>, vector<1x4x4xbf16>
    %14 = vector.shape_cast %13 : vector<1x4x4xbf16> to vector<4x4xbf16>
    %15 = vector.extract_strided_slice %2 {offsets = [0, 2], sizes = [4, 844], strides = [1, 1]} : vector<4x882xbf16> to vector<4x844xbf16>
    %cst_12 = arith.constant dense<0.000000e+00> : vector<4x844xf32>
    %16 = tpu.matmul %14, %15, %cst_12 {dimension_numbers = #tpu.dot_dimension_numbers<[1], [0], [0], [1], [0, 0, 1, 1], [], []>} : vector<4x4xbf16>, vector<4x844xbf16>, vector<4x844xf32> -> vector<4x844xf32>
    %17 = arith.addf %12, %16 : vector<4x844xf32>
    %c3 = arith.constant 3 : index
    %c0_13 = arith.constant 0 : index
    %c0_14 = arith.constant 0 : index
    %18 = vector.load %arg5[%c3, %c0_13, %c0_14] : memref<9x4x4xbf16, #tpu.memory_space<vmem>>, vector<1x4x4xbf16>
    %19 = vector.shape_cast %18 : vector<1x4x4xbf16> to vector<4x4xbf16>
    %20 = vector.extract_strided_slice %2 {offsets = [0, 18], sizes = [4, 844], strides = [1, 1]} : vector<4x882xbf16> to vector<4x844xbf16>
    %cst_15 = arith.constant dense<0.000000e+00> : vector<4x844xf32>
    %21 = tpu.matmul %19, %20, %cst_15 {dimension_numbers = #tpu.dot_dimension_numbers<[1], [0], [0], [1], [0, 0, 1, 1], [], []>} : vector<4x4xbf16>, vector<4x844xbf16>, vector<4x844xf32> -> vector<4x844xf32>
    %22 = arith.addf %17, %21 : vector<4x844xf32>
    %c4 = arith.constant 4 : index
    %c0_16 = arith.constant 0 : index
    %c0_17 = arith.constant 0 : index
    %23 = vector.load %arg5[%c4, %c0_16, %c0_17] : memref<9x4x4xbf16, #tpu.memory_space<vmem>>, vector<1x4x4xbf16>
    %24 = vector.shape_cast %23 : vector<1x4x4xbf16> to vector<4x4xbf16>
    %25 = vector.extract_strided_slice %2 {offsets = [0, 19], sizes = [4, 844], strides = [1, 1]} : vector<4x882xbf16> to vector<4x844xbf16>
    %cst_18 = arith.constant dense<0.000000e+00> : vector<4x844xf32>
    %26 = tpu.matmul %24, %25, %cst_18 {dimension_numbers = #tpu.dot_dimension_numbers<[1], [0], [0], [1], [0, 0, 1, 1], [], []>} : vector<4x4xbf16>, vector<4x844xbf16>, vector<4x844xf32> -> vector<4x844xf32>
    %27 = arith.addf %22, %26 : vector<4x844xf32>
    %c5 = arith.constant 5 : index
    %c0_19 = arith.constant 0 : index
    %c0_20 = arith.constant 0 : index
    %28 = vector.load %arg5[%c5, %c0_19, %c0_20] : memref<9x4x4xbf16, #tpu.memory_space<vmem>>, vector<1x4x4xbf16>
    %29 = vector.shape_cast %28 : vector<1x4x4xbf16> to vector<4x4xbf16>
    %30 = vector.extract_strided_slice %2 {offsets = [0, 20], sizes = [4, 844], strides = [1, 1]} : vector<4x882xbf16> to vector<4x844xbf16>
    %cst_21 = arith.constant dense<0.000000e+00> : vector<4x844xf32>
    %31 = tpu.matmul %29, %30, %cst_21 {dimension_numbers = #tpu.dot_dimension_numbers<[1], [0], [0], [1], [0, 0, 1, 1], [], []>} : vector<4x4xbf16>, vector<4x844xbf16>, vector<4x844xf32> -> vector<4x844xf32>
    %32 = arith.addf %27, %31 : vector<4x844xf32>
    %c6 = arith.constant 6 : index
    %c0_22 = arith.constant 0 : index
    %c0_23 = arith.constant 0 : index
    %33 = vector.load %arg5[%c6, %c0_22, %c0_23] : memref<9x4x4xbf16, #tpu.memory_space<vmem>>, vector<1x4x4xbf16>
    %34 = vector.shape_cast %33 : vector<1x4x4xbf16> to vector<4x4xbf16>
    %35 = vector.extract_strided_slice %2 {offsets = [0, 36], sizes = [4, 844], strides = [1, 1]} : vector<4x882xbf16> to vector<4x844xbf16>
    %cst_24 = arith.constant dense<0.000000e+00> : vector<4x844xf32>
    %36 = tpu.matmul %34, %35, %cst_24 {dimension_numbers = #tpu.dot_dimension_numbers<[1], [0], [0], [1], [0, 0, 1, 1], [], []>} : vector<4x4xbf16>, vector<4x844xbf16>, vector<4x844xf32> -> vector<4x844xf32>
    %37 = arith.addf %32, %36 : vector<4x844xf32>
    %c7 = arith.constant 7 : index
    %c0_25 = arith.constant 0 : index
    %c0_26 = arith.constant 0 : index
    %38 = vector.load %arg5[%c7, %c0_25, %c0_26] : memref<9x4x4xbf16, #tpu.memory_space<vmem>>, vector<1x4x4xbf16>
    %39 = vector.shape_cast %38 : vector<1x4x4xbf16> to vector<4x4xbf16>
    %40 = vector.extract_strided_slice %2 {offsets = [0, 37], sizes = [4, 844], strides = [1, 1]} : vector<4x882xbf16> to vector<4x844xbf16>
    %cst_27 = arith.constant dense<0.000000e+00> : vector<4x844xf32>
    %41 = tpu.matmul %39, %40, %cst_27 {dimension_numbers = #tpu.dot_dimension_numbers<[1], [0], [0], [1], [0, 0, 1, 1], [], []>} : vector<4x4xbf16>, vector<4x844xbf16>, vector<4x844xf32> -> vector<4x844xf32>
    %42 = arith.addf %37, %41 : vector<4x844xf32>
    %c8 = arith.constant 8 : index
    %c0_28 = arith.constant 0 : index
    %c0_29 = arith.constant 0 : index
    %43 = vector.load %arg5[%c8, %c0_28, %c0_29] : memref<9x4x4xbf16, #tpu.memory_space<vmem>>, vector<1x4x4xbf16>
    %44 = vector.shape_cast %43 : vector<1x4x4xbf16> to vector<4x4xbf16>
    %45 = vector.extract_strided_slice %2 {offsets = [0, 38], sizes = [4, 844], strides = [1, 1]} : vector<4x882xbf16> to vector<4x844xbf16>
    %cst_30 = arith.constant dense<0.000000e+00> : vector<4x844xf32>
    %46 = tpu.matmul %44, %45, %cst_30 {dimension_numbers = #tpu.dot_dimension_numbers<[1], [0], [0], [1], [0, 0, 1, 1], [], []>} : vector<4x4xbf16>, vector<4x844xbf16>, vector<4x844xf32> -> vector<4x844xf32>
    %47 = arith.addf %42, %46 : vector<4x844xf32>
    %c0_31 = arith.constant 0 : index
    %c0_32 = arith.constant 0 : index
    %48 = vector.load %arg6[%c0_31, %c0_32] : memref<4x1xf32, #tpu.memory_space<vmem>>, vector<4x1xf32>
    %49 = vector.broadcast %48 : vector<4x1xf32> to vector<4x844xf32>
    %50 = arith.addf %47, %49 : vector<4x844xf32>
    %51 = vector.broadcast %3 : vector<1x844xf32> to vector<4x844xf32>
    %52 = arith.mulf %50, %51 : vector<4x844xf32>
    %53 = arith.truncf %52 : vector<4x844xf32> to vector<4x844xbf16>
    %c0_33 = arith.constant 0 : index
    %c0_34 = arith.constant 0 : index
    %54 = vector.load %arg4[%c0_33, %c0_34] : memref<1x806xf32, #tpu.memory_space<vmem>>, vector<1x806xf32>
    %c0_35 = arith.constant 0 : index
    %c0_36 = arith.constant 0 : index
    %c0_37 = arith.constant 0 : index
    %55 = vector.load %arg7[%c0_35, %c0_36, %c0_37] : memref<9x8x4xbf16, #tpu.memory_space<vmem>>, vector<1x8x4xbf16>
    %56 = vector.shape_cast %55 : vector<1x8x4xbf16> to vector<8x4xbf16>
    %57 = vector.extract_strided_slice %53 {offsets = [0, 0], sizes = [4, 806], strides = [1, 1]} : vector<4x844xbf16> to vector<4x806xbf16>
    %cst_38 = arith.constant dense<0.000000e+00> : vector<8x806xf32>
    %58 = tpu.matmul %56, %57, %cst_38 {dimension_numbers = #tpu.dot_dimension_numbers<[1], [0], [0], [1], [0, 0, 1, 1], [], []>} : vector<8x4xbf16>, vector<4x806xbf16>, vector<8x806xf32> -> vector<8x806xf32>
    %c1_39 = arith.constant 1 : index
    %c0_40 = arith.constant 0 : index
    %c0_41 = arith.constant 0 : index
    %59 = vector.load %arg7[%c1_39, %c0_40, %c0_41] : memref<9x8x4xbf16, #tpu.memory_space<vmem>>, vector<1x8x4xbf16>
    %60 = vector.shape_cast %59 : vector<1x8x4xbf16> to vector<8x4xbf16>
    %61 = vector.extract_strided_slice %53 {offsets = [0, 1], sizes = [4, 806], strides = [1, 1]} : vector<4x844xbf16> to vector<4x806xbf16>
    %cst_42 = arith.constant dense<0.000000e+00> : vector<8x806xf32>
    %62 = tpu.matmul %60, %61, %cst_42 {dimension_numbers = #tpu.dot_dimension_numbers<[1], [0], [0], [1], [0, 0, 1, 1], [], []>} : vector<8x4xbf16>, vector<4x806xbf16>, vector<8x806xf32> -> vector<8x806xf32>
    %63 = arith.addf %58, %62 : vector<8x806xf32>
    %c2_43 = arith.constant 2 : index
    %c0_44 = arith.constant 0 : index
    %c0_45 = arith.constant 0 : index
    %64 = vector.load %arg7[%c2_43, %c0_44, %c0_45] : memref<9x8x4xbf16, #tpu.memory_space<vmem>>, vector<1x8x4xbf16>
    %65 = vector.shape_cast %64 : vector<1x8x4xbf16> to vector<8x4xbf16>
    %66 = vector.extract_strided_slice %53 {offsets = [0, 2], sizes = [4, 806], strides = [1, 1]} : vector<4x844xbf16> to vector<4x806xbf16>
    %cst_46 = arith.constant dense<0.000000e+00> : vector<8x806xf32>
    %67 = tpu.matmul %65, %66, %cst_46 {dimension_numbers = #tpu.dot_dimension_numbers<[1], [0], [0], [1], [0, 0, 1, 1], [], []>} : vector<8x4xbf16>, vector<4x806xbf16>, vector<8x806xf32> -> vector<8x806xf32>
    %68 = arith.addf %63, %67 : vector<8x806xf32>
    %c3_47 = arith.constant 3 : index
    %c0_48 = arith.constant 0 : index
    %c0_49 = arith.constant 0 : index
    %69 = vector.load %arg7[%c3_47, %c0_48, %c0_49] : memref<9x8x4xbf16, #tpu.memory_space<vmem>>, vector<1x8x4xbf16>
    %70 = vector.shape_cast %69 : vector<1x8x4xbf16> to vector<8x4xbf16>
    %71 = vector.extract_strided_slice %53 {offsets = [0, 18], sizes = [4, 806], strides = [1, 1]} : vector<4x844xbf16> to vector<4x806xbf16>
    %cst_50 = arith.constant dense<0.000000e+00> : vector<8x806xf32>
    %72 = tpu.matmul %70, %71, %cst_50 {dimension_numbers = #tpu.dot_dimension_numbers<[1], [0], [0], [1], [0, 0, 1, 1], [], []>} : vector<8x4xbf16>, vector<4x806xbf16>, vector<8x806xf32> -> vector<8x806xf32>
    %73 = arith.addf %68, %72 : vector<8x806xf32>
    %c4_51 = arith.constant 4 : index
    %c0_52 = arith.constant 0 : index
    %c0_53 = arith.constant 0 : index
    %74 = vector.load %arg7[%c4_51, %c0_52, %c0_53] : memref<9x8x4xbf16, #tpu.memory_space<vmem>>, vector<1x8x4xbf16>
    %75 = vector.shape_cast %74 : vector<1x8x4xbf16> to vector<8x4xbf16>
    %76 = vector.extract_strided_slice %53 {offsets = [0, 19], sizes = [4, 806], strides = [1, 1]} : vector<4x844xbf16> to vector<4x806xbf16>
    %cst_54 = arith.constant dense<0.000000e+00> : vector<8x806xf32>
    %77 = tpu.matmul %75, %76, %cst_54 {dimension_numbers = #tpu.dot_dimension_numbers<[1], [0], [0], [1], [0, 0, 1, 1], [], []>} : vector<8x4xbf16>, vector<4x806xbf16>, vector<8x806xf32> -> vector<8x806xf32>
    %78 = arith.addf %73, %77 : vector<8x806xf32>
    %c5_55 = arith.constant 5 : index
    %c0_56 = arith.constant 0 : index
    %c0_57 = arith.constant 0 : index
    %79 = vector.load %arg7[%c5_55, %c0_56, %c0_57] : memref<9x8x4xbf16, #tpu.memory_space<vmem>>, vector<1x8x4xbf16>
    %80 = vector.shape_cast %79 : vector<1x8x4xbf16> to vector<8x4xbf16>
    %81 = vector.extract_strided_slice %53 {offsets = [0, 20], sizes = [4, 806], strides = [1, 1]} : vector<4x844xbf16> to vector<4x806xbf16>
    %cst_58 = arith.constant dense<0.000000e+00> : vector<8x806xf32>
    %82 = tpu.matmul %80, %81, %cst_58 {dimension_numbers = #tpu.dot_dimension_numbers<[1], [0], [0], [1], [0, 0, 1, 1], [], []>} : vector<8x4xbf16>, vector<4x806xbf16>, vector<8x806xf32> -> vector<8x806xf32>
    %83 = arith.addf %78, %82 : vector<8x806xf32>
    %c6_59 = arith.constant 6 : index
    %c0_60 = arith.constant 0 : index
    %c0_61 = arith.constant 0 : index
    %84 = vector.load %arg7[%c6_59, %c0_60, %c0_61] : memref<9x8x4xbf16, #tpu.memory_space<vmem>>, vector<1x8x4xbf16>
    %85 = vector.shape_cast %84 : vector<1x8x4xbf16> to vector<8x4xbf16>
    %86 = vector.extract_strided_slice %53 {offsets = [0, 36], sizes = [4, 806], strides = [1, 1]} : vector<4x844xbf16> to vector<4x806xbf16>
    %cst_62 = arith.constant dense<0.000000e+00> : vector<8x806xf32>
    %87 = tpu.matmul %85, %86, %cst_62 {dimension_numbers = #tpu.dot_dimension_numbers<[1], [0], [0], [1], [0, 0, 1, 1], [], []>} : vector<8x4xbf16>, vector<4x806xbf16>, vector<8x806xf32> -> vector<8x806xf32>
    %88 = arith.addf %83, %87 : vector<8x806xf32>
    %c7_63 = arith.constant 7 : index
    %c0_64 = arith.constant 0 : index
    %c0_65 = arith.constant 0 : index
    %89 = vector.load %arg7[%c7_63, %c0_64, %c0_65] : memref<9x8x4xbf16, #tpu.memory_space<vmem>>, vector<1x8x4xbf16>
    %90 = vector.shape_cast %89 : vector<1x8x4xbf16> to vector<8x4xbf16>
    %91 = vector.extract_strided_slice %53 {offsets = [0, 37], sizes = [4, 806], strides = [1, 1]} : vector<4x844xbf16> to vector<4x806xbf16>
    %cst_66 = arith.constant dense<0.000000e+00> : vector<8x806xf32>
    %92 = tpu.matmul %90, %91, %cst_66 {dimension_numbers = #tpu.dot_dimension_numbers<[1], [0], [0], [1], [0, 0, 1, 1], [], []>} : vector<8x4xbf16>, vector<4x806xbf16>, vector<8x806xf32> -> vector<8x806xf32>
    %93 = arith.addf %88, %92 : vector<8x806xf32>
    %c8_67 = arith.constant 8 : index
    %c0_68 = arith.constant 0 : index
    %c0_69 = arith.constant 0 : index
    %94 = vector.load %arg7[%c8_67, %c0_68, %c0_69] : memref<9x8x4xbf16, #tpu.memory_space<vmem>>, vector<1x8x4xbf16>
    %95 = vector.shape_cast %94 : vector<1x8x4xbf16> to vector<8x4xbf16>
    %96 = vector.extract_strided_slice %53 {offsets = [0, 38], sizes = [4, 806], strides = [1, 1]} : vector<4x844xbf16> to vector<4x806xbf16>
    %cst_70 = arith.constant dense<0.000000e+00> : vector<8x806xf32>
    %97 = tpu.matmul %95, %96, %cst_70 {dimension_numbers = #tpu.dot_dimension_numbers<[1], [0], [0], [1], [0, 0, 1, 1], [], []>} : vector<8x4xbf16>, vector<4x806xbf16>, vector<8x806xf32> -> vector<8x806xf32>
    %98 = arith.addf %93, %97 : vector<8x806xf32>
    %c0_71 = arith.constant 0 : index
    %c0_72 = arith.constant 0 : index
    %99 = vector.load %arg8[%c0_71, %c0_72] : memref<8x1xf32, #tpu.memory_space<vmem>>, vector<8x1xf32>
    %100 = vector.broadcast %99 : vector<8x1xf32> to vector<8x806xf32>
    %101 = arith.addf %98, %100 : vector<8x806xf32>
    %102 = vector.broadcast %54 : vector<1x806xf32> to vector<8x806xf32>
    %103 = arith.mulf %101, %102 : vector<8x806xf32>
    %104 = arith.truncf %103 : vector<8x806xf32> to vector<8x806xbf16>
    %c0_73 = arith.constant 0 : index
    %c0_74 = arith.constant 0 : index
    %c0_75 = arith.constant 0 : index
    %105 = vector.load %arg9[%c0_73, %c0_74, %c0_75] : memref<9x4x8xbf16, #tpu.memory_space<vmem>>, vector<1x4x8xbf16>
    %106 = vector.shape_cast %105 : vector<1x4x8xbf16> to vector<4x8xbf16>
    %107 = vector.extract_strided_slice %104 {offsets = [0, 0], sizes = [8, 768], strides = [1, 1]} : vector<8x806xbf16> to vector<8x768xbf16>
    %cst_76 = arith.constant dense<0.000000e+00> : vector<4x768xf32>
    %108 = tpu.matmul %106, %107, %cst_76 {dimension_numbers = #tpu.dot_dimension_numbers<[1], [0], [0], [1], [0, 0, 1, 1], [], []>} : vector<4x8xbf16>, vector<8x768xbf16>, vector<4x768xf32> -> vector<4x768xf32>
    %c1_77 = arith.constant 1 : index
    %c0_78 = arith.constant 0 : index
    %c0_79 = arith.constant 0 : index
    %109 = vector.load %arg9[%c1_77, %c0_78, %c0_79] : memref<9x4x8xbf16, #tpu.memory_space<vmem>>, vector<1x4x8xbf16>
    %110 = vector.shape_cast %109 : vector<1x4x8xbf16> to vector<4x8xbf16>
    %111 = vector.extract_strided_slice %104 {offsets = [0, 1], sizes = [8, 768], strides = [1, 1]} : vector<8x806xbf16> to vector<8x768xbf16>
    %cst_80 = arith.constant dense<0.000000e+00> : vector<4x768xf32>
    %112 = tpu.matmul %110, %111, %cst_80 {dimension_numbers = #tpu.dot_dimension_numbers<[1], [0], [0], [1], [0, 0, 1, 1], [], []>} : vector<4x8xbf16>, vector<8x768xbf16>, vector<4x768xf32> -> vector<4x768xf32>
    %113 = arith.addf %108, %112 : vector<4x768xf32>
    %c2_81 = arith.constant 2 : index
    %c0_82 = arith.constant 0 : index
    %c0_83 = arith.constant 0 : index
    %114 = vector.load %arg9[%c2_81, %c0_82, %c0_83] : memref<9x4x8xbf16, #tpu.memory_space<vmem>>, vector<1x4x8xbf16>
    %115 = vector.shape_cast %114 : vector<1x4x8xbf16> to vector<4x8xbf16>
    %116 = vector.extract_strided_slice %104 {offsets = [0, 2], sizes = [8, 768], strides = [1, 1]} : vector<8x806xbf16> to vector<8x768xbf16>
    %cst_84 = arith.constant dense<0.000000e+00> : vector<4x768xf32>
    %117 = tpu.matmul %115, %116, %cst_84 {dimension_numbers = #tpu.dot_dimension_numbers<[1], [0], [0], [1], [0, 0, 1, 1], [], []>} : vector<4x8xbf16>, vector<8x768xbf16>, vector<4x768xf32> -> vector<4x768xf32>
    %118 = arith.addf %113, %117 : vector<4x768xf32>
    %c3_85 = arith.constant 3 : index
    %c0_86 = arith.constant 0 : index
    %c0_87 = arith.constant 0 : index
    %119 = vector.load %arg9[%c3_85, %c0_86, %c0_87] : memref<9x4x8xbf16, #tpu.memory_space<vmem>>, vector<1x4x8xbf16>
    %120 = vector.shape_cast %119 : vector<1x4x8xbf16> to vector<4x8xbf16>
    %121 = vector.extract_strided_slice %104 {offsets = [0, 18], sizes = [8, 768], strides = [1, 1]} : vector<8x806xbf16> to vector<8x768xbf16>
    %cst_88 = arith.constant dense<0.000000e+00> : vector<4x768xf32>
    %122 = tpu.matmul %120, %121, %cst_88 {dimension_numbers = #tpu.dot_dimension_numbers<[1], [0], [0], [1], [0, 0, 1, 1], [], []>} : vector<4x8xbf16>, vector<8x768xbf16>, vector<4x768xf32> -> vector<4x768xf32>
    %123 = arith.addf %118, %122 : vector<4x768xf32>
    %c4_89 = arith.constant 4 : index
    %c0_90 = arith.constant 0 : index
    %c0_91 = arith.constant 0 : index
    %124 = vector.load %arg9[%c4_89, %c0_90, %c0_91] : memref<9x4x8xbf16, #tpu.memory_space<vmem>>, vector<1x4x8xbf16>
    %125 = vector.shape_cast %124 : vector<1x4x8xbf16> to vector<4x8xbf16>
    %126 = vector.extract_strided_slice %104 {offsets = [0, 19], sizes = [8, 768], strides = [1, 1]} : vector<8x806xbf16> to vector<8x768xbf16>
    %cst_92 = arith.constant dense<0.000000e+00> : vector<4x768xf32>
    %127 = tpu.matmul %125, %126, %cst_92 {dimension_numbers = #tpu.dot_dimension_numbers<[1], [0], [0], [1], [0, 0, 1, 1], [], []>} : vector<4x8xbf16>, vector<8x768xbf16>, vector<4x768xf32> -> vector<4x768xf32>
    %128 = arith.addf %123, %127 : vector<4x768xf32>
    %c5_93 = arith.constant 5 : index
    %c0_94 = arith.constant 0 : index
    %c0_95 = arith.constant 0 : index
    %129 = vector.load %arg9[%c5_93, %c0_94, %c0_95] : memref<9x4x8xbf16, #tpu.memory_space<vmem>>, vector<1x4x8xbf16>
    %130 = vector.shape_cast %129 : vector<1x4x8xbf16> to vector<4x8xbf16>
    %131 = vector.extract_strided_slice %104 {offsets = [0, 20], sizes = [8, 768], strides = [1, 1]} : vector<8x806xbf16> to vector<8x768xbf16>
    %cst_96 = arith.constant dense<0.000000e+00> : vector<4x768xf32>
    %132 = tpu.matmul %130, %131, %cst_96 {dimension_numbers = #tpu.dot_dimension_numbers<[1], [0], [0], [1], [0, 0, 1, 1], [], []>} : vector<4x8xbf16>, vector<8x768xbf16>, vector<4x768xf32> -> vector<4x768xf32>
    %133 = arith.addf %128, %132 : vector<4x768xf32>
    %c6_97 = arith.constant 6 : index
    %c0_98 = arith.constant 0 : index
    %c0_99 = arith.constant 0 : index
    %134 = vector.load %arg9[%c6_97, %c0_98, %c0_99] : memref<9x4x8xbf16, #tpu.memory_space<vmem>>, vector<1x4x8xbf16>
    %135 = vector.shape_cast %134 : vector<1x4x8xbf16> to vector<4x8xbf16>
    %136 = vector.extract_strided_slice %104 {offsets = [0, 36], sizes = [8, 768], strides = [1, 1]} : vector<8x806xbf16> to vector<8x768xbf16>
    %cst_100 = arith.constant dense<0.000000e+00> : vector<4x768xf32>
    %137 = tpu.matmul %135, %136, %cst_100 {dimension_numbers = #tpu.dot_dimension_numbers<[1], [0], [0], [1], [0, 0, 1, 1], [], []>} : vector<4x8xbf16>, vector<8x768xbf16>, vector<4x768xf32> -> vector<4x768xf32>
    %138 = arith.addf %133, %137 : vector<4x768xf32>
    %c7_101 = arith.constant 7 : index
    %c0_102 = arith.constant 0 : index
    %c0_103 = arith.constant 0 : index
    %139 = vector.load %arg9[%c7_101, %c0_102, %c0_103] : memref<9x4x8xbf16, #tpu.memory_space<vmem>>, vector<1x4x8xbf16>
    %140 = vector.shape_cast %139 : vector<1x4x8xbf16> to vector<4x8xbf16>
    %141 = vector.extract_strided_slice %104 {offsets = [0, 37], sizes = [8, 768], strides = [1, 1]} : vector<8x806xbf16> to vector<8x768xbf16>
    %cst_104 = arith.constant dense<0.000000e+00> : vector<4x768xf32>
    %142 = tpu.matmul %140, %141, %cst_104 {dimension_numbers = #tpu.dot_dimension_numbers<[1], [0], [0], [1], [0, 0, 1, 1], [], []>} : vector<4x8xbf16>, vector<8x768xbf16>, vector<4x768xf32> -> vector<4x768xf32>
    %143 = arith.addf %138, %142 : vector<4x768xf32>
    %c8_105 = arith.constant 8 : index
    %c0_106 = arith.constant 0 : index
    %c0_107 = arith.constant 0 : index
    %144 = vector.load %arg9[%c8_105, %c0_106, %c0_107] : memref<9x4x8xbf16, #tpu.memory_space<vmem>>, vector<1x4x8xbf16>
    %145 = vector.shape_cast %144 : vector<1x4x8xbf16> to vector<4x8xbf16>
    %146 = vector.extract_strided_slice %104 {offsets = [0, 38], sizes = [8, 768], strides = [1, 1]} : vector<8x806xbf16> to vector<8x768xbf16>
    %cst_108 = arith.constant dense<0.000000e+00> : vector<4x768xf32>
    %147 = tpu.matmul %145, %146, %cst_108 {dimension_numbers = #tpu.dot_dimension_numbers<[1], [0], [0], [1], [0, 0, 1, 1], [], []>} : vector<4x8xbf16>, vector<8x768xbf16>, vector<4x768xf32> -> vector<4x768xf32>
    %148 = arith.addf %143, %147 : vector<4x768xf32>
    %c0_109 = arith.constant 0 : index
    %c0_110 = arith.constant 0 : index
    %149 = vector.load %arg10[%c0_109, %c0_110] : memref<4x1xf32, #tpu.memory_space<vmem>>, vector<4x1xf32>
    %150 = vector.broadcast %149 : vector<4x1xf32> to vector<4x768xf32>
    %151 = arith.addf %148, %150 : vector<4x768xf32>
    %c0_111 = arith.constant 0 : index
    %c0_112 = arith.constant 0 : index
    %152 = vector.load %arg11[%c0_111, %c0_112] : memref<4x4xbf16, #tpu.memory_space<vmem>>, vector<4x4xbf16>
    %153 = arith.truncf %151 : vector<4x768xf32> to vector<4x768xbf16>
    %cst_113 = arith.constant dense<0.000000e+00> : vector<4x768xf32>
    %154 = tpu.matmul %152, %153, %cst_113 {dimension_numbers = #tpu.dot_dimension_numbers<[1], [0], [0], [1], [0, 0, 1, 1], [], []>} : vector<4x4xbf16>, vector<4x768xbf16>, vector<4x768xf32> -> vector<4x768xf32>
    %c0_114 = arith.constant 0 : index
    %c0_115 = arith.constant 0 : index
    %155 = vector.load %arg12[%c0_114, %c0_115] : memref<4x1xf32, #tpu.memory_space<vmem>>, vector<4x1xf32>
    %156 = vector.broadcast %155 : vector<4x1xf32> to vector<4x768xf32>
    %157 = arith.addf %154, %156 : vector<4x768xf32>
    %c0_116 = arith.constant 0 : index
    %c0_117 = arith.constant 0 : index
    %c0_118 = arith.constant 0 : index
    %158 = vector.load %arg2[%c0_116, %c0_117, %c0_118] : memref<1x4x768xf32, #tpu.memory_space<vmem>>, vector<1x4x768xf32>
    %159 = vector.shape_cast %158 : vector<1x4x768xf32> to vector<4x768xf32>
    %160 = arith.addf %159, %157 : vector<4x768xf32>
    %c0_119 = arith.constant 0 : index
    %c0_120 = arith.constant 0 : index
    %c0_121 = arith.constant 0 : index
    %161 = vector.load %arg13[%c0_119, %c0_120, %c0_121] : memref<1x4x768xf32, #tpu.memory_space<vmem>>, vector<1x4x768xf32>
    %162 = vector.shape_cast %161 : vector<1x4x768xf32> to vector<4x768xf32>
    %163 = vector.shape_cast %160 : vector<4x768xf32> to vector<1x4x768xf32>
    tpu.vector_store %arg13[%c0_119, %c0_120, %c0_121], %163 {strides = array<i32>} : memref<1x4x768xf32, #tpu.memory_space<vmem>>, vector<1x4x768xf32>,
    return
  }
  func.func @transform_0(%arg0: i32) -> (i32, i32, i32) {
    %c0_i32 = arith.constant 0 : i32
    %c0_i32_0 = arith.constant 0 : i32
    %c0_i32_1 = arith.constant 0 : i32
    return %arg0, %c0_i32, %c0_i32_0 : i32, i32, i32
  }
  func.func @transform_1(%arg0: i32) -> (i32, i32, i32) {
    %c0_i32 = arith.constant 0 : i32
    %c0_i32_0 = arith.constant 0 : i32
    %c0_i32_1 = arith.constant 0 : i32
    return %arg0, %c0_i32, %c0_i32_0 : i32, i32, i32
  }
  func.func @transform_2(%arg0: i32) -> (i32, i32) {
    %c0_i32 = arith.constant 0 : i32
    %c0_i32_0 = arith.constant 0 : i32
    %c0_i32_1 = arith.constant 0 : i32
    return %c0_i32, %c0_i32_0 : i32, i32
  }
  func.func @transform_3(%arg0: i32) -> (i32, i32) {
    %c0_i32 = arith.constant 0 : i32
    %c0_i32_0 = arith.constant 0 : i32
    %c0_i32_1 = arith.constant 0 : i32
    return %c0_i32, %c0_i32_0 : i32, i32
  }
  func.func @transform_4(%arg0: i32) -> (i32, i32, i32) {
    %c0_i32 = arith.constant 0 : i32
    %c0_i32_0 = arith.constant 0 : i32
    %c0_i32_1 = arith.constant 0 : i32
    %c0_i32_2 = arith.constant 0 : i32
    return %c0_i32, %c0_i32_0, %c0_i32_1 : i32, i32, i32
  }
  func.func @transform_5(%arg0: i32) -> (i32, i32) {
    %c0_i32 = arith.constant 0 : i32
    %c0_i32_0 = arith.constant 0 : i32
    %c0_i32_1 = arith.constant 0 : i32
    return %c0_i32, %c0_i32_0 : i32, i32
  }
  func.func @transform_6(%arg0: i32) -> (i32, i32, i32) {
    %c0_i32 = arith.constant 0 : i32
    %c0_i32_0 = arith.constant 0 : i32
    %c0_i32_1 = arith.constant 0 : i32
    %c0_i32_2 = arith.constant 0 : i32
    return %c0_i32, %c0_i32_0, %c0_i32_1 : i32, i32, i32
  }
  func.func @transform_7(%arg0: i32) -> (i32, i32) {
    %c0_i32 = arith.constant 0 : i32
    %c0_i32_0 = arith.constant 0 : i32
    %c0_i32_1 = arith.constant 0 : i32
    return %c0_i32, %c0_i32_0 : i32, i32
  }
  func.func @transform_8(%arg0: i32) -> (i32, i32, i32) {
    %c0_i32 = arith.constant 0 : i32
    %c0_i32_0 = arith.constant 0 : i32
    %c0_i32_1 = arith.constant 0 : i32
    %c0_i32_2 = arith.constant 0 : i32
    return %c0_i32, %c0_i32_0, %c0_i32_1 : i32, i32, i32
  }
  func.func @transform_9(%arg0: i32) -> (i32, i32) {
    %c0_i32 = arith.constant 0 : i32
    %c0_i32_0 = arith.constant 0 : i32
    %c0_i32_1 = arith.constant 0 : i32
    return %c0_i32, %c0_i32_0 : i32, i32
  }
  func.func @transform_10(%arg0: i32) -> (i32, i32) {
    %c0_i32 = arith.constant 0 : i32
    %c0_i32_0 = arith.constant 0 : i32
    %c0_i32_1 = arith.constant 0 : i32
    return %c0_i32, %c0_i32_0 : i32, i32
  }
  func.func @transform_11(%arg0: i32) -> (i32, i32) {
    %c0_i32 = arith.constant 0 : i32
    %c0_i32_0 = arith.constant 0 : i32
    %c0_i32_1 = arith.constant 0 : i32
    return %c0_i32, %c0_i32_0 : i32, i32
  }
  func.func @transform_12(%arg0: i32) -> (i32, i32, i32) {
    %c0_i32 = arith.constant 0 : i32
    %c0_i32_0 = arith.constant 0 : i32
    %c0_i32_1 = arith.constant 0 : i32
    return %arg0, %c0_i32, %c0_i32_0 : i32, i32, i32
  }
}

</mosaic_0001>

<bundles_post_ra>
// kernel: tile.13
= control target key start
LH: loop header
LB: loop body
LE: loop exit
PB: predicated region body
PF: predicated region fallthrough
CT: control target
= control target key end

     0   :  { %s58_s0 = inlined_call_operand.vmem [shape: f32[400], index: 0, kind: input, shape index: {}]   ;;  %s59_s1 = inlined_call_operand.vmem [shape: f32[2,400], index: 1, kind: output, shape index: {}]  }
   0x1   :  { %v4_v0 = vld [vmem:[%s58_s0] ss:$0 sm:$0xff]  ;;  %v18_v1 = vld [vmem:[%s58_s0 + $0x1] ss:$0 sm:$0xff]  ;;  %v20_v2 = vld [vmem:[%s58_s0 + $0x2] ss:$0 sm:$0xff] }
   0x2   :  { %5 = vst [vmem:[%s59_s1] sm:$0x3] %v4_v0  ;;  %19 = vst [vmem:[%s59_s1 + $0x2] sm:$0x3] %v18_v1  ;;  %v22_v3 = vld [vmem:[%s58_s0 + $0x3] ss:$0 sm:$0xff] }
   0x3   :  { %21 = vst [vmem:[%s59_s1 + $0x4] sm:$0x3] %v20_v2  ;;  %23 = vst [vmem:[%s59_s1 + $0x6] sm:$0x3] %v22_v3 }

// kernel: tile.14
= control target key start
LH: loop header
LB: loop body
LE: loop exit
PB: predicated region body
PF: predicated region fallthrough
CT: control target
= control target key end

     0   :  { %vm32_vm0 = vcmask 916480   ;;  %vm23_vm1 = vcmask 130048   ;;  %s59_s17 = smov 16   ;;  %vm39_vm2 = vcmask 261248   ;;  %vm46_vm3 = vcmask 1047680   ;;  %s97_s0 = inlined_call_operand.vmem [shape: f32[2,400], index: 0, kind: input, shape index: {}]   ;;  %s98_s1 = inlined_call_operand.vmem [shape: f32[800], index: 1, kind: output, shape index: {}]  }
   0x1   :  { %v51_v0 = vld [vmem:[%s97_s0 + $0x6] sm:$0x3]  ;;  %v52_v1 = vld [vmem:[%s97_s0 + $0x4] sm:$0x3]  ;;  %v53_v2 = vld [vmem:[%s97_s0 + $0x2] sm:$0x3] }
   0x2   :  { %9 = vst [vmem:[#allocation0 + $0x18] sm:$0x3] %v51_v0  ;;  %14 = vst [vmem:[#allocation0 + $0x10] sm:$0x3] %v52_v1  ;;  %v19_v3 = vld [vmem:[%s97_s0] sm:$0x3] }
   0x3   :  { %18 = vst [vmem:[#allocation0 + $0x8] sm:$0x3] %v53_v2  ;;  %20 = vst [vmem:[#allocation0] sm:$0x3] %v19_v3 }
   0x9   :  { %v31_v4 = vld [vmem:[#allocation0 + $0x19] sm:$0x1]   ;;  %v22_v5 = vld [vmem:[#allocation0 + $0x18] sm:$0x1]  }
   0xa   :  { %v29_v6 = vld [vmem:[#allocation0 + $0x1] ss:$8 sm:$0x7]   ;;  %v26_v7 = vld [vmem:[#allocation0] ss:$8 sm:$0x7]  }
   0xb   :  { %54 = vst.msk [vmem:[%s98_s1 + $0x3] sm:$0x1] %vm23_vm1, %v22_v5   ;;  %v33_v8 = vsel %vm32_vm0, %v31_v4, %v29_v6  ;;  %27 = vst [vmem:[%s98_s1] sm:$0x7] %v26_v7   ;;  %v43_v9 = vld [vmem:[#allocation0 + $0x1] ss:$8 sm:$0x7]  }
   0xc   :  { %34 = vrot.lane.b32.xlu0 %v33_v8, %s59_s17 }
  0x10   :  { %44 = vrot.lane.b32.xlu0 %v43_v9, %s59_s17 }
  0x7e   :  { %v35_v10 = vpop.permute.xlu0 %34  }
  0x7f   :  { %55 = vst.msk [vmem:[%s98_s1 + $0x4] sm:$0x7] %vm23_vm1, %v35_v10  }
  0x80   :  { %56 = vst.msk [vmem:[%s98_s1 + $0x6] sm:$0x1] %vm39_vm2, %v35_v10  }
  0x82   :  { %v45_v11 = vpop.permute.xlu0 %44  }
  0x83   :  { %57 = vst.msk [vmem:[%s98_s1 + $0x3] sm:$0x7] %vm46_vm3, %v45_v11  }

// kernel: resblock_forward.1
= control target key start
LH: loop header
LB: loop body
LE: loop exit
PB: predicated region body
PF: predicated region fallthrough
CT: control target
= control target key end

     0   :  { %v6120_v3 = vmov 0   ;;  %s6121_s27 = smov 127   ;;  %s6122_s30 = smov 126   ;;  %vm87_vm0 = vcmask 1039360   ;;  %vm98_vm1 = vcmask 1041408   ;;  %vm94_vm2 = vcmask 31744   ;;  %s7496_s0 = inlined_call_operand.vmem [shape: f32[1,4,882], index: 0, kind: input, shape index: {}]   ;;  %s7497_s4 = inlined_call_operand.vmem [shape: bf16[9,4,4], index: 4, kind: input, shape index: {}]   ;;  %s7498_s5 = inlined_call_operand.vmem [shape: f32[4,1], index: 5, kind: input, shape index: {}]   ;;  %s7499_s2 = inlined_call_operand.vmem [shape: f32[1,844], index: 2, kind: input, shape index: {}]   ;;  %s7500_s7 = inlined_call_operand.vmem [shape: f32[8,1], index: 7, kind: input, shape index: {}]   ;;  %s7501_s6 = inlined_call_operand.vmem [shape: bf16[9,8,4], index: 6, kind: input, shape index: {}]   ;;  %s7502_s3 = inlined_call_operand.vmem [shape: f32[1,806], index: 3, kind: input, shape index: {}]   ;;  %s7503_s11 = inlined_call_operand.vmem [shape: f32[4,1], index: 11, kind: input, shape index: {}]   ;;  %s7504_s9 = inlined_call_operand.vmem [shape: f32[4,1], index: 9, kind: input, shape index: {}]   ;;  %s7505_s8 = inlined_call_operand.vmem [shape: bf16[9,4,8], index: 8, kind: input, shape index: {}]   ;;  %s7506_s10 = inlined_call_operand.vmem [shape: bf16[4,4], index: 10, kind: input, shape index: {}]   ;;  %s7507_s1 = inlined_call_operand.vmem [shape: f32[1,4,768], index: 1, kind: input, shape index: {}]   ;;  %s7508_s12 = inlined_call_operand.vmem [shape: f32[1,4,768], index: 12, kind: output, shape index: {}]  }
   0x1   :  { %v43_v0 = vld [vmem:[%s7496_s0 + $0x8] sm:$0xff]  ;;  %v42_v1 = vld [vmem:[%s7496_s0] sm:$0xff]  ;;  %v44_v2 = vld [vmem:[%s7496_s0 + $0x10] sm:$0xff]  ;;  %152 = vmatprep.mubr.bf16.mxu0 %v6120_v3  ;;  %193 = vmatprep.mubr.bf16.mxu1 %v6120_v3  ;;  %s6124_s13 = smov 109   ;;  %s6125_s14 = smov 108   ;;  %v6129_v30 = vmov 0.0  }
   0x2   :  { %v6207_v4 = vpack.c.bf16 %v43_v0, %v43_v0  ;;  %v6209_v5 = vpack.c.bf16 %v42_v1, %v42_v1  ;;  %v50_v6 = vcombine.high %v43_v0, %v43_v0  ;;  %v49_v7 = vcombine.high %v42_v1, %v42_v1  ;;  %6115 = vset.pattern.permute.xlu0 %v6120_v3  ;;  %v45_v13 = vld [vmem:[%s7496_s0 + $0x18] sm:$0xf]  ;;  %s6123_s0 = smov 110   ;;  %s6126_s15 = smov 92   ;;  %v5750_v22 = vld [vmem:[%s7497_s4 + $0x2] sm:$0x3] }
   0x3   :  { %6116 = vset.pattern.permute.xlu1 %v6120_v3  ;;  %v51_v10 = vcombine.high %v44_v2, %v44_v2  ;;  %v6227_v12 = vpack.c.bf16 %v44_v2, %v44_v2  ;;  %v6236_v14 = vpack.c.bf16 %v45_v13, %v45_v13  ;;  %s6127_s16 = smov 91   ;;  %s6128_s17 = smov 90   ;;  %vm6130_vm3 = vmmov 0   ;;  %v63_v41 = vld [vmem:[%s7497_s4] sm:$0x3] }
   0x4   :  { %77 = vrot.lane.b32.xlu1 %v6207_v4, %s6121_s27  ;;  %73 = vrot.lane.b32.xlu0 %v6209_v5, %s6121_s27  ;;  %v6217_v8 = vpack.c.bf16 %v50_v6, %v50_v6  ;;  %v6219_v9 = vpack.c.bf16 %v49_v7, %v49_v7  ;;  %v287_v35 = vsel %vm98_vm1, %v6209_v5, 0  ;;  %v293_v38 = vsel %vm98_vm1, %v6207_v4, 0  ;;  %v5765_v60 = vld [vmem:[%s7497_s4 + $0x4] sm:$0x3] }
   0x5   :  { %v6225_v11 = vpack.c.bf16 %v51_v10, %v51_v10  ;;  %vm486_vm4 = vcmask 1031168   ;;  %v299_v42 = vsel %vm98_vm1, %v6227_v12, 0  ;;  %v305_v46 = vsel %vm98_vm1, %v6236_v14, 0 }
   0x6   :  { %vm703_vm5 = vcmask 900096   ;;  %vm920_vm6 = vcmask 891904   ;;  %vm1137_vm7 = vcmask 883712   ;;  %vm1354_vm8 = vcmask 752640  }
   0x7   :  { %vm1571_vm9 = vcmask 744448   ;;  %vm1788_vm10 = vcmask 736256   ;;  %vm4066_vm11 = vcmask 1043456   ;;  %vm4062_vm12 = vcmask 64512  }
   0x8   :  { %79 = vrot.lane.b32.xlu1 %v6217_v8, %s6121_s27  ;;  %75 = vrot.lane.b32.xlu0 %v6219_v9, %s6121_s27 }
   0xc   :  { %83 = vrot.lane.b32.xlu1 %v6225_v11, %s6121_s27  ;;  %81 = vrot.lane.b32.xlu0 %v6227_v12, %s6121_s27 }
  0x10   :  { %85 = vrot.lane.b32.xlu0 %v6236_v14, %s6121_s27  ;;  %472 = vrot.lane.b32.xlu1 %v6209_v5, %s6122_s30 }
  0x14   :  { %476 = vrot.lane.b32.xlu1 %v6207_v4, %s6122_s30  ;;  %474 = vrot.lane.b32.xlu0 %v6219_v9, %s6122_s30 }
  0x18   :  { %480 = vrot.lane.b32.xlu1 %v6227_v12, %s6122_s30  ;;  %478 = vrot.lane.b32.xlu0 %v6217_v8, %s6122_s30 }
  0x1c   :  { %484 = vrot.lane.b32.xlu1 %v6236_v14, %s6122_s30  ;;  %482 = vrot.lane.b32.xlu0 %v6225_v11, %s6122_s30 }
  0x20   :  { %689 = vrot.lane.b32.xlu0 %v6209_v5, %s6123_s0  ;;  %691 = vrot.lane.b32.xlu1 %v6219_v9, %s6123_s0 }
  0x24   :  { %693 = vrot.lane.b32.xlu0 %v6207_v4, %s6123_s0  ;;  %695 = vrot.lane.b32.xlu1 %v6217_v8, %s6123_s0 }
  0x28   :  { %697 = vrot.lane.b32.xlu0 %v6227_v12, %s6123_s0  ;;  %699 = vrot.lane.b32.xlu1 %v6225_v11, %s6123_s0 }
  0x2c   :  { %701 = vrot.lane.b32.xlu0 %v6236_v14, %s6123_s0  ;;  %906 = vrot.lane.b32.xlu1 %v6209_v5, %s6124_s13 }
  0x30   :  { %910 = vrot.lane.b32.xlu1 %v6207_v4, %s6124_s13  ;;  %908 = vrot.lane.b32.xlu0 %v6219_v9, %s6124_s13 }
  0x34   :  { %914 = vrot.lane.b32.xlu1 %v6227_v12, %s6124_s13  ;;  %912 = vrot.lane.b32.xlu0 %v6217_v8, %s6124_s13 }
  0x38   :  { %918 = vrot.lane.b32.xlu1 %v6236_v14, %s6124_s13  ;;  %916 = vrot.lane.b32.xlu0 %v6225_v11, %s6124_s13 }
  0x3c   :  { %1123 = vrot.lane.b32.xlu0 %v6209_v5, %s6125_s14  ;;  %1125 = vrot.lane.b32.xlu1 %v6219_v9, %s6125_s14 }
  0x40   :  { %1127 = vrot.lane.b32.xlu0 %v6207_v4, %s6125_s14  ;;  %1129 = vrot.lane.b32.xlu1 %v6217_v8, %s6125_s14 }
  0x44   :  { %1131 = vrot.lane.b32.xlu0 %v6227_v12, %s6125_s14  ;;  %1133 = vrot.lane.b32.xlu1 %v6225_v11, %s6125_s14 }
  0x48   :  { %1135 = vrot.lane.b32.xlu0 %v6236_v14, %s6125_s14  ;;  %1340 = vrot.lane.b32.xlu1 %v6209_v5, %s6126_s15 }
  0x4c   :  { %1344 = vrot.lane.b32.xlu1 %v6207_v4, %s6126_s15  ;;  %1342 = vrot.lane.b32.xlu0 %v6219_v9, %s6126_s15 }
  0x50   :  { %1348 = vrot.lane.b32.xlu1 %v6227_v12, %s6126_s15  ;;  %1346 = vrot.lane.b32.xlu0 %v6217_v8, %s6126_s15 }
  0x54   :  { %1352 = vrot.lane.b32.xlu1 %v6236_v14, %s6126_s15  ;;  %1350 = vrot.lane.b32.xlu0 %v6225_v11, %s6126_s15 }
  0x58   :  { %1557 = vrot.lane.b32.xlu0 %v6209_v5, %s6127_s16  ;;  %1559 = vrot.lane.b32.xlu1 %v6219_v9, %s6127_s16 }
  0x5c   :  { %1561 = vrot.lane.b32.xlu0 %v6207_v4, %s6127_s16  ;;  %1563 = vrot.lane.b32.xlu1 %v6217_v8, %s6127_s16 }
  0x60   :  { %1565 = vrot.lane.b32.xlu0 %v6227_v12, %s6127_s16  ;;  %1567 = vrot.lane.b32.xlu1 %v6225_v11, %s6127_s16 }
  0x64   :  { %1569 = vrot.lane.b32.xlu0 %v6236_v14, %s6127_s16  ;;  %1774 = vrot.lane.b32.xlu1 %v6209_v5, %s6128_s17 }
  0x68   :  { %1778 = vrot.lane.b32.xlu1 %v6207_v4, %s6128_s17  ;;  %1776 = vrot.lane.b32.xlu0 %v6219_v9, %s6128_s17 }
  0x6c   :  { %1782 = vrot.lane.b32.xlu1 %v6227_v12, %s6128_s17  ;;  %1780 = vrot.lane.b32.xlu0 %v6217_v8, %s6128_s17 }
  0x70   :  { %1786 = vrot.lane.b32.xlu1 %v6236_v14, %s6128_s17  ;;  %1784 = vrot.lane.b32.xlu0 %v6225_v11, %s6128_s17 }
  0x76   :  { %v78_v15 = vpop.permute.xlu1 %77  ;;  %v74_v16 = vpop.permute.xlu0 %73 }
  0x7a   :  { %v80_v17 = vpop.permute.xlu1 %79  ;;  %v76_v18 = vpop.permute.xlu0 %75 }
  0x7b   :  { %v89_v19 = vsel %vm87_vm0, %v76_v18, %v78_v15  ;;  %v88_v20 = vsel %vm87_vm0, %v74_v16, %v76_v18  ;;  %v90_v23 = vsel %vm87_vm0, %v78_v15, %v80_v17  ;;  %v5773_v16 = vld [vmem:[%s7497_s4 + $0x6] sm:$0x3] }
  0x7c   :  { %5751 = vmatprep.subr.msk.bf16.mxu0 %vm98_vm1, %v89_v19  ;;  %v100_v21 = vsel %vm98_vm1, %v88_v20, 0  ;;  %v106_v27 = vsel %vm98_vm1, %v90_v23, 0 }
  0x7d   :  { %135 = vmatpush1.bf16.msra.mxu0 %v100_v21 }
  0x7e   :  { %v84_v24 = vpop.permute.xlu1 %83  ;;  %v82_v25 = vpop.permute.xlu0 %81 }
  0x7f   :  { %v91_v26 = vsel %vm87_vm0, %v80_v17, %v82_v25  ;;  %v92_v28 = vsel %vm87_vm0, %v82_v25, %v84_v24 }
  0x80   :  { %5752 = vmatmul.mubr.msk.bf16.vlgmr.msra.gmra.mxu0 %vm94_vm2, %v5750_v22  ;;  %5753 = vmatprep.subr.msk.bf16.mxu1 %vm98_vm1, %v91_v26  ;;  %v112_v34 = vsel %vm98_vm1, %v92_v28, 0 }
  0x81   :  { %176 = vmatpush1.bf16.msra.mxu1 %v106_v27  ;;  %234 = vmatprep.mubr.bf16.mxu0 %v6120_v3 }
  0x82   :  { %v86_v29 = vpop.permute.xlu0 %85  ;;  %5996 = vmatprep.subr.bf16.mxu1 %v6129_v30  ;;  %v473_v31 = vpop.permute.xlu1 %472 }
  0x83   :  { %v93_v32 = vsel %vm87_vm0, %v84_v24, %v86_v29  ;;  %v118_v33 = vsel %vm98_vm1, %v86_v29, 0 }
  0x84   :  { %5754 = vmatmul.mubr.msk.bf16.vlgmr.msra.gmra.mxu1 %vm94_vm2, %v5750_v22  ;;  %5755 = vmatprep.subr.msk.bf16.mxu0 %vm98_vm1, %v93_v32 }
  0x85   :  { %217 = vmatpush1.bf16.msra.mxu0 %v112_v34  ;;  %5997 = vmatpush3.bf16.msra.mxu1 %v118_v33 }
  0x86   :  { %5998 = vmatprep.mubr.msk.bf16.mxu1 %vm6130_vm3, %v6129_v30  ;;  %5758 = vmatprep.subr.msk.bf16.mxu0 %vm98_vm1, %v6219_v9  ;;  %v477_v36 = vpop.permute.xlu1 %476  ;;  %v475_v37 = vpop.permute.xlu0 %474 }
  0x87   :  { %5760 = vmatprep.subr.msk.bf16.mxu1 %vm98_vm1, %v6217_v8  ;;  %v488_v45 = vsel %vm486_vm4, %v475_v37, %v477_v36  ;;  %v487_v49 = vsel %vm486_vm4, %v473_v31, %v475_v37 }
  0x88   :  { %5756 = vmatmul.mubr.msk.bf16.vlgmr.msra.gmra.mxu0 %vm94_vm2, %v5750_v22  ;;  %v497_v51 = vsel %vm98_vm1, %v487_v49, 0  ;;  %v1989_v49 = vld [vmem:[%s7498_s5] sm:$0xf] }
  0x89   :  { %322 = vmatpush1.bf16.msra.mxu0 %v287_v35  ;;  %339 = vmatprep.mubr.bf16.mxu0 %v6120_v3 }
  0x8a   :  { %5762 = vmatprep.subr.msk.bf16.mxu0 %vm98_vm1, %v6225_v11  ;;  %v481_v39 = vpop.permute.xlu1 %480  ;;  %v479_v40 = vpop.permute.xlu0 %478  ;;  %1992 = vperm.xlu0 %6115, %v1989_v49  }
  0x8b   :  { %v490_v50 = vsel %vm486_vm4, %v479_v40, %v481_v39  ;;  %v489_v54 = vsel %vm486_vm4, %v477_v36, %v479_v40  ;;  %v5781_v36 = vld [vmem:[%s7497_s4 + $0x8] sm:$0x3] }
  0x8c   :  { %5999 = vmatmul.mubr.msk.bf16.vlgmr.msra.gmra.mxu1 %vm94_vm2, %v5750_v22  ;;  %v503_v56 = vsel %vm98_vm1, %v489_v54, 0  ;;  %v5789_v54 = vld [vmem:[%s7497_s4 + $0xa] sm:$0x3] }
  0x8d   :  { %363 = vmatpush1.bf16.msra.mxu1 %v293_v38  ;;  %380 = vmatprep.mubr.bf16.mxu1 %v6120_v3 }
  0x8e   :  { %6002 = vmatprep.subr.bf16.mxu1 %v6129_v30  ;;  %v485_v43 = vpop.permute.xlu1 %484  ;;  %v483_v44 = vpop.permute.xlu0 %482 }
  0x8f   :  { %v492_v55 = vsel %vm486_vm4, %v483_v44, %v485_v43  ;;  %v491_v59 = vsel %vm486_vm4, %v481_v39, %v483_v44  ;;  %v515_v1 = vsel %vm98_vm1, %v485_v43, 0 }
  0x90   :  { %5759 = vmatmul.mubr.msk.bf16.vlgmr.msra.gmra.mxu0 %vm94_vm2, %v63_v41  ;;  %v509_v61 = vsel %vm98_vm1, %v491_v59, 0 }
  0x91   :  { %404 = vmatpush1.bf16.msra.mxu0 %v299_v42  ;;  %421 = vmatprep.mubr.bf16.mxu0 %v6120_v3 }
  0x92   :  { %5766 = vmatprep.subr.msk.bf16.mxu0 %vm98_vm1, %v488_v45  ;;  %v690_v47 = vpop.permute.xlu0 %689  ;;  %v692_v48 = vpop.permute.xlu1 %691 }
  0x93   :  { %v704_v5 = vsel %vm703_vm5, %v690_v47, %v692_v48 }
  0x94   :  { %5761 = vmatmul.mubr.msk.bf16.vlgmr.msra.gmra.mxu1 %vm94_vm2, %v63_v41  ;;  %v714_v7 = vsel %vm98_vm1, %v704_v5, 0 }
  0x95   :  { %6003 = vmatpush3.bf16.msra.mxu1 %v305_v46  ;;  %6004 = vmatprep.mubr.msk.bf16.mxu1 %vm6130_vm3, %v6129_v30 }
  0x96   :  { %5768 = vmatprep.subr.msk.bf16.mxu1 %vm98_vm1, %v490_v50  ;;  %v694_v52 = vpop.permute.xlu0 %693  ;;  %v696_v53 = vpop.permute.xlu1 %695 }
  0x97   :  { %v705_v0 = vsel %vm703_vm5, %v692_v48, %v694_v52  ;;  %v706_v10 = vsel %vm703_vm5, %v694_v52, %v696_v53 }
  0x98   :  { %5763 = vmatmul.mubr.msk.bf16.vlgmr.msra.gmra.mxu0 %vm94_vm2, %v63_v41  ;;  %v720_v12 = vsel %vm98_vm1, %v706_v10, 0 }
  0x99   :  { %532 = vmatpush1.bf16.msra.mxu0 %v497_v51  ;;  %549 = vmatprep.mubr.bf16.mxu0 %v6120_v3 }
  0x9a   :  { %5770 = vmatprep.subr.msk.bf16.mxu0 %vm98_vm1, %v492_v55  ;;  %v698_v57 = vpop.permute.xlu0 %697  ;;  %v700_v58 = vpop.permute.xlu1 %699 }
  0x9b   :  { %v707_v6 = vsel %vm703_vm5, %v696_v53, %v698_v57  ;;  %v708_v15 = vsel %vm703_vm5, %v698_v57, %v700_v58 }
  0x9c   :  { %6005 = vmatmul.mubr.msk.bf16.vlgmr.msra.gmra.mxu1 %vm94_vm2, %v63_v41  ;;  %v726_v17 = vsel %vm98_vm1, %v708_v15, 0 }
  0x9d   :  { %573 = vmatpush1.bf16.msra.mxu1 %v503_v56  ;;  %590 = vmatprep.mubr.bf16.mxu1 %v6120_v3 }
  0x9e   :  { %6008 = vmatprep.subr.bf16.mxu1 %v6129_v30  ;;  %v702_v62 = vpop.permute.xlu0 %701  ;;  %v907_v63 = vpop.permute.xlu1 %906 }
  0x9f   :  { %v709_v11 = vsel %vm703_vm5, %v700_v58, %v702_v62  ;;  %v732_v21 = vsel %vm98_vm1, %v702_v62, 0 }
  0xa0   :  { %5767 = vmatmul.mubr.msk.bf16.vlgmr.msra.gmra.mxu0 %vm94_vm2, %v5765_v60 }
  0xa1   :  { %614 = vmatpush1.bf16.msra.mxu0 %v509_v61  ;;  %631 = vmatprep.mubr.bf16.mxu0 %v6120_v3 }
  0xa2   :  { %5774 = vmatprep.subr.msk.bf16.mxu0 %vm98_vm1, %v705_v0  ;;  %v911_v2 = vpop.permute.xlu1 %910  ;;  %v909_v4 = vpop.permute.xlu0 %908 }
  0xa3   :  { %v922_v20 = vsel %vm920_vm6, %v909_v4, %v911_v2  ;;  %v921_v24 = vsel %vm920_vm6, %v907_v63, %v909_v4 }
  0xa4   :  { %5769 = vmatmul.mubr.msk.bf16.vlgmr.msra.gmra.mxu1 %vm94_vm2, %v5765_v60  ;;  %v931_v26 = vsel %vm98_vm1, %v921_v24, 0 }
  0xa5   :  { %6009 = vmatpush3.bf16.msra.mxu1 %v515_v1  ;;  %6010 = vmatprep.mubr.msk.bf16.mxu1 %vm6130_vm3, %v6129_v30 }
  0xa6   :  { %5776 = vmatprep.subr.msk.bf16.mxu1 %vm98_vm1, %v707_v6  ;;  %v915_v8 = vpop.permute.xlu1 %914  ;;  %v913_v9 = vpop.permute.xlu0 %912 }
  0xa7   :  { %v924_v25 = vsel %vm920_vm6, %v913_v9, %v915_v8  ;;  %v923_v29 = vsel %vm920_vm6, %v911_v2, %v913_v9 }
  0xa8   :  { %5771 = vmatmul.mubr.msk.bf16.vlgmr.msra.gmra.mxu0 %vm94_vm2, %v5765_v60  ;;  %v937_v32 = vsel %vm98_vm1, %v923_v29, 0 }
  0xa9   :  { %749 = vmatpush1.bf16.msra.mxu0 %v714_v7  ;;  %766 = vmatprep.mubr.bf16.mxu0 %v6120_v3  ;;  %v5797_v7 = vld [vmem:[%s7497_s4 + $0xc] sm:$0x3] }
  0xaa   :  { %5778 = vmatprep.subr.msk.bf16.mxu0 %vm98_vm1, %v709_v11  ;;  %v919_v13 = vpop.permute.xlu1 %918  ;;  %v917_v14 = vpop.permute.xlu0 %916 }
  0xab   :  { %v926_v31 = vsel %vm920_vm6, %v917_v14, %v919_v13  ;;  %v925_v34 = vsel %vm920_vm6, %v915_v8, %v917_v14  ;;  %v949_v41 = vsel %vm98_vm1, %v919_v13, 0 }
  0xac   :  { %6011 = vmatmul.mubr.msk.bf16.vlgmr.msra.gmra.mxu1 %vm94_vm2, %v5765_v60  ;;  %v943_v37 = vsel %vm98_vm1, %v925_v34, 0 }
  0xad   :  { %790 = vmatpush1.bf16.msra.mxu1 %v720_v12  ;;  %807 = vmatprep.mubr.bf16.mxu1 %v6120_v3 }
  0xae   :  { %6014 = vmatprep.subr.bf16.mxu1 %v6129_v30  ;;  %v1124_v18 = vpop.permute.xlu0 %1123  ;;  %v1126_v19 = vpop.permute.xlu1 %1125 }
  0xaf   :  { %v1138_v42 = vsel %vm1137_vm7, %v1124_v18, %v1126_v19 }
  0xb0   :  { %5775 = vmatmul.mubr.msk.bf16.vlgmr.msra.gmra.mxu0 %vm94_vm2, %v5773_v16  ;;  %v1148_v44 = vsel %vm98_vm1, %v1138_v42, 0 }
  0xb1   :  { %831 = vmatpush1.bf16.msra.mxu0 %v726_v17  ;;  %848 = vmatprep.mubr.bf16.mxu0 %v6120_v3 }
  0xb2   :  { %5782 = vmatprep.subr.msk.bf16.mxu0 %vm98_vm1, %v922_v20  ;;  %v1128_v22 = vpop.permute.xlu0 %1127  ;;  %v1130_v23 = vpop.permute.xlu1 %1129 }
  0xb3   :  { %v1139_v38 = vsel %vm1137_vm7, %v1126_v19, %v1128_v22  ;;  %v1140_v47 = vsel %vm1137_vm7, %v1128_v22, %v1130_v23 }
  0xb4   :  { %5777 = vmatmul.mubr.msk.bf16.vlgmr.msra.gmra.mxu1 %vm94_vm2, %v5773_v16  ;;  %v1154_v50 = vsel %vm98_vm1, %v1140_v47, 0 }
  0xb5   :  { %6015 = vmatpush3.bf16.msra.mxu1 %v732_v21  ;;  %6016 = vmatprep.mubr.msk.bf16.mxu1 %vm6130_vm3, %v6129_v30 }
  0xb6   :  { %5784 = vmatprep.subr.msk.bf16.mxu1 %vm98_vm1, %v924_v25  ;;  %v1132_v27 = vpop.permute.xlu0 %1131  ;;  %v1134_v28 = vpop.permute.xlu1 %1133 }
  0xb7   :  { %v1141_v43 = vsel %vm1137_vm7, %v1130_v23, %v1132_v27  ;;  %v1142_v51 = vsel %vm1137_vm7, %v1132_v27, %v1134_v28  ;;  %v5805_v23 = vld [vmem:[%s7497_s4 + $0xe] sm:$0x3] }
  0xb8   :  { %5779 = vmatmul.mubr.msk.bf16.vlgmr.msra.gmra.mxu0 %vm94_vm2, %v5773_v16  ;;  %v1160_v55 = vsel %vm98_vm1, %v1142_v51, 0 }
  0xb9   :  { %966 = vmatpush1.bf16.msra.mxu0 %v931_v26  ;;  %983 = vmatprep.mubr.bf16.mxu0 %v6120_v3 }
  0xba   :  { %5786 = vmatprep.subr.msk.bf16.mxu0 %vm98_vm1, %v926_v31  ;;  %v1341_v33 = vpop.permute.xlu1 %1340  ;;  %v1136_v35 = vpop.permute.xlu0 %1135 }
  0xbb   :  { %v1143_v48 = vsel %vm1137_vm7, %v1134_v28, %v1136_v35  ;;  %v1166_v58 = vsel %vm98_vm1, %v1136_v35, 0 }
  0xbc   :  { %6017 = vmatmul.mubr.msk.bf16.vlgmr.msra.gmra.mxu1 %vm94_vm2, %v5773_v16 }
  0xbd   :  { %1007 = vmatpush1.bf16.msra.mxu1 %v937_v32  ;;  %1024 = vmatprep.mubr.bf16.mxu1 %v6120_v3 }
  0xbe   :  { %6020 = vmatprep.subr.bf16.mxu1 %v6129_v30  ;;  %v1345_v39 = vpop.permute.xlu1 %1344  ;;  %v1343_v40 = vpop.permute.xlu0 %1342 }
  0xbf   :  { %v1356_v56 = vsel %vm1354_vm8, %v1343_v40, %v1345_v39  ;;  %v1355_v60 = vsel %vm1354_vm8, %v1341_v33, %v1343_v40 }
  0xc0   :  { %5783 = vmatmul.mubr.msk.bf16.vlgmr.msra.gmra.mxu0 %vm94_vm2, %v5781_v36  ;;  %v1365_v62 = vsel %vm98_vm1, %v1355_v60, 0 }
  0xc1   :  { %1048 = vmatpush1.bf16.msra.mxu0 %v943_v37  ;;  %1065 = vmatprep.mubr.bf16.mxu0 %v6120_v3 }
  0xc2   :  { %5790 = vmatprep.subr.msk.bf16.mxu0 %vm98_vm1, %v1139_v38  ;;  %v1349_v45 = vpop.permute.xlu1 %1348  ;;  %v1347_v46 = vpop.permute.xlu0 %1346 }
  0xc3   :  { %v1358_v61 = vsel %vm1354_vm8, %v1347_v46, %v1349_v45  ;;  %v1357_v0 = vsel %vm1354_vm8, %v1345_v39, %v1347_v46  ;;  %v5813_v39 = vld [vmem:[%s7497_s4 + $0x10] sm:$0x3] }
  0xc4   :  { %5785 = vmatmul.mubr.msk.bf16.vlgmr.msra.gmra.mxu1 %vm94_vm2, %v5781_v36  ;;  %v1371_v4 = vsel %vm98_vm1, %v1357_v0, 0 }
  0xc5   :  { %6021 = vmatpush3.bf16.msra.mxu1 %v949_v41  ;;  %6022 = vmatprep.mubr.msk.bf16.mxu1 %vm6130_vm3, %v6129_v30 }
  0xc6   :  { %5792 = vmatprep.subr.msk.bf16.mxu1 %vm98_vm1, %v1141_v43  ;;  %v1353_v52 = vpop.permute.xlu1 %1352  ;;  %v1351_v53 = vpop.permute.xlu0 %1350 }
  0xc7   :  { %v1360_v1 = vsel %vm1354_vm8, %v1351_v53, %v1353_v52  ;;  %v1359_v5 = vsel %vm1354_vm8, %v1349_v45, %v1351_v53  ;;  %v1383_v11 = vsel %vm98_vm1, %v1353_v52, 0 }
  0xc8   :  { %5787 = vmatmul.mubr.msk.bf16.vlgmr.msra.gmra.mxu0 %vm94_vm2, %v5781_v36  ;;  %v1377_v8 = vsel %vm98_vm1, %v1359_v5, 0 }
  0xc9   :  { %1183 = vmatpush1.bf16.msra.mxu0 %v1148_v44  ;;  %1200 = vmatprep.mubr.bf16.mxu0 %v6120_v3 }
  0xca   :  { %5794 = vmatprep.subr.msk.bf16.mxu0 %vm98_vm1, %v1143_v48  ;;  %v1560_v57 = vpop.permute.xlu1 %1559  ;;  %v1558_v59 = vpop.permute.xlu0 %1557 }
  0xcb   :  { %v1572_v13 = vsel %vm1571_vm9, %v1558_v59, %v1560_v57 }
  0xcc   :  { %6023 = vmatmul.mubr.msk.bf16.vlgmr.msra.gmra.mxu1 %vm94_vm2, %v5781_v36  ;;  %v1582_v16 = vsel %vm98_vm1, %v1572_v13, 0 }
  0xcd   :  { %1224 = vmatpush1.bf16.msra.mxu1 %v1154_v50  ;;  %1241 = vmatprep.mubr.bf16.mxu1 %v6120_v3 }
  0xce   :  { %6026 = vmatprep.subr.bf16.mxu1 %v6129_v30  ;;  %v1564_v63 = vpop.permute.xlu1 %1563  ;;  %v1562_v2 = vpop.permute.xlu0 %1561 }
  0xcf   :  { %v1573_v10 = vsel %vm1571_vm9, %v1560_v57, %v1562_v2  ;;  %v1574_v17 = vsel %vm1571_vm9, %v1562_v2, %v1564_v63 }
  0xd0   :  { %5791 = vmatmul.mubr.msk.bf16.vlgmr.msra.gmra.mxu0 %vm94_vm2, %v5789_v54  ;;  %v1588_v21 = vsel %vm98_vm1, %v1574_v17, 0 }
  0xd1   :  { %1265 = vmatpush1.bf16.msra.mxu0 %v1160_v55  ;;  %1282 = vmatprep.mubr.bf16.mxu0 %v6120_v3 }
  0xd2   :  { %5798 = vmatprep.subr.msk.bf16.mxu0 %vm98_vm1, %v1356_v56  ;;  %v1568_v6 = vpop.permute.xlu1 %1567  ;;  %v1566_v9 = vpop.permute.xlu0 %1565 }
  0xd3   :  { %v1575_v14 = vsel %vm1571_vm9, %v1564_v63, %v1566_v9  ;;  %v1576_v22 = vsel %vm1571_vm9, %v1566_v9, %v1568_v6 }
  0xd4   :  { %5793 = vmatmul.mubr.msk.bf16.vlgmr.msra.gmra.mxu1 %vm94_vm2, %v5789_v54  ;;  %v1594_v24 = vsel %vm98_vm1, %v1576_v22, 0 }
  0xd5   :  { %6027 = vmatpush3.bf16.msra.mxu1 %v1166_v58  ;;  %6028 = vmatprep.mubr.msk.bf16.mxu1 %vm6130_vm3, %v6129_v30 }
  0xd6   :  { %5800 = vmatprep.subr.msk.bf16.mxu1 %vm98_vm1, %v1358_v61  ;;  %v1775_v12 = vpop.permute.xlu1 %1774  ;;  %v1570_v15 = vpop.permute.xlu0 %1569 }
  0xd7   :  { %v1577_v18 = vsel %vm1571_vm9, %v1568_v6, %v1570_v15  ;;  %v1600_v28 = vsel %vm98_vm1, %v1570_v15, 0 }
  0xd8   :  { %5795 = vmatmul.mubr.msk.bf16.vlgmr.msra.gmra.mxu0 %vm94_vm2, %v5789_v54 }
  0xd9   :  { %1400 = vmatpush1.bf16.msra.mxu0 %v1365_v62  ;;  %1417 = vmatprep.mubr.bf16.mxu0 %v6120_v3 }
  0xda   :  { %5802 = vmatprep.subr.msk.bf16.mxu0 %vm98_vm1, %v1360_v1  ;;  %v1779_v19 = vpop.permute.xlu1 %1778  ;;  %v1777_v20 = vpop.permute.xlu0 %1776 }
  0xdb   :  { %v1790_v27 = vsel %vm1788_vm10, %v1777_v20, %v1779_v19  ;;  %v1789_v29 = vsel %vm1788_vm10, %v1775_v12, %v1777_v20 }
  0xdc   :  { %6029 = vmatmul.mubr.msk.bf16.vlgmr.msra.gmra.mxu1 %vm94_vm2, %v5789_v54  ;;  %v1799_v34 = vsel %vm98_vm1, %v1789_v29, 0 }
  0xdd   :  { %1441 = vmatpush1.bf16.msra.mxu1 %v1371_v4  ;;  %1458 = vmatprep.mubr.bf16.mxu1 %v6120_v3 }
  0xde   :  { %6032 = vmatprep.subr.bf16.mxu1 %v6129_v30  ;;  %v1783_v25 = vpop.permute.xlu1 %1782  ;;  %v1781_v26 = vpop.permute.xlu0 %1780 }
  0xdf   :  { %v1792_v31 = vsel %vm1788_vm10, %v1781_v26, %v1783_v25  ;;  %v1791_v35 = vsel %vm1788_vm10, %v1779_v19, %v1781_v26 }
  0xe0   :  { %5799 = vmatmul.mubr.msk.bf16.vlgmr.msra.gmra.mxu0 %vm94_vm2, %v5797_v7  ;;  %v1805_v37 = vsel %vm98_vm1, %v1791_v35, 0 }
  0xe1   :  { %1482 = vmatpush1.bf16.msra.mxu0 %v1377_v8  ;;  %1499 = vmatprep.mubr.bf16.mxu0 %v6120_v3 }
  0xe2   :  { %5806 = vmatprep.subr.msk.bf16.mxu0 %vm98_vm1, %v1573_v10  ;;  %v1787_v32 = vpop.permute.xlu1 %1786  ;;  %v1785_v33 = vpop.permute.xlu0 %1784 }
  0xe3   :  { %v1794_v36 = vsel %vm1788_vm10, %v1785_v33, %v1787_v32  ;;  %v1793_v38 = vsel %vm1788_vm10, %v1783_v25, %v1785_v33  ;;  %v1817_v41 = vsel %vm98_vm1, %v1787_v32, 0 }
  0xe4   :  { %5801 = vmatmul.mubr.msk.bf16.vlgmr.msra.gmra.mxu1 %vm94_vm2, %v5797_v7  ;;  %v1811_v40 = vsel %vm98_vm1, %v1793_v38, 0 }
  0xe5   :  { %6033 = vmatpush3.bf16.msra.mxu1 %v1383_v11  ;;  %6034 = vmatprep.mubr.msk.bf16.mxu1 %vm6130_vm3, %v6129_v30 }
  0xe6   :  { %5808 = vmatprep.subr.msk.bf16.mxu1 %vm98_vm1, %v1575_v14 }
  0xe8   :  { %5803 = vmatmul.mubr.msk.bf16.vlgmr.msra.gmra.mxu0 %vm94_vm2, %v5797_v7 }
  0xe9   :  { %1617 = vmatpush1.bf16.msra.mxu0 %v1582_v16  ;;  %1634 = vmatprep.mubr.bf16.mxu0 %v6120_v3 }
  0xea   :  { %5810 = vmatprep.subr.msk.bf16.mxu0 %vm98_vm1, %v1577_v18 }
  0xec   :  { %6035 = vmatmul.mubr.msk.bf16.vlgmr.msra.gmra.mxu1 %vm94_vm2, %v5797_v7 }
  0xed   :  { %1658 = vmatpush1.bf16.msra.mxu1 %v1588_v21  ;;  %1675 = vmatprep.mubr.bf16.mxu1 %v6120_v3 }
  0xee   :  { %6038 = vmatprep.subr.bf16.mxu1 %v6129_v30 }
  0xf0   :  { %5807 = vmatmul.mubr.msk.bf16.vlgmr.msra.gmra.mxu0 %vm94_vm2, %v5805_v23 }
  0xf1   :  { %1699 = vmatpush1.bf16.msra.mxu0 %v1594_v24  ;;  %1716 = vmatprep.mubr.bf16.mxu0 %v6120_v3 }
  0xf2   :  { %5814 = vmatprep.subr.msk.bf16.mxu0 %vm98_vm1, %v1790_v27 }
  0xf4   :  { %5809 = vmatmul.mubr.msk.bf16.vlgmr.msra.gmra.mxu1 %vm94_vm2, %v5805_v23 }
  0xf5   :  { %6039 = vmatpush3.bf16.msra.mxu1 %v1600_v28  ;;  %6040 = vmatprep.mubr.msk.bf16.mxu1 %vm6130_vm3, %v6129_v30 }
  0xf6   :  { %5816 = vmatprep.subr.msk.bf16.mxu1 %vm98_vm1, %v1792_v31 }
  0xf8   :  { %5811 = vmatmul.mubr.msk.bf16.vlgmr.msra.gmra.mxu0 %vm94_vm2, %v5805_v23 }
  0xf9   :  { %1834 = vmatpush1.bf16.msra.mxu0 %v1799_v34  ;;  %1851 = vmatprep.mubr.bf16.mxu0 %v6120_v3 }
  0xfa   :  { %5818 = vmatprep.subr.msk.bf16.mxu0 %vm98_vm1, %v1794_v36 }
  0xfc   :  { %6041 = vmatmul.mubr.msk.bf16.vlgmr.msra.gmra.mxu1 %vm94_vm2, %v5805_v23 }
  0xfd   :  { %1875 = vmatpush1.bf16.msra.mxu1 %v1805_v37  ;;  %1892 = vmatprep.mubr.bf16.mxu1 %v6120_v3 }
  0xfe   :  { %6044 = vmatprep.subr.bf16.mxu1 %v6129_v30 }
 0x100   :  { %5815 = vmatmul.mubr.msk.bf16.vlgmr.msra.gmra.mxu0 %vm94_vm2, %v5813_v39 }
 0x101   :  { %1916 = vmatpush1.bf16.msra.mxu0 %v1811_v40  ;;  %1933 = vmatprep.mubr.bf16.mxu0 %v6120_v3 }
 0x104   :  { %5817 = vmatmul.mubr.msk.bf16.vlgmr.msra.gmra.mxu1 %vm94_vm2, %v5813_v39 }
 0x105   :  { %6045 = vmatpush3.bf16.msra.mxu1 %v1817_v41  ;;  %6046 = vmatprep.mubr.msk.bf16.mxu1 %vm6130_vm3, %v6129_v30 }
 0x108   :  { %5819 = vmatmul.mubr.msk.bf16.vlgmr.msra.gmra.mxu0 %vm94_vm2, %v5813_v39 }
 0x109   :  { %2139 = vmatprep.mubr.bf16.mxu0 %v6120_v3 }
 0x10c   :  { %6047 = vmatmul.mubr.msk.bf16.vlgmr.msra.gmra.mxu1 %vm94_vm2, %v5813_v39 }
 0x10d   :  { %2180 = vmatprep.mubr.bf16.mxu1 %v6120_v3 }
 0x140   :  { %v154_v42 = vpop.f32.mrf.mxu0 }
 0x142   :  { %v156_v43 = vpop.f32.mrf.mxu0 }
 0x144   :  { %v158_v44 = vpop.f32.mrf.mxu0  ;;  %v195_v45 = vpop.f32.mrf.mxu1 }
 0x146   :  { %v159_v46 = vpop.f32.mrf.mxu0  ;;  %v197_v47 = vpop.f32.mrf.mxu1 }
 0x148   :  { %v199_v48 = vpop.f32.mrf.mxu1  ;;  %v236_v49 = vpop.f32.mrf.mxu0 }
 0x14a   :  { %v200_v50 = vpop.f32.mrf.mxu1  ;;  %v238_v51 = vpop.f32.mrf.mxu0 }
 0x14c   :  { %v240_v52 = vpop.f32.mrf.mxu0  ;;  %v277_v53 = vpop.f32.mrf.mxu1 }
 0x14e   :  { %v241_v54 = vpop.f32.mrf.mxu0  ;;  %v6000_v55 = vpop.f32.mrf.mxu1 }
 0x150   :  { %v280_v56 = vpop.f32.mrf.mxu1  ;;  %v341_v57 = vpop.f32.mrf.mxu0 }
 0x151   :  { %v342_v58 = vadd.f32 %v341_v57, %v154_v42 }
 0x152   :  { %v6001_v59 = vpop.f32.mrf.mxu1  ;;  %v343_v60 = vpop.f32.mrf.mxu0 }
 0x153   :  { %v344_v61 = vadd.f32 %v343_v60, %v156_v43 }
 0x154   :  { %v345_v62 = vpop.f32.mrf.mxu0  ;;  %v382_v63 = vpop.f32.mrf.mxu1 }
 0x155   :  { %v383_v0 = vadd.f32 %v382_v63, %v195_v45 }
 0x156   :  { %v346_v1 = vpop.f32.mrf.mxu0  ;;  %v384_v2 = vpop.f32.mrf.mxu1 }
 0x157   :  { %v385_v4 = vadd.f32 %v384_v2, %v197_v47 }
 0x158   :  { %v386_v5 = vpop.f32.mrf.mxu1  ;;  %v423_v6 = vpop.f32.mrf.mxu0 }
 0x159   :  { %v424_v7 = vadd.f32 %v423_v6, %v236_v49 }
 0x15a   :  { %v387_v8 = vpop.f32.mrf.mxu1  ;;  %v425_v9 = vpop.f32.mrf.mxu0 }
 0x15b   :  { %v426_v10 = vadd.f32 %v425_v9, %v238_v51 }
 0x15c   :  { %v427_v11 = vpop.f32.mrf.mxu0  ;;  %v464_v12 = vpop.f32.mrf.mxu1 }
 0x15d   :  { %v465_v13 = vadd.f32 %v464_v12, %v277_v53 }
 0x15e   :  { %v428_v14 = vpop.f32.mrf.mxu0  ;;  %v6006_v15 = vpop.f32.mrf.mxu1 }
 0x160   :  { %v467_v16 = vpop.f32.mrf.mxu1  ;;  %v551_v17 = vpop.f32.mrf.mxu0 }
 0x161   :  { %v680_v18 = vadd.f32 %v551_v17, %v342_v58 }
 0x162   :  { %v6007_v19 = vpop.f32.mrf.mxu1  ;;  %v553_v20 = vpop.f32.mrf.mxu0 }
 0x163   :  { %v681_v21 = vadd.f32 %v553_v20, %v344_v61 }
 0x164   :  { %v555_v22 = vpop.f32.mrf.mxu0  ;;  %v592_v23 = vpop.f32.mrf.mxu1 }
 0x165   :  { %v682_v24 = vadd.f32 %v592_v23, %v383_v0 }
 0x166   :  { %v556_v25 = vpop.f32.mrf.mxu0  ;;  %v594_v26 = vpop.f32.mrf.mxu1 }
 0x167   :  { %v683_v27 = vadd.f32 %v594_v26, %v385_v4 }
 0x168   :  { %v596_v28 = vpop.f32.mrf.mxu1  ;;  %v633_v29 = vpop.f32.mrf.mxu0 }
 0x169   :  { %v684_v31 = vadd.f32 %v633_v29, %v424_v7 }
 0x16a   :  { %v597_v32 = vpop.f32.mrf.mxu1  ;;  %v635_v33 = vpop.f32.mrf.mxu0 }
 0x16b   :  { %v685_v34 = vadd.f32 %v635_v33, %v426_v10 }
 0x16c   :  { %v637_v35 = vpop.f32.mrf.mxu0  ;;  %v674_v36 = vpop.f32.mrf.mxu1 }
 0x16d   :  { %v686_v37 = vadd.f32 %v674_v36, %v465_v13 }
 0x16e   :  { %v638_v38 = vpop.f32.mrf.mxu0  ;;  %v6012_v39 = vpop.f32.mrf.mxu1 }
 0x170   :  { %v677_v40 = vpop.f32.mrf.mxu1  ;;  %v768_v41 = vpop.f32.mrf.mxu0 }
 0x171   :  { %v6576_v42 = vadd.f32 %v768_v41, %v680_v18 }
 0x172   :  { %v6013_v43 = vpop.f32.mrf.mxu1  ;;  %v770_v44 = vpop.f32.mrf.mxu0 }
 0x173   :  { %v6578_v45 = vadd.f32 %v770_v44, %v681_v21 }
 0x174   :  { %v772_v46 = vpop.f32.mrf.mxu0  ;;  %v809_v47 = vpop.f32.mrf.mxu1 }
 0x175   :  { %v6580_v48 = vadd.f32 %v809_v47, %v682_v24 }
 0x176   :  { %v773_v49 = vpop.f32.mrf.mxu0  ;;  %v811_v50 = vpop.f32.mrf.mxu1 }
 0x177   :  { %v6582_v51 = vadd.f32 %v811_v50, %v683_v27 }
 0x178   :  { %v813_v52 = vpop.f32.mrf.mxu1  ;;  %v850_v53 = vpop.f32.mrf.mxu0 }
 0x179   :  { %v6584_v54 = vadd.f32 %v850_v53, %v684_v31 }
 0x17a   :  { %v814_v55 = vpop.f32.mrf.mxu1  ;;  %v852_v56 = vpop.f32.mrf.mxu0 }
 0x17b   :  { %v6586_v57 = vadd.f32 %v852_v56, %v685_v34 }
 0x17c   :  { %v854_v58 = vpop.f32.mrf.mxu0  ;;  %v891_v59 = vpop.f32.mrf.mxu1 }
 0x17d   :  { %v6588_v60 = vadd.f32 %v891_v59, %v686_v37 }
 0x17e   :  { %v855_v61 = vpop.f32.mrf.mxu0  ;;  %v6018_v62 = vpop.f32.mrf.mxu1 }
 0x17f   :  { %v2003_v62 = vlaneseq }
 0x180   :  { %v894_v63 = vpop.f32.mrf.mxu1  ;;  %v985_v0 = vpop.f32.mrf.mxu0 }
 0x182   :  { %v6019_v1 = vpop.f32.mrf.mxu1  ;;  %v987_v2 = vpop.f32.mrf.mxu0 }
 0x184   :  { %v989_v4 = vpop.f32.mrf.mxu0  ;;  %v6590_v5 = vpop.f32.mrf.mxu1 }
 0x186   :  { %v990_v6 = vpop.f32.mrf.mxu0  ;;  %v6592_v7 = vpop.f32.mrf.mxu1 }
 0x188   :  { %v1030_v8 = vpop.f32.mrf.mxu1  ;;  %v6594_v9 = vpop.f32.mrf.mxu0 }
 0x189   :  { %v6612_v8 = vshrl.u32 %v2003_v62, 7 }
 0x18a   :  { %v1031_v10 = vpop.f32.mrf.mxu1  ;;  %v6596_v11 = vpop.f32.mrf.mxu0 }
 0x18b   :  { %v1114_v10 = vadd.f32 %v985_v0, %v6576_v42  ;;  %v6627_v42 = vld [vmem:[%s7499_s2] sm:$0x7f] }
 0x18c   :  { %v1071_v12 = vpop.f32.mrf.mxu0  ;;  %v6598_v13 = vpop.f32.mrf.mxu1 }
 0x18e   :  { %v1072_v14 = vpop.f32.mrf.mxu0  ;;  %v6024_v15 = vpop.f32.mrf.mxu1 }
 0x18f   :  { %v1115_v15 = vadd.f32 %v987_v2, %v6578_v45  ;;  %v1117_v2 = vadd.f32 %v6592_v7, %v6582_v51  ;;  %v2013_v51 = vsub.s32 2, %v6612_v8 }
 0x190   :  { %v1111_v16 = vpop.f32.mrf.mxu1  ;;  %v1202_v17 = vpop.f32.mrf.mxu0 }
 0x191   :  { %v1331_v16 = vadd.f32 %v1202_v17, %v1114_v10 }
 0x192   :  { %v6025_v18 = vpop.f32.mrf.mxu1  ;;  %v1204_v19 = vpop.f32.mrf.mxu0 }
 0x194   :  { %v1206_v20 = vpop.f32.mrf.mxu0  ;;  %v1243_v21 = vpop.f32.mrf.mxu1 }
 0x196   :  { %v1207_v22 = vpop.f32.mrf.mxu0  ;;  %v6600_v23 = vpop.f32.mrf.mxu1 }
 0x197   :  { %v2005_v22 = vsub.s32 0, %v6612_v8  ;;  %v1334_v7 = vadd.f32 %v6600_v23, %v1117_v2  ;;  %v1120_v23 = vadd.f32 %v6598_v13, %v6588_v60 }
 0x198   :  { %v1247_v24 = vpop.f32.mrf.mxu1  ;;  %v6602_v25 = vpop.f32.mrf.mxu0 }
 0x199   :  { %v2009_v24 = vsub.s32 1, %v6612_v8 }
 0x19a   :  { %v1248_v26 = vpop.f32.mrf.mxu1  ;;  %v6604_v27 = vpop.f32.mrf.mxu0 }
 0x19b   :  { %v1116_v26 = vadd.f32 %v6590_v5, %v6580_v48  ;;  %v1118_v48 = vadd.f32 %v6594_v9, %v6584_v54  ;;  %v1119_v54 = vadd.f32 %v6596_v11, %v6586_v57 }
 0x19c   :  { %v1288_v28 = vpop.f32.mrf.mxu0  ;;  %v6606_v29 = vpop.f32.mrf.mxu1 }
 0x19d   :  { %v1332_v28 = vadd.f32 %v1204_v19, %v1115_v15  ;;  %v1333_v17 = vadd.f32 %v1243_v21, %v1116_v26  ;;  %v1335_v9 = vadd.f32 %v6602_v25, %v1118_v48  ;;  %v2014_v25 = vrot.slane %v6627_v42, %v2013_v51 }
 0x19e   :  { %v1289_v31 = vpop.f32.mrf.mxu0  ;;  %v6030_v32 = vpop.f32.mrf.mxu1  ;;  %v2025_v26 = vsub.s32 5, %v6612_v8 }
 0x1a0   :  { %v1328_v33 = vpop.f32.mrf.mxu1  ;;  %v1419_v34 = vpop.f32.mrf.mxu0 }
 0x1a1   :  { %v1548_v31 = vadd.f32 %v1419_v34, %v1331_v16  ;;  %v2006_v34 = vrot.slane %v6627_v42, %v2005_v22 }
 0x1a2   :  { %v6031_v35 = vpop.f32.mrf.mxu1  ;;  %v1421_v36 = vpop.f32.mrf.mxu0 }
 0x1a3   :  { %v1549_v32 = vadd.f32 %v1421_v36, %v1332_v28  ;;  %v6631_v35 = vpop.permute.xlu0 %1992  ;;  %v2029_v28 = vsub.s32 6, %v6612_v8 }
 0x1a4   :  { %v1423_v37 = vpop.f32.mrf.mxu0  ;;  %v1460_v38 = vpop.f32.mrf.mxu1 }
 0x1a5   :  { %v2010_v37 = vrot.slane %v6627_v42, %v2009_v24  ;;  %v1550_v21 = vadd.f32 %v1460_v38, %v1333_v17  ;;  %v1336_v38 = vadd.f32 %v6604_v27, %v1119_v54 }
 0x1a6   :  { %v1424_v39 = vpop.f32.mrf.mxu0  ;;  %v1462_v40 = vpop.f32.mrf.mxu1 }
 0x1a8   :  { %v1464_v41 = vpop.f32.mrf.mxu1  ;;  %v1501_v43 = vpop.f32.mrf.mxu0 }
 0x1aa   :  { %v1465_v44 = vpop.f32.mrf.mxu1  ;;  %v6608_v46 = vpop.f32.mrf.mxu0 }
 0x1ac   :  { %v1505_v47 = vpop.f32.mrf.mxu0  ;;  %v6610_v49 = vpop.f32.mrf.mxu1 }
 0x1ad   :  { %v2017_v47 = vsub.s32 3, %v6612_v8 }
 0x1ae   :  { %v1506_v50 = vpop.f32.mrf.mxu0  ;;  %v6036_v52 = vpop.f32.mrf.mxu1 }
 0x1af   :  { %v2021_v50 = vsub.s32 4, %v6612_v8  ;;  %v1551_v52 = vadd.f32 %v1462_v40, %v1334_v7  ;;  %v2018_v13 = vrot.slane %v6627_v42, %v2017_v47 }
 0x1b0   :  { %v1545_v53 = vpop.f32.mrf.mxu1  ;;  %v1636_v55 = vpop.f32.mrf.mxu0 }
 0x1b1   :  { %v1765_v33 = vadd.f32 %v1636_v55, %v1548_v31  ;;  %v2022_v27 = vrot.slane %v6627_v42, %v2021_v50 }
 0x1b2   :  { %v6037_v56 = vpop.f32.mrf.mxu1  ;;  %v1638_v58 = vpop.f32.mrf.mxu0 }
 0x1b3   :  { %v1766_v36 = vadd.f32 %v1638_v58, %v1549_v32  ;;  %v1552_v58 = vadd.f32 %v1501_v43, %v1335_v9 }
 0x1b4   :  { %v1640_v59 = vpop.f32.mrf.mxu0  ;;  %v1677_v61 = vpop.f32.mrf.mxu1 }
 0x1b5   :  { %v1767_v53 = vadd.f32 %v1677_v61, %v1550_v21 }
 0x1b6   :  { %v1641_v63 = vpop.f32.mrf.mxu0  ;;  %v1679_v1 = vpop.f32.mrf.mxu1 }
 0x1b7   :  { %v1768_v59 = vadd.f32 %v1679_v1, %v1551_v52  ;;  %v1337_v63 = vadd.f32 %v6606_v29, %v1120_v23 }
 0x1b8   :  { %v1681_v4 = vpop.f32.mrf.mxu1  ;;  %v1718_v6 = vpop.f32.mrf.mxu0 }
 0x1b9   :  { %v1553_v4 = vadd.f32 %v6608_v46, %v1336_v38  ;;  %v1769_v43 = vadd.f32 %v1718_v6, %v1552_v58  ;;  %v1554_v29 = vadd.f32 %v6610_v49, %v1337_v63 }
 0x1ba   :  { %v1682_v12 = vpop.f32.mrf.mxu1  ;;  %v6615_v14 = vpop.f32.mrf.mxu0 }
 0x1bb   :  { %v1770_v31 = vadd.f32 %v6615_v14, %v1553_v4  ;;  %v2026_v14 = vrot.slane %v6627_v42, %v2025_v26 }
 0x1bc   :  { %v1722_v18 = vpop.f32.mrf.mxu0  ;;  %v6618_v20 = vpop.f32.mrf.mxu1 }
 0x1bd   :  { %v1771_v49 = vadd.f32 %v6618_v20, %v1554_v29  ;;  %v2030_v20 = vrot.slane %v6627_v42, %v2029_v28 }
 0x1be   :  { %v1723_v0 = vpop.f32.mrf.mxu0  ;;  %v6042_v45 = vpop.f32.mrf.mxu1 }
 0x1c0   :  { %v1762_v5 = vpop.f32.mrf.mxu1  ;;  %v1853_v19 = vpop.f32.mrf.mxu0 }
 0x1c1   :  { %v1982_v39 = vadd.f32 %v1853_v19, %v1765_v33 }
 0x1c2   :  { %v6043_v41 = vpop.f32.mrf.mxu1  ;;  %v1855_v44 = vpop.f32.mrf.mxu0 }
 0x1c3   :  { %v1983_v55 = vadd.f32 %v1855_v44, %v1766_v36  ;;  %v1995_v56 = vadd.f32 %v6631_v35, %v1982_v39 }
 0x1c4   :  { %v1857_v57 = vpop.f32.mrf.mxu0  ;;  %v1894_v11 = vpop.f32.mrf.mxu1 }
 0x1c5   :  { %v1996_v62 = vadd.f32 %v6631_v35, %v1983_v55  ;;  %v1984_v40 = vadd.f32 %v1894_v11, %v1767_v53  ;;  %v2038_v61 = vmul.f32 %v2006_v34, %v1995_v56 }
 0x1c6   :  { %v1858_v10 = vpop.f32.mrf.mxu0  ;;  %v1896_v60 = vpop.f32.mrf.mxu1 }
 0x1c7   :  { %v1997_v1 = vadd.f32 %v6631_v35, %v1984_v40  ;;  %v6665_v12 = vpack.c.bf16 %v2038_v61, %v2038_v61  ;;  %v1985_v15 = vadd.f32 %v1896_v60, %v1768_v59  ;;  %v2039_v16 = vmul.f32 %v2010_v37, %v1996_v62  ;;  %v5821_v40 = vld [vmem:[%s7501_s6 + $0x4] sm:$0xf] }
 0x1c8   :  { %v1898_v46 = vpop.f32.mrf.mxu1  ;;  %v1935_v18 = vpop.f32.mrf.mxu0 }
 0x1c9   :  { %v2040_v0 = vmul.f32 %v2014_v25, %v1997_v1  ;;  %v1998_v45 = vadd.f32 %v6631_v35, %v1985_v15  ;;  %v1986_v6 = vadd.f32 %v1935_v18, %v1769_v43  ;;  %2063 = vrot.lane.b32.xlu1 %v6665_v12, %s6121_s27  ;;  %v6678_v5 = vpack.c.bf16 %v2039_v16, %v2039_v16 }
 0x1ca   :  { %v1899_v2 = vpop.f32.mrf.mxu1  ;;  %v1937_v17 = vpop.f32.mrf.mxu0  ;;  %v2274_v46 = vsel %vm98_vm1, %v6665_v12, 0 }
 0x1cb   :  { %v6675_v32 = vpack.c.bf16 %v2040_v0, %v2040_v0  ;;  %v1999_v33 = vadd.f32 %v6631_v35, %v1986_v6  ;;  %v1987_v48 = vadd.f32 %v1937_v17, %v1770_v31  ;;  %v2041_v19 = vmul.f32 %v2018_v13, %v1998_v45  ;;  %v2053_v6 = vld [vmem:[%s7501_s6] sm:$0xf] }
 0x1cc   :  { %v1939_v34 = vpop.f32.mrf.mxu0  ;;  %v1976_v37 = vpop.f32.mrf.mxu1 }
 0x1cd   :  { %v2042_v7 = vmul.f32 %v2022_v27, %v1999_v33  ;;  %v2000_v21 = vadd.f32 %v6631_v35, %v1987_v48  ;;  %v1988_v36 = vadd.f32 %v1976_v37, %v1771_v49  ;;  %2067 = vrot.lane.b32.xlu0 %v6675_v32, %s6121_s27  ;;  %2065 = vrot.lane.b32.xlu1 %v6678_v5, %s6121_s27  ;;  %v2280_v0 = vsel %vm98_vm1, %v6675_v32, 0 }
 0x1ce   :  { %v1940_v39 = vpop.f32.mrf.mxu0  ;;  %v6048_v54 = vpop.f32.mrf.mxu1  ;;  %v6694_v44 = vpack.c.bf16 %v2041_v19, %v2041_v19 }
 0x1cf   :  { %v6691_v9 = vpack.c.bf16 %v2042_v7, %v2042_v7  ;;  %v2001_v41 = vadd.f32 %v6631_v35, %v1988_v36  ;;  %v2043_v52 = vmul.f32 %v2026_v14, %v2000_v21  ;;  %v3969_v35 = vld [vmem:[%s7500_s7] sm:$0xff] }
 0x1d0   :  { %v1979_v53 = vpop.f32.mrf.mxu1 }
 0x1d1   :  { %v2044_v55 = vmul.f32 %v2030_v20, %v2001_v41  ;;  %2071 = vrot.lane.b32.xlu0 %v6691_v9, %s6121_s27  ;;  %2069 = vrot.lane.b32.xlu1 %v6694_v44, %s6121_s27  ;;  %v6702_v23 = vpack.c.bf16 %v2043_v52, %v2043_v52  ;;  %v2286_v2 = vsel %vm98_vm1, %v6691_v9, 0 }
 0x1d2   :  { %v6049_v42 = vpop.f32.mrf.mxu1 }
 0x1d3   :  { %v6700_v56 = vpack.c.bf16 %v2044_v55, %v2044_v55 }
 0x1d5   :  { %2075 = vrot.lane.b32.xlu0 %v6700_v56, %s6121_s27  ;;  %2073 = vrot.lane.b32.xlu1 %v6702_v23, %s6121_s27  ;;  %v2292_v33 = vsel %vm98_vm1, %v6700_v56, 0 }
 0x1d9   :  { %2461 = vrot.lane.b32.xlu0 %v6678_v5, %s6122_s30  ;;  %2459 = vrot.lane.b32.xlu1 %v6665_v12, %s6122_s30 }
 0x1dd   :  { %2465 = vrot.lane.b32.xlu0 %v6694_v44, %s6122_s30  ;;  %2463 = vrot.lane.b32.xlu1 %v6675_v32, %s6122_s30 }
 0x1e1   :  { %2469 = vrot.lane.b32.xlu0 %v6702_v23, %s6122_s30  ;;  %2467 = vrot.lane.b32.xlu1 %v6691_v9, %s6122_s30 }
 0x1e5   :  { %2675 = vrot.lane.b32.xlu0 %v6665_v12, %s6123_s0  ;;  %2471 = vrot.lane.b32.xlu1 %v6700_v56, %s6122_s30 }
 0x1e9   :  { %2679 = vrot.lane.b32.xlu0 %v6675_v32, %s6123_s0  ;;  %2677 = vrot.lane.b32.xlu1 %v6678_v5, %s6123_s0 }
 0x1ed   :  { %2683 = vrot.lane.b32.xlu0 %v6691_v9, %s6123_s0  ;;  %2681 = vrot.lane.b32.xlu1 %v6694_v44, %s6123_s0 }
 0x1f1   :  { %2687 = vrot.lane.b32.xlu0 %v6700_v56, %s6123_s0  ;;  %2685 = vrot.lane.b32.xlu1 %v6702_v23, %s6123_s0 }
 0x1f5   :  { %2893 = vrot.lane.b32.xlu0 %v6678_v5, %s6124_s13  ;;  %2891 = vrot.lane.b32.xlu1 %v6665_v12, %s6124_s13 }
 0x1f9   :  { %2897 = vrot.lane.b32.xlu0 %v6694_v44, %s6124_s13  ;;  %2895 = vrot.lane.b32.xlu1 %v6675_v32, %s6124_s13 }
 0x1fd   :  { %2901 = vrot.lane.b32.xlu0 %v6702_v23, %s6124_s13  ;;  %2899 = vrot.lane.b32.xlu1 %v6691_v9, %s6124_s13 }
 0x201   :  { %3107 = vrot.lane.b32.xlu0 %v6665_v12, %s6125_s14  ;;  %2903 = vrot.lane.b32.xlu1 %v6700_v56, %s6124_s13 }
 0x205   :  { %3111 = vrot.lane.b32.xlu0 %v6675_v32, %s6125_s14  ;;  %3109 = vrot.lane.b32.xlu1 %v6678_v5, %s6125_s14 }
 0x209   :  { %3115 = vrot.lane.b32.xlu0 %v6691_v9, %s6125_s14  ;;  %3113 = vrot.lane.b32.xlu1 %v6694_v44, %s6125_s14 }
 0x20d   :  { %3119 = vrot.lane.b32.xlu0 %v6700_v56, %s6125_s14  ;;  %3117 = vrot.lane.b32.xlu1 %v6702_v23, %s6125_s14 }
 0x211   :  { %3325 = vrot.lane.b32.xlu0 %v6678_v5, %s6126_s15  ;;  %3323 = vrot.lane.b32.xlu1 %v6665_v12, %s6126_s15 }
 0x215   :  { %3329 = vrot.lane.b32.xlu0 %v6694_v44, %s6126_s15  ;;  %3327 = vrot.lane.b32.xlu1 %v6675_v32, %s6126_s15 }
 0x219   :  { %3333 = vrot.lane.b32.xlu0 %v6702_v23, %s6126_s15  ;;  %3331 = vrot.lane.b32.xlu1 %v6691_v9, %s6126_s15 }
 0x21d   :  { %3539 = vrot.lane.b32.xlu0 %v6665_v12, %s6127_s16  ;;  %3335 = vrot.lane.b32.xlu1 %v6700_v56, %s6126_s15 }
 0x221   :  { %3543 = vrot.lane.b32.xlu0 %v6675_v32, %s6127_s16  ;;  %3541 = vrot.lane.b32.xlu1 %v6678_v5, %s6127_s16 }
 0x225   :  { %3547 = vrot.lane.b32.xlu0 %v6691_v9, %s6127_s16  ;;  %3545 = vrot.lane.b32.xlu1 %v6694_v44, %s6127_s16 }
 0x229   :  { %3551 = vrot.lane.b32.xlu0 %v6700_v56, %s6127_s16  ;;  %3549 = vrot.lane.b32.xlu1 %v6702_v23, %s6127_s16 }
 0x22d   :  { %3757 = vrot.lane.b32.xlu0 %v6678_v5, %s6128_s17  ;;  %3755 = vrot.lane.b32.xlu1 %v6665_v12, %s6128_s17 }
 0x231   :  { %3761 = vrot.lane.b32.xlu0 %v6694_v44, %s6128_s17  ;;  %3759 = vrot.lane.b32.xlu1 %v6675_v32, %s6128_s17 }
 0x235   :  { %3765 = vrot.lane.b32.xlu0 %v6702_v23, %s6128_s17  ;;  %3763 = vrot.lane.b32.xlu1 %v6691_v9, %s6128_s17  ;;  %v5836_v9 = vld [vmem:[%s7501_s6 + $0x8] sm:$0xf] }
 0x239   :  { %3972 = vperm.xlu0 %6115, %v3969_v35   ;;  %3767 = vrot.lane.b32.xlu1 %v6700_v56, %s6128_s17 }
 0x23b   :  { %v2064_v38 = vpop.permute.xlu1 %2063 }
 0x23f   :  { %v2068_v58 = vpop.permute.xlu0 %2067  ;;  %v2066_v57 = vpop.permute.xlu1 %2065 }
 0x240   :  { %v2077_v11 = vsel %vm87_vm0, %v2064_v38, %v2066_v57  ;;  %v2078_v25 = vsel %vm87_vm0, %v2066_v57, %v2068_v58 }
 0x241   :  { %5822 = vmatprep.subr.msk.bf16.mxu0 %vm98_vm1, %v2078_v25  ;;  %v2087_v59 = vsel %vm98_vm1, %v2077_v11, 0 }
 0x242   :  { %2122 = vmatpush1.bf16.msra.mxu0 %v2087_v59 }
 0x243   :  { %v2072_v62 = vpop.permute.xlu0 %2071  ;;  %v2070_v61 = vpop.permute.xlu1 %2069 }
 0x244   :  { %v2079_v63 = vsel %vm87_vm0, %v2068_v58, %v2070_v61  ;;  %v2080_v4 = vsel %vm87_vm0, %v2070_v61, %v2072_v62 }
 0x245   :  { %5823 = vmatmul.mubr.msk.bf16.vlgmr.msra.gmra.mxu0 %vm94_vm2, %v5821_v40  ;;  %5824 = vmatprep.subr.msk.bf16.mxu1 %vm98_vm1, %v2080_v4  ;;  %v2093_v10 = vsel %vm98_vm1, %v2079_v63, 0  ;;  %v5844_v63 = vld [vmem:[%s7501_s6 + $0xc] sm:$0xf] }
 0x246   :  { %2163 = vmatpush1.bf16.msra.mxu1 %v2093_v10  ;;  %2221 = vmatprep.mubr.bf16.mxu0 %v6120_v3 }
 0x247   :  { %v2076_v60 = vpop.permute.xlu0 %2075  ;;  %v2074_v13 = vpop.permute.xlu1 %2073  ;;  %6050 = vmatprep.subr.bf16.mxu1 %v6129_v30 }
 0x248   :  { %v2105_v27 = vsel %vm98_vm1, %v2076_v60, 0  ;;  %v2081_v43 = vsel %vm87_vm0, %v2072_v62, %v2074_v13  ;;  %v2082_v1 = vsel %vm87_vm0, %v2074_v13, %v2076_v60 }
 0x249   :  { %5825 = vmatmul.mubr.msk.bf16.vlgmr.msra.gmra.mxu1 %vm94_vm2, %v5821_v40  ;;  %5826 = vmatprep.subr.msk.bf16.mxu0 %vm98_vm1, %v2082_v1  ;;  %v2099_v15 = vsel %vm98_vm1, %v2081_v43, 0 }
 0x24a   :  { %2204 = vmatpush1.bf16.msra.mxu0 %v2099_v15  ;;  %6051 = vmatpush3.bf16.msra.mxu1 %v2105_v27 }
 0x24b   :  { %v2462_v29 = vpop.permute.xlu0 %2461  ;;  %5829 = vmatprep.subr.msk.bf16.mxu0 %vm98_vm1, %v6678_v5  ;;  %5831 = vmatprep.subr.msk.bf16.mxu1 %vm98_vm1, %v6694_v44  ;;  %v2460_v16 = vpop.permute.xlu1 %2459 }
 0x24c   :  { %6052 = vmatprep.mubr.msk.bf16.mxu1 %vm6130_vm3, %v6129_v30  ;;  %v2473_v48 = vsel %vm486_vm4, %v2460_v16, %v2462_v29 }
 0x24d   :  { %5827 = vmatmul.mubr.msk.bf16.vlgmr.msra.gmra.mxu0 %vm94_vm2, %v5821_v40  ;;  %v2483_v34 = vsel %vm98_vm1, %v2473_v48, 0 }
 0x24e   :  { %2309 = vmatpush1.bf16.msra.mxu0 %v2274_v46  ;;  %2326 = vmatprep.mubr.bf16.mxu0 %v6120_v3 }
 0x24f   :  { %v2466_v18 = vpop.permute.xlu0 %2465  ;;  %v2464_v31 = vpop.permute.xlu1 %2463  ;;  %5833 = vmatprep.subr.msk.bf16.mxu0 %vm98_vm1, %v6702_v23 }
 0x250   :  { %v2474_v17 = vsel %vm486_vm4, %v2462_v29, %v2464_v31  ;;  %v2475_v37 = vsel %vm486_vm4, %v2464_v31, %v2466_v18 }
 0x251   :  { %6053 = vmatmul.mubr.msk.bf16.vlgmr.msra.gmra.mxu1 %vm94_vm2, %v5821_v40  ;;  %v2489_v20 = vsel %vm98_vm1, %v2475_v37, 0 }
 0x252   :  { %2350 = vmatpush1.bf16.msra.mxu1 %v2280_v0  ;;  %2367 = vmatprep.mubr.bf16.mxu1 %v6120_v3 }
 0x253   :  { %v2470_v45 = vpop.permute.xlu0 %2469  ;;  %v2468_v12 = vpop.permute.xlu1 %2467  ;;  %6056 = vmatprep.subr.bf16.mxu1 %v6129_v30 }
 0x254   :  { %v2476_v5 = vsel %vm486_vm4, %v2466_v18, %v2468_v12  ;;  %v2477_v39 = vsel %vm486_vm4, %v2468_v12, %v2470_v45 }
 0x255   :  { %5830 = vmatmul.mubr.msk.bf16.vlgmr.msra.gmra.mxu0 %vm94_vm2, %v2053_v6  ;;  %v2495_v44 = vsel %vm98_vm1, %v2477_v39, 0 }
 0x256   :  { %2391 = vmatpush1.bf16.msra.mxu0 %v2286_v2  ;;  %2408 = vmatprep.mubr.bf16.mxu0 %v6120_v3  ;;  %v5852_v2 = vld [vmem:[%s7501_s6 + $0x10] sm:$0xf] }
 0x257   :  { %v2676_v49 = vpop.permute.xlu0 %2675  ;;  %5837 = vmatprep.subr.msk.bf16.mxu0 %vm98_vm1, %v2474_v17  ;;  %v2472_v32 = vpop.permute.xlu1 %2471 }
 0x258   :  { %v2478_v7 = vsel %vm486_vm4, %v2470_v45, %v2472_v32  ;;  %v2501_v42 = vsel %vm98_vm1, %v2472_v32, 0 }
 0x259   :  { %5832 = vmatmul.mubr.msk.bf16.vlgmr.msra.gmra.mxu1 %vm94_vm2, %v2053_v6 }
 0x25a   :  { %6057 = vmatpush3.bf16.msra.mxu1 %v2292_v33  ;;  %6058 = vmatprep.mubr.msk.bf16.mxu1 %vm6130_vm3, %v6129_v30 }
 0x25b   :  { %v2680_v19 = vpop.permute.xlu0 %2679  ;;  %5839 = vmatprep.subr.msk.bf16.mxu1 %vm98_vm1, %v2476_v5  ;;  %v2678_v14 = vpop.permute.xlu1 %2677 }
 0x25c   :  { %v2690_v52 = vsel %vm703_vm5, %v2678_v14, %v2680_v19  ;;  %v2689_v56 = vsel %vm703_vm5, %v2676_v49, %v2678_v14 }
 0x25d   :  { %5834 = vmatmul.mubr.msk.bf16.vlgmr.msra.gmra.mxu0 %vm94_vm2, %v2053_v6  ;;  %v2699_v58 = vsel %vm98_vm1, %v2689_v56, 0 }
 0x25e   :  { %2518 = vmatpush1.bf16.msra.mxu0 %v2483_v34  ;;  %2535 = vmatprep.mubr.bf16.mxu0 %v6120_v3 }
 0x25f   :  { %v2684_v21 = vpop.permute.xlu0 %2683  ;;  %5841 = vmatprep.subr.msk.bf16.mxu0 %vm98_vm1, %v2478_v7  ;;  %v2682_v36 = vpop.permute.xlu1 %2681 }
 0x260   :  { %v2692_v23 = vsel %vm703_vm5, %v2682_v36, %v2684_v21  ;;  %v2691_v57 = vsel %vm703_vm5, %v2680_v19, %v2682_v36 }
 0x261   :  { %6059 = vmatmul.mubr.msk.bf16.vlgmr.msra.gmra.mxu1 %vm94_vm2, %v2053_v6  ;;  %v2705_v62 = vsel %vm98_vm1, %v2691_v57, 0 }
 0x262   :  { %2559 = vmatpush1.bf16.msra.mxu1 %v2489_v20  ;;  %2576 = vmatprep.mubr.bf16.mxu1 %v6120_v3 }
 0x263   :  { %v2688_v54 = vpop.permute.xlu0 %2687  ;;  %v2686_v41 = vpop.permute.xlu1 %2685  ;;  %6062 = vmatprep.subr.bf16.mxu1 %v6129_v30 }
 0x264   :  { %v2694_v11 = vsel %vm703_vm5, %v2686_v41, %v2688_v54  ;;  %v2693_v40 = vsel %vm703_vm5, %v2684_v21, %v2686_v41  ;;  %v2717_v43 = vsel %vm98_vm1, %v2688_v54, 0 }
 0x265   :  { %5838 = vmatmul.mubr.msk.bf16.vlgmr.msra.gmra.mxu0 %vm94_vm2, %v5836_v9  ;;  %v2711_v10 = vsel %vm98_vm1, %v2693_v40, 0 }
 0x266   :  { %2600 = vmatpush1.bf16.msra.mxu0 %v2495_v44  ;;  %2617 = vmatprep.mubr.bf16.mxu0 %v6120_v3 }
 0x267   :  { %v2894_v53 = vpop.permute.xlu0 %2893  ;;  %5845 = vmatprep.subr.msk.bf16.mxu0 %vm98_vm1, %v2690_v52  ;;  %v2892_v55 = vpop.permute.xlu1 %2891 }
 0x268   :  { %v2905_v1 = vsel %vm920_vm6, %v2892_v55, %v2894_v53 }
 0x269   :  { %5840 = vmatmul.mubr.msk.bf16.vlgmr.msra.gmra.mxu1 %vm94_vm2, %v5836_v9  ;;  %v2915_v46 = vsel %vm98_vm1, %v2905_v1, 0 }
 0x26a   :  { %6063 = vmatpush3.bf16.msra.mxu1 %v2501_v42  ;;  %6064 = vmatprep.mubr.msk.bf16.mxu1 %vm6130_vm3, %v6129_v30 }
 0x26b   :  { %v2898_v35 = vpop.permute.xlu0 %2897  ;;  %5847 = vmatprep.subr.msk.bf16.mxu1 %vm98_vm1, %v2692_v23  ;;  %v2896_v38 = vpop.permute.xlu1 %2895 }
 0x26c   :  { %v2906_v60 = vsel %vm920_vm6, %v2894_v53, %v2896_v38  ;;  %v2907_v18 = vsel %vm920_vm6, %v2896_v38, %v2898_v35 }
 0x26d   :  { %5842 = vmatmul.mubr.msk.bf16.vlgmr.msra.gmra.mxu0 %vm94_vm2, %v5836_v9  ;;  %v2921_v45 = vsel %vm98_vm1, %v2907_v18, 0 }
 0x26e   :  { %2734 = vmatpush1.bf16.msra.mxu0 %v2699_v58  ;;  %2751 = vmatprep.mubr.bf16.mxu0 %v6120_v3 }
 0x26f   :  { %v2902_v25 = vpop.permute.xlu0 %2901  ;;  %5849 = vmatprep.subr.msk.bf16.mxu0 %vm98_vm1, %v2694_v11  ;;  %v2900_v59 = vpop.permute.xlu1 %2899 }
 0x270   :  { %v2908_v15 = vsel %vm920_vm6, %v2898_v35, %v2900_v59  ;;  %v2909_v12 = vsel %vm920_vm6, %v2900_v59, %v2902_v25 }
 0x271   :  { %6065 = vmatmul.mubr.msk.bf16.vlgmr.msra.gmra.mxu1 %vm94_vm2, %v5836_v9  ;;  %v2927_v49 = vsel %vm98_vm1, %v2909_v12, 0  ;;  %v5860_v9 = vld [vmem:[%s7501_s6 + $0x14] sm:$0xf] }
 0x272   :  { %2775 = vmatpush1.bf16.msra.mxu1 %v2705_v62  ;;  %2792 = vmatprep.mubr.bf16.mxu1 %v6120_v3  ;;  %v5868_v62 = vld [vmem:[%s7501_s6 + $0x18] sm:$0xf] }
 0x273   :  { %v3108_v61 = vpop.permute.xlu0 %3107  ;;  %v2904_v4 = vpop.permute.xlu1 %2903  ;;  %6068 = vmatprep.subr.bf16.mxu1 %v6129_v30 }
 0x274   :  { %v2910_v31 = vsel %vm920_vm6, %v2902_v25, %v2904_v4  ;;  %v2933_v5 = vsel %vm98_vm1, %v2904_v4, 0 }
 0x275   :  { %5846 = vmatmul.mubr.msk.bf16.vlgmr.msra.gmra.mxu0 %vm94_vm2, %v5844_v63 }
 0x276   :  { %2816 = vmatpush1.bf16.msra.mxu0 %v2711_v10  ;;  %2833 = vmatprep.mubr.bf16.mxu0 %v6120_v3 }
 0x277   :  { %v3112_v13 = vpop.permute.xlu0 %3111  ;;  %5853 = vmatprep.subr.msk.bf16.mxu0 %vm98_vm1, %v2906_v60  ;;  %v3110_v27 = vpop.permute.xlu1 %3109 }
 0x278   :  { %v3122_v32 = vsel %vm1137_vm7, %v3110_v27, %v3112_v13  ;;  %v3121_v19 = vsel %vm1137_vm7, %v3108_v61, %v3110_v27 }
 0x279   :  { %5848 = vmatmul.mubr.msk.bf16.vlgmr.msra.gmra.mxu1 %vm94_vm2, %v5844_v63  ;;  %v3131_v37 = vsel %vm98_vm1, %v3121_v19, 0 }
 0x27a   :  { %6069 = vmatpush3.bf16.msra.mxu1 %v2717_v43  ;;  %6070 = vmatprep.mubr.msk.bf16.mxu1 %vm6130_vm3, %v6129_v30 }
 0x27b   :  { %5855 = vmatprep.subr.msk.bf16.mxu1 %vm98_vm1, %v2908_v15  ;;  %v3116_v29 = vpop.permute.xlu0 %3115  ;;  %v3114_v16 = vpop.permute.xlu1 %3113 }
 0x27c   :  { %v3124_v14 = vsel %vm1137_vm7, %v3114_v16, %v3116_v29  ;;  %v3123_v21 = vsel %vm1137_vm7, %v3112_v13, %v3114_v16 }
 0x27d   :  { %5850 = vmatmul.mubr.msk.bf16.vlgmr.msra.gmra.mxu0 %vm94_vm2, %v5844_v63  ;;  %v3137_v20 = vsel %vm98_vm1, %v3123_v21, 0 }
 0x27e   :  { %2950 = vmatpush1.bf16.msra.mxu0 %v2915_v46  ;;  %2967 = vmatprep.mubr.bf16.mxu0 %v6120_v3 }
 0x27f   :  { %5857 = vmatprep.subr.msk.bf16.mxu0 %vm98_vm1, %v2910_v31  ;;  %v3118_v0 = vpop.permute.xlu1 %3117  ;;  %v3120_v6 = vpop.permute.xlu0 %3119 }
 0x280   :  { %v3126_v36 = vsel %vm1137_vm7, %v3118_v0, %v3120_v6  ;;  %v3125_v54 = vsel %vm1137_vm7, %v3116_v29, %v3118_v0  ;;  %v3149_v55 = vsel %vm98_vm1, %v3120_v6, 0  ;;  %v5876_v0 = vld [vmem:[%s7501_s6 + $0x1c] sm:$0xf] }
 0x281   :  { %6071 = vmatmul.mubr.msk.bf16.vlgmr.msra.gmra.mxu1 %vm94_vm2, %v5844_v63  ;;  %v3143_v44 = vsel %vm98_vm1, %v3125_v54, 0 }
 0x282   :  { %2991 = vmatpush1.bf16.msra.mxu1 %v2921_v45  ;;  %3008 = vmatprep.mubr.bf16.mxu1 %v6120_v3 }
 0x283   :  { %v3324_v17 = vpop.permute.xlu1 %3323  ;;  %6074 = vmatprep.subr.bf16.mxu1 %v6129_v30  ;;  %v3326_v33 = vpop.permute.xlu0 %3325 }
 0x284   :  { %v3337_v56 = vsel %vm1354_vm8, %v3324_v17, %v3326_v33 }
 0x285   :  { %5854 = vmatmul.mubr.msk.bf16.vlgmr.msra.gmra.mxu0 %vm94_vm2, %v5852_v2  ;;  %v3347_v35 = vsel %vm98_vm1, %v3337_v56, 0 }
 0x286   :  { %3032 = vmatpush1.bf16.msra.mxu0 %v2927_v49  ;;  %3049 = vmatprep.mubr.bf16.mxu0 %v6120_v3 }
 0x287   :  { %5861 = vmatprep.subr.msk.bf16.mxu0 %vm98_vm1, %v3122_v32  ;;  %v3328_v48 = vpop.permute.xlu1 %3327  ;;  %v3330_v7 = vpop.permute.xlu0 %3329 }
 0x288   :  { %v3338_v52 = vsel %vm1354_vm8, %v3326_v33, %v3328_v48  ;;  %v3339_v58 = vsel %vm1354_vm8, %v3328_v48, %v3330_v7 }
 0x289   :  { %5856 = vmatmul.mubr.msk.bf16.vlgmr.msra.gmra.mxu1 %vm94_vm2, %v5852_v2  ;;  %v3353_v25 = vsel %vm98_vm1, %v3339_v58, 0 }
 0x28a   :  { %6075 = vmatpush3.bf16.msra.mxu1 %v2933_v5  ;;  %6076 = vmatprep.mubr.msk.bf16.mxu1 %vm6130_vm3, %v6129_v30 }
 0x28b   :  { %5863 = vmatprep.subr.msk.bf16.mxu1 %vm98_vm1, %v3124_v14  ;;  %v3332_v34 = vpop.permute.xlu1 %3331  ;;  %v3334_v41 = vpop.permute.xlu0 %3333 }
 0x28c   :  { %v3340_v23 = vsel %vm1354_vm8, %v3330_v7, %v3332_v34  ;;  %v3341_v59 = vsel %vm1354_vm8, %v3332_v34, %v3334_v41  ;;  %v5884_v7 = vld [vmem:[%s7501_s6 + $0x20] sm:$0xf] }
 0x28d   :  { %5858 = vmatmul.mubr.msk.bf16.vlgmr.msra.gmra.mxu0 %vm94_vm2, %v5852_v2  ;;  %v3359_v61 = vsel %vm98_vm1, %v3341_v59, 0 }
 0x28e   :  { %3166 = vmatpush1.bf16.msra.mxu0 %v3131_v37  ;;  %3183 = vmatprep.mubr.bf16.mxu0 %v6120_v3 }
 0x28f   :  { %5865 = vmatprep.subr.msk.bf16.mxu0 %vm98_vm1, %v3126_v36  ;;  %v3336_v39 = vpop.permute.xlu1 %3335  ;;  %v3540_v42 = vpop.permute.xlu0 %3539 }
 0x290   :  { %v3342_v57 = vsel %vm1354_vm8, %v3334_v41, %v3336_v39  ;;  %v3365_v10 = vsel %vm98_vm1, %v3336_v39, 0 }
 0x291   :  { %6077 = vmatmul.mubr.msk.bf16.vlgmr.msra.gmra.mxu1 %vm94_vm2, %v5852_v2 }
 0x292   :  { %3207 = vmatpush1.bf16.msra.mxu1 %v3137_v20  ;;  %3224 = vmatprep.mubr.bf16.mxu1 %v6120_v3 }
 0x293   :  { %6080 = vmatprep.subr.bf16.mxu1 %v6129_v30  ;;  %v3542_v53 = vpop.permute.xlu1 %3541  ;;  %v3544_v11 = vpop.permute.xlu0 %3543 }
 0x294   :  { %v3554_v4 = vsel %vm1571_vm9, %v3542_v53, %v3544_v11  ;;  %v3553_v13 = vsel %vm1571_vm9, %v3540_v42, %v3542_v53 }
 0x295   :  { %5862 = vmatmul.mubr.msk.bf16.vlgmr.msra.gmra.mxu0 %vm94_vm2, %v5860_v9  ;;  %v3563_v1 = vsel %vm98_vm1, %v3553_v13, 0 }
 0x296   :  { %3248 = vmatpush1.bf16.msra.mxu0 %v3143_v44  ;;  %3265 = vmatprep.mubr.bf16.mxu0 %v6120_v3 }
 0x297   :  { %5869 = vmatprep.subr.msk.bf16.mxu0 %vm98_vm1, %v3338_v52  ;;  %v3546_v38 = vpop.permute.xlu1 %3545  ;;  %v3548_v63 = vpop.permute.xlu0 %3547 }
 0x298   :  { %v3556_v27 = vsel %vm1571_vm9, %v3546_v38, %v3548_v63  ;;  %v3555_v15 = vsel %vm1571_vm9, %v3544_v11, %v3546_v38 }
 0x299   :  { %5864 = vmatmul.mubr.msk.bf16.vlgmr.msra.gmra.mxu1 %vm94_vm2, %v5860_v9  ;;  %v3569_v46 = vsel %vm98_vm1, %v3555_v15, 0 }
 0x29a   :  { %6081 = vmatpush3.bf16.msra.mxu1 %v3149_v55  ;;  %6082 = vmatprep.mubr.msk.bf16.mxu1 %vm6130_vm3, %v6129_v30 }
 0x29b   :  { %5871 = vmatprep.subr.msk.bf16.mxu1 %vm98_vm1, %v3340_v23  ;;  %v3550_v40 = vpop.permute.xlu1 %3549  ;;  %v3552_v43 = vpop.permute.xlu0 %3551 }
 0x29c   :  { %v3558_v29 = vsel %vm1571_vm9, %v3550_v40, %v3552_v43  ;;  %v3557_v31 = vsel %vm1571_vm9, %v3548_v63, %v3550_v40  ;;  %v3581_v17 = vsel %vm98_vm1, %v3552_v43, 0 }
 0x29d   :  { %5866 = vmatmul.mubr.msk.bf16.vlgmr.msra.gmra.mxu0 %vm94_vm2, %v5860_v9  ;;  %v3575_v45 = vsel %vm98_vm1, %v3557_v31, 0 }
 0x29e   :  { %3382 = vmatpush1.bf16.msra.mxu0 %v3347_v35  ;;  %3399 = vmatprep.mubr.bf16.mxu0 %v6120_v3 }
 0x29f   :  { %5873 = vmatprep.subr.msk.bf16.mxu0 %vm98_vm1, %v3342_v57  ;;  %v3756_v60 = vpop.permute.xlu1 %3755  ;;  %v3758_v18 = vpop.permute.xlu0 %3757 }
 0x2a0   :  { %v3769_v49 = vsel %vm1788_vm10, %v3756_v60, %v3758_v18 }
 0x2a1   :  { %6083 = vmatmul.mubr.msk.bf16.vlgmr.msra.gmra.mxu1 %vm94_vm2, %v5860_v9  ;;  %v3779_v48 = vsel %vm98_vm1, %v3769_v49, 0 }
 0x2a2   :  { %3423 = vmatpush1.bf16.msra.mxu1 %v3353_v25  ;;  %3440 = vmatprep.mubr.bf16.mxu1 %v6120_v3 }
 0x2a3   :  { %6086 = vmatprep.subr.bf16.mxu1 %v6129_v30  ;;  %v3760_v16 = vpop.permute.xlu1 %3759  ;;  %v3762_v2 = vpop.permute.xlu0 %3761 }
 0x2a4   :  { %v3770_v12 = vsel %vm1788_vm10, %v3758_v18, %v3760_v16  ;;  %v3771_v19 = vsel %vm1788_vm10, %v3760_v16, %v3762_v2 }
 0x2a5   :  { %5870 = vmatmul.mubr.msk.bf16.vlgmr.msra.gmra.mxu0 %vm94_vm2, %v5868_v62  ;;  %v3785_v34 = vsel %vm98_vm1, %v3771_v19, 0 }
 0x2a6   :  { %3464 = vmatpush1.bf16.msra.mxu0 %v3359_v61  ;;  %3481 = vmatprep.mubr.bf16.mxu0 %v6120_v3 }
 0x2a7   :  { %5877 = vmatprep.subr.msk.bf16.mxu0 %vm98_vm1, %v3554_v4  ;;  %v3764_v6 = vpop.permute.xlu1 %3763  ;;  %v3766_v5 = vpop.permute.xlu0 %3765 }
 0x2a8   :  { %v3772_v32 = vsel %vm1788_vm10, %v3762_v2, %v3764_v6  ;;  %v3773_v37 = vsel %vm1788_vm10, %v3764_v6, %v3766_v5 }
 0x2a9   :  { %5872 = vmatmul.mubr.msk.bf16.vlgmr.msra.gmra.mxu1 %vm94_vm2, %v5868_v62  ;;  %v3791_v21 = vsel %vm98_vm1, %v3773_v37, 0 }
 0x2aa   :  { %6087 = vmatpush3.bf16.msra.mxu1 %v3365_v10  ;;  %6088 = vmatprep.mubr.msk.bf16.mxu1 %vm6130_vm3, %v6129_v30 }
 0x2ab   :  { %5879 = vmatprep.subr.msk.bf16.mxu1 %vm98_vm1, %v3556_v27  ;;  %v3768_v33 = vpop.permute.xlu1 %3767 }
 0x2ac   :  { %v3774_v14 = vsel %vm1788_vm10, %v3766_v5, %v3768_v33  ;;  %v3797_v36 = vsel %vm98_vm1, %v3768_v33, 0 }
 0x2ad   :  { %5874 = vmatmul.mubr.msk.bf16.vlgmr.msra.gmra.mxu0 %vm94_vm2, %v5868_v62 }
 0x2ae   :  { %3598 = vmatpush1.bf16.msra.mxu0 %v3563_v1  ;;  %3615 = vmatprep.mubr.bf16.mxu0 %v6120_v3 }
 0x2af   :  { %5881 = vmatprep.subr.msk.bf16.mxu0 %vm98_vm1, %v3558_v29 }
 0x2b1   :  { %6089 = vmatmul.mubr.msk.bf16.vlgmr.msra.gmra.mxu1 %vm94_vm2, %v5868_v62 }
 0x2b2   :  { %3639 = vmatpush1.bf16.msra.mxu1 %v3569_v46  ;;  %3656 = vmatprep.mubr.bf16.mxu1 %v6120_v3 }
 0x2b3   :  { %6092 = vmatprep.subr.bf16.mxu1 %v6129_v30 }
 0x2b5   :  { %5878 = vmatmul.mubr.msk.bf16.vlgmr.msra.gmra.mxu0 %vm94_vm2, %v5876_v0 }
 0x2b6   :  { %3680 = vmatpush1.bf16.msra.mxu0 %v3575_v45  ;;  %3697 = vmatprep.mubr.bf16.mxu0 %v6120_v3 }
 0x2b7   :  { %5885 = vmatprep.subr.msk.bf16.mxu0 %vm98_vm1, %v3770_v12 }
 0x2b9   :  { %5880 = vmatmul.mubr.msk.bf16.vlgmr.msra.gmra.mxu1 %vm94_vm2, %v5876_v0 }
 0x2ba   :  { %6093 = vmatpush3.bf16.msra.mxu1 %v3581_v17  ;;  %6094 = vmatprep.mubr.msk.bf16.mxu1 %vm6130_vm3, %v6129_v30 }
 0x2bb   :  { %5887 = vmatprep.subr.msk.bf16.mxu1 %vm98_vm1, %v3772_v32 }
 0x2bd   :  { %5882 = vmatmul.mubr.msk.bf16.vlgmr.msra.gmra.mxu0 %vm94_vm2, %v5876_v0 }
 0x2be   :  { %3814 = vmatpush1.bf16.msra.mxu0 %v3779_v48  ;;  %3831 = vmatprep.mubr.bf16.mxu0 %v6120_v3 }
 0x2bf   :  { %5889 = vmatprep.subr.msk.bf16.mxu0 %vm98_vm1, %v3774_v14 }
 0x2c1   :  { %6095 = vmatmul.mubr.msk.bf16.vlgmr.msra.gmra.mxu1 %vm94_vm2, %v5876_v0 }
 0x2c2   :  { %3855 = vmatpush1.bf16.msra.mxu1 %v3785_v34  ;;  %3872 = vmatprep.mubr.bf16.mxu1 %v6120_v3 }
 0x2c3   :  { %6098 = vmatprep.subr.bf16.mxu1 %v6129_v30 }
 0x2c5   :  { %5886 = vmatmul.mubr.msk.bf16.vlgmr.msra.gmra.mxu0 %vm94_vm2, %v5884_v7 }
 0x2c6   :  { %3896 = vmatpush1.bf16.msra.mxu0 %v3791_v21  ;;  %3913 = vmatprep.mubr.bf16.mxu0 %v6120_v3 }
 0x2c9   :  { %5888 = vmatmul.mubr.msk.bf16.vlgmr.msra.gmra.mxu1 %vm94_vm2, %v5884_v7 }
 0x2ca   :  { %6099 = vmatpush3.bf16.msra.mxu1 %v3797_v36  ;;  %6100 = vmatprep.mubr.msk.bf16.mxu1 %vm6130_vm3, %v6129_v30 }
 0x2cd   :  { %5890 = vmatmul.mubr.msk.bf16.vlgmr.msra.gmra.mxu0 %vm94_vm2, %v5884_v7 }
 0x2ce   :  { %4117 = vmatprep.mubr.bf16.mxu0 %v6120_v3 }
 0x2d1   :  { %6101 = vmatmul.mubr.msk.bf16.vlgmr.msra.gmra.mxu1 %vm94_vm2, %v5884_v7 }
 0x2d2   :  { %4158 = vmatprep.mubr.bf16.mxu1 %v6120_v3 }
 0x305   :  { %v2141_v20 = vpop.f32.mrf.mxu0 }
 0x307   :  { %v2143_v39 = vpop.f32.mrf.mxu0 }
 0x309   :  { %v2145_v54 = vpop.f32.mrf.mxu0  ;;  %v2182_v9 = vpop.f32.mrf.mxu1 }
 0x30b   :  { %v2146_v41 = vpop.f32.mrf.mxu0  ;;  %v2184_v44 = vpop.f32.mrf.mxu1 }
 0x30d   :  { %v2186_v52 = vpop.f32.mrf.mxu1  ;;  %v2223_v53 = vpop.f32.mrf.mxu0 }
 0x30f   :  { %v2187_v55 = vpop.f32.mrf.mxu1  ;;  %v2225_v42 = vpop.f32.mrf.mxu0 }
 0x311   :  { %v2227_v56 = vpop.f32.mrf.mxu0  ;;  %v2264_v30 = vpop.f32.mrf.mxu1 }
 0x313   :  { %v2228_v23 = vpop.f32.mrf.mxu0  ;;  %v6054_v35 = vpop.f32.mrf.mxu1 }
 0x315   :  { %v2267_v38 = vpop.f32.mrf.mxu1  ;;  %v2328_v58 = vpop.f32.mrf.mxu0 }
 0x316   :  { %v2329_v57 = vadd.f32 %v2328_v58, %v2141_v20 }
 0x317   :  { %v6055_v11 = vpop.f32.mrf.mxu1  ;;  %v2330_v25 = vpop.f32.mrf.mxu0 }
 0x318   :  { %v2331_v59 = vadd.f32 %v2330_v25, %v2143_v39 }
 0x319   :  { %v2332_v62 = vpop.f32.mrf.mxu0  ;;  %v2369_v40 = vpop.f32.mrf.mxu1 }
 0x31a   :  { %v2370_v61 = vadd.f32 %v2369_v40, %v2182_v9 }
 0x31b   :  { %v2333_v63 = vpop.f32.mrf.mxu0  ;;  %v2371_v4 = vpop.f32.mrf.mxu1 }
 0x31c   :  { %v2372_v10 = vadd.f32 %v2371_v4, %v2184_v44 }
 0x31d   :  { %v2373_v60 = vpop.f32.mrf.mxu1  ;;  %v2410_v13 = vpop.f32.mrf.mxu0 }
 0x31e   :  { %v2411_v27 = vadd.f32 %v2410_v13, %v2223_v53 }
 0x31f   :  { %v2374_v43 = vpop.f32.mrf.mxu1  ;;  %v2412_v1 = vpop.f32.mrf.mxu0 }
 0x320   :  { %v2413_v15 = vadd.f32 %v2412_v1, %v2225_v42 }
 0x321   :  { %v2414_v29 = vpop.f32.mrf.mxu0  ;;  %v2451_v16 = vpop.f32.mrf.mxu1 }
 0x322   :  { %v2452_v46 = vadd.f32 %v2451_v16, %v2264_v30 }
 0x323   :  { %v2415_v18 = vpop.f32.mrf.mxu0  ;;  %v6060_v31 = vpop.f32.mrf.mxu1 }
 0x325   :  { %v2454_v0 = vpop.f32.mrf.mxu1  ;;  %v2537_v45 = vpop.f32.mrf.mxu0 }
 0x326   :  { %v2666_v6 = vadd.f32 %v2537_v45, %v2329_v57 }
 0x327   :  { %v6061_v12 = vpop.f32.mrf.mxu1  ;;  %v2539_v2 = vpop.f32.mrf.mxu0 }
 0x328   :  { %v2667_v17 = vadd.f32 %v2539_v2, %v2331_v59 }
 0x329   :  { %v2541_v49 = vpop.f32.mrf.mxu0  ;;  %v2578_v32 = vpop.f32.mrf.mxu1 }
 0x32a   :  { %v2668_v33 = vadd.f32 %v2578_v32, %v2370_v61 }
 0x32b   :  { %v2542_v48 = vpop.f32.mrf.mxu0  ;;  %v2580_v5 = vpop.f32.mrf.mxu1 }
 0x32c   :  { %v2669_v19 = vadd.f32 %v2580_v5, %v2372_v10 }
 0x32d   :  { %v2582_v14 = vpop.f32.mrf.mxu1  ;;  %v2619_v34 = vpop.f32.mrf.mxu0 }
 0x32e   :  { %v2670_v37 = vadd.f32 %v2619_v34, %v2411_v27 }
 0x32f   :  { %v2583_v7 = vpop.f32.mrf.mxu1  ;;  %v2621_v21 = vpop.f32.mrf.mxu0 }
 0x330   :  { %v2671_v36 = vadd.f32 %v2621_v21, %v2413_v15 }
 0x331   :  { %v2623_v20 = vpop.f32.mrf.mxu0  ;;  %v2660_v39 = vpop.f32.mrf.mxu1 }
 0x332   :  { %v2672_v54 = vadd.f32 %v2660_v39, %v2452_v46 }
 0x333   :  { %v2624_v9 = vpop.f32.mrf.mxu0  ;;  %v6066_v41 = vpop.f32.mrf.mxu1 }
 0x335   :  { %v2663_v44 = vpop.f32.mrf.mxu1  ;;  %v2753_v52 = vpop.f32.mrf.mxu0 }
 0x336   :  { %v7044_v53 = vadd.f32 %v2753_v52, %v2666_v6 }
 0x337   :  { %v6067_v55 = vpop.f32.mrf.mxu1  ;;  %v2755_v42 = vpop.f32.mrf.mxu0 }
 0x338   :  { %v7046_v56 = vadd.f32 %v2755_v42, %v2667_v17 }
 0x339   :  { %v2757_v30 = vpop.f32.mrf.mxu0  ;;  %v2794_v23 = vpop.f32.mrf.mxu1 }
 0x33a   :  { %v7048_v35 = vadd.f32 %v2794_v23, %v2668_v33 }
 0x33b   :  { %v2758_v38 = vpop.f32.mrf.mxu0  ;;  %v2796_v58 = vpop.f32.mrf.mxu1 }
 0x33c   :  { %v7050_v57 = vadd.f32 %v2796_v58, %v2669_v19 }
 0x33d   :  { %v2798_v11 = vpop.f32.mrf.mxu1  ;;  %v2835_v25 = vpop.f32.mrf.mxu0 }
 0x33e   :  { %v7052_v59 = vadd.f32 %v2835_v25, %v2670_v37 }
 0x33f   :  { %v2799_v62 = vpop.f32.mrf.mxu1  ;;  %v2837_v40 = vpop.f32.mrf.mxu0 }
 0x340   :  { %v7054_v61 = vadd.f32 %v2837_v40, %v2671_v36 }
 0x341   :  { %v2839_v63 = vpop.f32.mrf.mxu0  ;;  %v2876_v4 = vpop.f32.mrf.mxu1 }
 0x342   :  { %v7056_v10 = vadd.f32 %v2876_v4, %v2672_v54 }
 0x343   :  { %v2840_v60 = vpop.f32.mrf.mxu0  ;;  %v6072_v13 = vpop.f32.mrf.mxu1 }
 0x345   :  { %v2879_v27 = vpop.f32.mrf.mxu1  ;;  %v2969_v43 = vpop.f32.mrf.mxu0 }
 0x347   :  { %v6073_v1 = vpop.f32.mrf.mxu1  ;;  %v2971_v15 = vpop.f32.mrf.mxu0 }
 0x349   :  { %v2973_v29 = vpop.f32.mrf.mxu0  ;;  %v3010_v16 = vpop.f32.mrf.mxu1 }
 0x34b   :  { %v2974_v46 = vpop.f32.mrf.mxu0  ;;  %v7058_v18 = vpop.f32.mrf.mxu1 }
 0x34d   :  { %v3014_v31 = vpop.f32.mrf.mxu1  ;;  %v7060_v0 = vpop.f32.mrf.mxu0 }
 0x34f   :  { %v3015_v45 = vpop.f32.mrf.mxu1  ;;  %v7062_v6 = vpop.f32.mrf.mxu0 }
 0x351   :  { %v3055_v12 = vpop.f32.mrf.mxu0  ;;  %v7064_v2 = vpop.f32.mrf.mxu1 }
 0x353   :  { %v3056_v17 = vpop.f32.mrf.mxu0  ;;  %v6078_v49 = vpop.f32.mrf.mxu1 }
 0x355   :  { %v3095_v32 = vpop.f32.mrf.mxu1  ;;  %v3185_v33 = vpop.f32.mrf.mxu0 }
 0x357   :  { %v6079_v48 = vpop.f32.mrf.mxu1  ;;  %v3187_v5 = vpop.f32.mrf.mxu0 }
 0x358   :  { %v3098_v48 = vadd.f32 %v2969_v43, %v7044_v53  ;;  %v3101_v53 = vadd.f32 %v7058_v18, %v7050_v57  ;;  %v3103_v57 = vadd.f32 %v7062_v6, %v7054_v61 }
 0x359   :  { %v3189_v19 = vpop.f32.mrf.mxu0  ;;  %v3226_v14 = vpop.f32.mrf.mxu1 }
 0x35b   :  { %v3190_v34 = vpop.f32.mrf.mxu0  ;;  %v3228_v37 = vpop.f32.mrf.mxu1 }
 0x35d   :  { %v3230_v7 = vpop.f32.mrf.mxu1  ;;  %v3267_v21 = vpop.f32.mrf.mxu0 }
 0x35e   :  { %v3099_v7 = vadd.f32 %v2971_v15, %v7046_v56  ;;  %v3102_v15 = vadd.f32 %v7060_v0, %v7052_v59 }
 0x35f   :  { %v3231_v36 = vpop.f32.mrf.mxu1  ;;  %v7066_v20 = vpop.f32.mrf.mxu0 }
 0x360   :  { %v3314_v36 = vadd.f32 %v3185_v33, %v3098_v48  ;;  %v3318_v18 = vadd.f32 %v3267_v21, %v3102_v15 }
 0x361   :  { %v3271_v39 = vpop.f32.mrf.mxu0  ;;  %v7068_v54 = vpop.f32.mrf.mxu1 }
 0x363   :  { %v3272_v9 = vpop.f32.mrf.mxu0  ;;  %v6084_v41 = vpop.f32.mrf.mxu1 }
 0x364   :  { %v3100_v41 = vadd.f32 %v3010_v16, %v7048_v35 }
 0x365   :  { %v3311_v44 = vpop.f32.mrf.mxu1  ;;  %v3401_v52 = vpop.f32.mrf.mxu0 }
 0x366   :  { %v3315_v44 = vadd.f32 %v3187_v5, %v3099_v7  ;;  %v3316_v43 = vadd.f32 %v3226_v14, %v3100_v41  ;;  %v7087_v5 = vpop.permute.xlu0 %3972 }
 0x367   :  { %v6085_v55 = vpop.f32.mrf.mxu1  ;;  %v3403_v42 = vpop.f32.mrf.mxu0 }
 0x368   :  { %v3530_v55 = vadd.f32 %v3401_v52, %v3314_v36  ;;  %v3317_v52 = vadd.f32 %v3228_v37, %v3101_v53  ;;  %v3104_v37 = vadd.f32 %v7064_v2, %v7056_v10 }
 0x369   :  { %v3405_v30 = vpop.f32.mrf.mxu0  ;;  %v3442_v23 = vpop.f32.mrf.mxu1 }
 0x36a   :  { %v7078_v30 = vld [vmem:[%s7502_s3] sm:$0x7f] }
 0x36b   :  { %v3406_v38 = vpop.f32.mrf.mxu0  ;;  %v3444_v58 = vpop.f32.mrf.mxu1  ;;  %v3986_v16 = vrot.slane %v7078_v30, %v2005_v22  ;;  %v3990_v59 = vrot.slane %v7078_v30, %v2009_v24  ;;  %v3994_v6 = vrot.slane %v7078_v30, %v2013_v51  ;;  %v3998_v2 = vrot.slane %v7078_v30, %v2017_v47 }
 0x36c   :  { %v3533_v0 = vadd.f32 %v3444_v58, %v3317_v52 }
 0x36d   :  { %v3446_v11 = vpop.f32.mrf.mxu1  ;;  %v3483_v25 = vpop.f32.mrf.mxu0 }
 0x36f   :  { %v3447_v62 = vpop.f32.mrf.mxu1  ;;  %v3485_v40 = vpop.f32.mrf.mxu0 }
 0x370   :  { %v3531_v62 = vadd.f32 %v3403_v42, %v3315_v44 }
 0x371   :  { %v3487_v63 = vpop.f32.mrf.mxu0  ;;  %v7070_v4 = vpop.f32.mrf.mxu1 }
 0x372   :  { %v3532_v63 = vadd.f32 %v3442_v23, %v3316_v43  ;;  %v3319_v23 = vadd.f32 %v7066_v20, %v3103_v57 }
 0x373   :  { %v3488_v60 = vpop.f32.mrf.mxu0  ;;  %v6090_v13 = vpop.f32.mrf.mxu1 }
 0x375   :  { %v3527_v27 = vpop.f32.mrf.mxu1  ;;  %v3617_v1 = vpop.f32.mrf.mxu0 }
 0x376   :  { %v3746_v56 = vadd.f32 %v3617_v1, %v3530_v55 }
 0x377   :  { %v6091_v29 = vpop.f32.mrf.mxu1  ;;  %v3619_v46 = vpop.f32.mrf.mxu0 }
 0x378   :  { %v3747_v60 = vadd.f32 %v3619_v46, %v3531_v62  ;;  %v3534_v29 = vadd.f32 %v3483_v25, %v3318_v18  ;;  %v5556_v18 = vld [vmem:[%s7504_s9] sm:$0xf] }
 0x379   :  { %v3621_v31 = vpop.f32.mrf.mxu0  ;;  %v3658_v45 = vpop.f32.mrf.mxu1 }
 0x37a   :  { %v3748_v27 = vadd.f32 %v3658_v45, %v3532_v63  ;;  %v3320_v45 = vadd.f32 %v7068_v54, %v3104_v37  ;;  %v4002_v54 = vrot.slane %v7078_v30, %v2021_v50  ;;  %v4006_v50 = vrot.slane %v7078_v30, %v2025_v26 }
 0x37b   :  { %v3622_v12 = vpop.f32.mrf.mxu0  ;;  %v3660_v17 = vpop.f32.mrf.mxu1 }
 0x37c   :  { %v3749_v21 = vadd.f32 %v3660_v17, %v3533_v0  ;;  %v3535_v12 = vadd.f32 %v3485_v40, %v3319_v23  ;;  %v5892_v23 = vld [vmem:[%s7505_s8 + $0x2] sm:$0x3] }
 0x37d   :  { %v3662_v49 = vpop.f32.mrf.mxu1  ;;  %v3699_v32 = vpop.f32.mrf.mxu0 }
 0x37e   :  { %v3750_v49 = vadd.f32 %v3699_v32, %v3534_v29 }
 0x37f   :  { %v3663_v19 = vpop.f32.mrf.mxu1  ;;  %v3701_v34 = vpop.f32.mrf.mxu0 }
 0x380   :  { %v3536_v19 = vadd.f32 %v7070_v4, %v3320_v45  ;;  %v3751_v40 = vadd.f32 %v3701_v34, %v3535_v12 }
 0x381   :  { %v3703_v39 = vpop.f32.mrf.mxu0  ;;  %v3740_v9 = vpop.f32.mrf.mxu1 }
 0x382   :  { %v3752_v47 = vadd.f32 %v3740_v9, %v3536_v19 }
 0x383   :  { %v3704_v38 = vpop.f32.mrf.mxu0  ;;  %v6096_v11 = vpop.f32.mrf.mxu1 }
 0x385   :  { %v3743_v33 = vpop.f32.mrf.mxu1  ;;  %v3833_v35 = vpop.f32.mrf.mxu0 }
 0x386   :  { %v3962_v13 = vadd.f32 %v3833_v35, %v3746_v56  ;;  %v4010_v33 = vrot.slane %v7078_v30, %v2029_v28 }
 0x387   :  { %v6097_v14 = vpop.f32.mrf.mxu1  ;;  %v3835_v42 = vpop.f32.mrf.mxu0 }
 0x388   :  { %v3975_v22 = vadd.f32 %v7087_v5, %v3962_v13  ;;  %v3963_v1 = vadd.f32 %v3835_v42, %v3747_v60 }
 0x389   :  { %v3837_v46 = vpop.f32.mrf.mxu0  ;;  %v3874_v61 = vpop.f32.mrf.mxu1 }
 0x38a   :  { %v4018_v31 = vmul.f32 %v3986_v16, %v3975_v22  ;;  %v3976_v24 = vadd.f32 %v7087_v5, %v3963_v1  ;;  %v3964_v58 = vadd.f32 %v3874_v61, %v3748_v27 }
 0x38b   :  { %v3838_v48 = vpop.f32.mrf.mxu0  ;;  %v3876_v10 = vpop.f32.mrf.mxu1 }
 0x38c   :  { %v7106_v20 = vpack.c.bf16 %v4018_v31, %v4018_v31  ;;  %v4019_v25 = vmul.f32 %v3990_v59, %v3976_v24  ;;  %v3977_v51 = vadd.f32 %v7087_v5, %v3964_v58  ;;  %v3965_v17 = vadd.f32 %v3876_v10, %v3749_v21 }
 0x38d   :  { %v3878_v7 = vpop.f32.mrf.mxu1  ;;  %v3915_v36 = vpop.f32.mrf.mxu0 }
 0x38e   :  { %v4020_v32 = vmul.f32 %v3994_v6, %v3977_v51  ;;  %v3978_v39 = vadd.f32 %v7087_v5, %v3965_v17  ;;  %v3966_v41 = vadd.f32 %v3915_v36, %v3750_v49  ;;  %4354 = vrot.lane.b32.xlu0 %v7106_v20, %s6122_s30  ;;  %v7116_v44 = vpack.c.bf16 %v4019_v25, %v4019_v25  ;;  %v4032_v25 = vld [vmem:[%s7505_s8] sm:$0x3] }
 0x38f   :  { %4042 = vrot.lane.b32.xlu1 %v7106_v20, %s6121_s27  ;;  %v3879_v4 = vpop.f32.mrf.mxu1  ;;  %v3917_v55 = vpop.f32.mrf.mxu0  ;;  %v4212_v12 = vsel %vm4066_vm11, %v7106_v20, 0 }
 0x390   :  { %v7123_v34 = vpack.c.bf16 %v4020_v32, %v4020_v32  ;;  %v4021_v38 = vmul.f32 %v3998_v2, %v3978_v39  ;;  %v3979_v11 = vadd.f32 %v7087_v5, %v3966_v41  ;;  %v3967_v53 = vadd.f32 %v3917_v55, %v3751_v40  ;;  %v5905_v4 = vld [vmem:[%s7505_s8 + $0x4] sm:$0x3] }
 0x391   :  { %v3919_v43 = vpop.f32.mrf.mxu0  ;;  %v3956_v62 = vpop.f32.mrf.mxu1 }
 0x392   :  { %v4022_v9 = vmul.f32 %v4002_v54, %v3979_v11  ;;  %v3980_v56 = vadd.f32 %v7087_v5, %v3967_v53  ;;  %v3968_v15 = vadd.f32 %v3956_v62, %v3752_v47  ;;  %4044 = vrot.lane.b32.xlu0 %v7116_v44, %s6121_s27  ;;  %v7134_v16 = vpack.c.bf16 %v4021_v38, %v4021_v38 }
 0x393   :  { %4046 = vrot.lane.b32.xlu1 %v7123_v34, %s6121_s27  ;;  %v3920_v26 = vpop.f32.mrf.mxu0  ;;  %v6102_v35 = vpop.f32.mrf.mxu1  ;;  %v4218_v10 = vsel %vm4066_vm11, %v7123_v34, 0 }
 0x394   :  { %v7136_v52 = vpack.c.bf16 %v4022_v9, %v4022_v9  ;;  %v4023_v63 = vmul.f32 %v4006_v50, %v3980_v56  ;;  %v3981_v60 = vadd.f32 %v7087_v5, %v3968_v15  ;;  %v5575_v5 = vld [vmem:[%s7503_s11] sm:$0xf] }
 0x395   :  { %v3959_v13 = vpop.f32.mrf.mxu1 }
 0x396   :  { %v4024_v57 = vmul.f32 %v4010_v33, %v3981_v60  ;;  %4048 = vrot.lane.b32.xlu0 %v7134_v16, %s6121_s27  ;;  %v7143_v28 = vpack.c.bf16 %v4023_v63, %v4023_v63  ;;  %v4224_v19 = vsel %vm4066_vm11, %v7136_v52, 0 }
 0x397   :  { %4050 = vrot.lane.b32.xlu1 %v7136_v52, %s6121_s27  ;;  %v6103_v8 = vpop.f32.mrf.mxu1 }
 0x398   :  { %v4031_v30 = vpack.c.bf16 %v4024_v57, %v4024_v57 }
 0x39a   :  { %4052 = vrot.lane.b32.xlu0 %v7143_v28, %s6121_s27 }
 0x39b   :  { %4054 = vrot.lane.b32.xlu1 %v4031_v30, %s6121_s27 }
 0x39e   :  { %4358 = vrot.lane.b32.xlu0 %v7123_v34, %s6122_s30 }
 0x39f   :  { %4356 = vrot.lane.b32.xlu1 %v7116_v44, %s6122_s30 }
 0x3a2   :  { %4362 = vrot.lane.b32.xlu0 %v7136_v52, %s6122_s30 }
 0x3a3   :  { %4360 = vrot.lane.b32.xlu1 %v7134_v16, %s6122_s30 }
 0x3a6   :  { %4528 = vrot.lane.b32.xlu0 %v7116_v44, %s6123_s0 }
 0x3a7   :  { %4364 = vrot.lane.b32.xlu1 %v7143_v28, %s6122_s30 }
 0x3aa   :  { %4532 = vrot.lane.b32.xlu0 %v7134_v16, %s6123_s0 }
 0x3ab   :  { %4526 = vrot.lane.b32.xlu1 %v7106_v20, %s6123_s0 }
 0x3ae   :  { %4536 = vrot.lane.b32.xlu0 %v7143_v28, %s6123_s0 }
 0x3af   :  { %4530 = vrot.lane.b32.xlu1 %v7123_v34, %s6123_s0 }
 0x3b2   :  { %4366 = vrot.lane.b32.xlu0 %v4031_v30, %s6122_s30 }
 0x3b3   :  { %4534 = vrot.lane.b32.xlu1 %v7136_v52, %s6123_s0 }
 0x3b6   :  { %4698 = vrot.lane.b32.xlu0 %v7106_v20, %s6124_s13 }
 0x3b7   :  { %4700 = vrot.lane.b32.xlu1 %v7116_v44, %s6124_s13 }
 0x3ba   :  { %4702 = vrot.lane.b32.xlu0 %v7123_v34, %s6124_s13 }
 0x3bb   :  { %4704 = vrot.lane.b32.xlu1 %v7134_v16, %s6124_s13 }
 0x3be   :  { %4706 = vrot.lane.b32.xlu0 %v7136_v52, %s6124_s13 }
 0x3bf   :  { %4708 = vrot.lane.b32.xlu1 %v7143_v28, %s6124_s13 }
 0x3c2   :  { %4872 = vrot.lane.b32.xlu0 %v7116_v44, %s6125_s14 }
 0x3c3   :  { %4538 = vrot.lane.b32.xlu1 %v4031_v30, %s6123_s0 }
 0x3c6   :  { %4876 = vrot.lane.b32.xlu0 %v7134_v16, %s6125_s14 }
 0x3c7   :  { %4870 = vrot.lane.b32.xlu1 %v7106_v20, %s6125_s14 }
 0x3ca   :  { %4710 = vrot.lane.b32.xlu0 %v4031_v30, %s6124_s13 }
 0x3cb   :  { %4874 = vrot.lane.b32.xlu1 %v7123_v34, %s6125_s14 }
 0x3ce   :  { %4880 = vrot.lane.b32.xlu0 %v7143_v28, %s6125_s14 }
 0x3cf   :  { %4878 = vrot.lane.b32.xlu1 %v7136_v52, %s6125_s14 }
 0x3d2   :  { %5042 = vrot.lane.b32.xlu0 %v7106_v20, %s6126_s15 }
 0x3d3   :  { %5044 = vrot.lane.b32.xlu1 %v7116_v44, %s6126_s15 }
 0x3d6   :  { %5046 = vrot.lane.b32.xlu0 %v7123_v34, %s6126_s15 }
 0x3d7   :  { %5048 = vrot.lane.b32.xlu1 %v7134_v16, %s6126_s15 }
 0x3da   :  { %5050 = vrot.lane.b32.xlu0 %v7136_v52, %s6126_s15 }
 0x3db   :  { %4882 = vrot.lane.b32.xlu1 %v4031_v30, %s6125_s14 }
 0x3de   :  { %5216 = vrot.lane.b32.xlu0 %v7116_v44, %s6127_s16 }
 0x3df   :  { %5052 = vrot.lane.b32.xlu1 %v7143_v28, %s6126_s15 }
 0x3e2   :  { %5054 = vrot.lane.b32.xlu0 %v4031_v30, %s6126_s15 }
 0x3e3   :  { %5214 = vrot.lane.b32.xlu1 %v7106_v20, %s6127_s16 }
 0x3e6   :  { %5220 = vrot.lane.b32.xlu0 %v7134_v16, %s6127_s16 }
 0x3e7   :  { %5218 = vrot.lane.b32.xlu1 %v7123_v34, %s6127_s16 }
 0x3ea   :  { %5224 = vrot.lane.b32.xlu0 %v7143_v28, %s6127_s16 }
 0x3eb   :  { %5222 = vrot.lane.b32.xlu1 %v7136_v52, %s6127_s16 }
 0x3ee   :  { %5386 = vrot.lane.b32.xlu0 %v7106_v20, %s6128_s17 }
 0x3ef   :  { %5388 = vrot.lane.b32.xlu1 %v7116_v44, %s6128_s17 }
 0x3f2   :  { %5390 = vrot.lane.b32.xlu0 %v7123_v34, %s6128_s17 }
 0x3f3   :  { %5226 = vrot.lane.b32.xlu1 %v4031_v30, %s6127_s16 }
 0x3f6   :  { %5394 = vrot.lane.b32.xlu0 %v7136_v52, %s6128_s17  ;;  %v5912_v52 = vld [vmem:[%s7505_s8 + $0x6] sm:$0x3] }
 0x3f7   :  { %5392 = vrot.lane.b32.xlu1 %v7134_v16, %s6128_s17 }
 0x3fa   :  { %5398 = vrot.lane.b32.xlu0 %v4031_v30, %s6128_s17 }
 0x3fb   :  { %5396 = vrot.lane.b32.xlu1 %v7143_v28, %s6128_s17 }
 0x3fe   :  { %5578 = vperm.xlu0 %6115, %v5575_v5  }
 0x3ff   :  { %5559 = vperm.xlu1 %6116, %v5556_v18  }
 0x400   :  { %v4355_v14 = vpop.permute.xlu0 %4354 }
 0x401   :  { %v4043_v42 = vpop.permute.xlu1 %4042 }
 0x404   :  { %v4045_v59 = vpop.permute.xlu0 %4044 }
 0x405   :  { %v4056_v0 = vsel %vm87_vm0, %v4043_v42, %v4045_v59  ;;  %v4047_v27 = vpop.permute.xlu1 %4046 }
 0x406   :  { %v4068_v22 = vsel %vm4066_vm11, %v4056_v0, 0  ;;  %v4057_v1 = vsel %vm87_vm0, %v4045_v59, %v4047_v27 }
 0x407   :  { %5893 = vmatprep.subr.msk.bf16.mxu0 %vm4066_vm11, %v4057_v1 }
 0x408   :  { %4100 = vmatpush1.bf16.msra.mxu0 %v4068_v22  ;;  %v4049_v37 = vpop.permute.xlu0 %4048  ;;  %v5919_v22 = vld [vmem:[%s7505_s8 + $0x8] sm:$0x3] }
 0x409   :  { %v4058_v29 = vsel %vm87_vm0, %v4047_v27, %v4049_v37  ;;  %v4051_v46 = vpop.permute.xlu1 %4050 }
 0x40a   :  { %v4074_v61 = vsel %vm4066_vm11, %v4058_v29, 0  ;;  %v4059_v6 = vsel %vm87_vm0, %v4049_v37, %v4051_v46 }
 0x40b   :  { %5894 = vmatmul.mubr.msk.bf16.vlgmr.msra.gmra.mxu0 %vm4062_vm12, %v5892_v23  ;;  %5895 = vmatprep.subr.msk.bf16.mxu1 %vm4066_vm11, %v4059_v6 }
 0x40c   :  { %4141 = vmatpush1.bf16.msra.mxu1 %v4074_v61  ;;  %v4053_v21 = vpop.permute.xlu0 %4052  ;;  %4199 = vmatprep.mubr.bf16.mxu0 %v6120_v3 }
 0x40d   :  { %v4060_v31 = vsel %vm87_vm0, %v4051_v46, %v4053_v21  ;;  %5899 = vmatprep.subr.msk.bf16.mxu1 %vm4066_vm11, %v7116_v44  ;;  %v4055_v24 = vpop.permute.xlu1 %4054 }
 0x40e   :  { %v4080_v58 = vsel %vm4066_vm11, %v4060_v31, 0  ;;  %v4061_v45 = vsel %vm87_vm0, %v4053_v21, %v4055_v24 }
 0x40f   :  { %5896 = vmatmul.mubr.msk.bf16.vlgmr.msra.gmra.mxu1 %vm4062_vm12, %v5892_v23  ;;  %5897 = vmatprep.subr.msk.bf16.mxu0 %vm4066_vm11, %v4061_v45 }
 0x410   :  { %4182 = vmatpush1.bf16.msra.mxu0 %v4080_v58  ;;  %4244 = vmatpush1.bf16.msra.mxu1 %v4212_v12  ;;  %v4359_v49 = vpop.permute.xlu0 %4358 }
 0x411   :  { %5901 = vmatprep.subr.msk.bf16.mxu0 %vm4066_vm11, %v7134_v16  ;;  %v4357_v48 = vpop.permute.xlu1 %4356  ;;  %5903 = vmatprep.subr.msk.bf16.mxu1 %vm4066_vm11, %v7143_v28 }
 0x412   :  { %4261 = vmatprep.mubr.bf16.mxu1 %v6120_v3  ;;  %v4369_v2 = vsel %vm486_vm4, %v4357_v48, %v4359_v49  ;;  %v4368_v7 = vsel %vm486_vm4, %v4355_v14, %v4357_v48 }
 0x413   :  { %5898 = vmatmul.mubr.msk.bf16.vlgmr.msra.gmra.mxu0 %vm4062_vm12, %v5892_v23  ;;  %v4378_v40 = vsel %vm4066_vm11, %v4368_v7, 0 }
 0x414   :  { %4285 = vmatpush1.bf16.msra.mxu0 %v4218_v10  ;;  %v4363_v20 = vpop.permute.xlu0 %4362  ;;  %4302 = vmatprep.mubr.bf16.mxu0 %v6120_v3 }
 0x415   :  { %5906 = vmatprep.subr.msk.bf16.mxu0 %vm4066_vm11, %v4369_v2  ;;  %v4361_v51 = vpop.permute.xlu1 %4360 }
 0x416   :  { %v4371_v17 = vsel %vm486_vm4, %v4361_v51, %v4363_v20  ;;  %v4370_v32 = vsel %vm486_vm4, %v4359_v49, %v4361_v51  ;;  %v5926_v51 = vld [vmem:[%s7505_s8 + $0xa] sm:$0x3] }
 0x417   :  { %5900 = vmatmul.mubr.msk.bf16.vlgmr.msra.gmra.mxu1 %vm4062_vm12, %v4032_v25  ;;  %v4384_v47 = vsel %vm4066_vm11, %v4370_v32, 0 }
 0x418   :  { %4326 = vmatpush1.bf16.msra.mxu1 %v4224_v19  ;;  %v4529_v36 = vpop.permute.xlu0 %4528  ;;  %4343 = vmatprep.mubr.bf16.mxu1 %v6120_v3 }
 0x419   :  { %5908 = vmatprep.subr.msk.bf16.mxu1 %vm4066_vm11, %v4371_v17  ;;  %v4365_v54 = vpop.permute.xlu1 %4364 }
 0x41a   :  { %v4372_v34 = vsel %vm486_vm4, %v4363_v20, %v4365_v54 }
 0x41b   :  { %5902 = vmatmul.mubr.msk.bf16.vlgmr.msra.gmra.mxu0 %vm4062_vm12, %v4032_v25  ;;  %v4390_v62 = vsel %vm4066_vm11, %v4372_v34, 0 }
 0x41c   :  { %4410 = vmatpush1.bf16.msra.mxu0 %v4378_v40  ;;  %v4533_v39 = vpop.permute.xlu0 %4532  ;;  %4427 = vmatprep.mubr.bf16.mxu0 %v6120_v3 }
 0x41d   :  { %v4527_v41 = vpop.permute.xlu1 %4526 }
 0x41e   :  { %v4540_v38 = vsel %vm703_vm5, %v4527_v41, %v4529_v36 }
 0x41f   :  { %5904 = vmatmul.mubr.msk.bf16.vlgmr.msra.gmra.mxu1 %vm4062_vm12, %v4032_v25  ;;  %v4550_v9 = vsel %vm4066_vm11, %v4540_v38, 0 }
 0x420   :  { %4451 = vmatpush1.bf16.msra.mxu1 %v4384_v47  ;;  %v4537_v44 = vpop.permute.xlu0 %4536  ;;  %4468 = vmatprep.mubr.bf16.mxu1 %v6120_v3 }
 0x421   :  { %v4531_v55 = vpop.permute.xlu1 %4530 }
 0x422   :  { %v4541_v50 = vsel %vm703_vm5, %v4529_v36, %v4531_v55  ;;  %v4542_v15 = vsel %vm703_vm5, %v4531_v55, %v4533_v39 }
 0x423   :  { %5907 = vmatmul.mubr.msk.bf16.vlgmr.msra.gmra.mxu0 %vm4062_vm12, %v5905_v4  ;;  %5913 = vmatprep.subr.msk.bf16.mxu1 %vm4066_vm11, %v4541_v50  ;;  %v4556_v35 = vsel %vm4066_vm11, %v4542_v15, 0 }
 0x424   :  { %v4367_v11 = vpop.permute.xlu0 %4366  ;;  %4509 = vmatprep.mubr.bf16.mxu0 %v6120_v3 }
 0x425   :  { %v4373_v53 = vsel %vm486_vm4, %v4365_v54, %v4367_v11  ;;  %v4535_v43 = vpop.permute.xlu1 %4534 }
 0x426   :  { %5910 = vmatprep.subr.msk.bf16.mxu0 %vm4066_vm11, %v4373_v53  ;;  %v4543_v56 = vsel %vm703_vm5, %v4533_v39, %v4535_v43  ;;  %v4544_v30 = vsel %vm703_vm5, %v4535_v43, %v4537_v44 }
 0x427   :  { %5909 = vmatmul.mubr.msk.bf16.vlgmr.msra.gmra.mxu1 %vm4062_vm12, %v5905_v4  ;;  %4492 = vmatpush1.bf16.msra.mxu0 %v4390_v62  ;;  %v4562_v42 = vsel %vm4066_vm11, %v4544_v30, 0 }
 0x428   :  { %4582 = vmatpush1.bf16.msra.mxu1 %v4550_v9  ;;  %v4699_v33 = vpop.permute.xlu0 %4698  ;;  %5915 = vmatprep.subr.msk.bf16.mxu0 %vm4066_vm11, %v4543_v56 }
 0x429   :  { %v4701_v26 = vpop.permute.xlu1 %4700  ;;  %4599 = vmatprep.mubr.bf16.mxu1 %v6120_v3 }
 0x42a   :  { %v4712_v13 = vsel %vm920_vm6, %v4699_v33, %v4701_v26 }
 0x42b   :  { %5911 = vmatmul.mubr.msk.bf16.vlgmr.msra.gmra.mxu0 %vm4062_vm12, %v5905_v4  ;;  %v4722_v28 = vsel %vm4066_vm11, %v4712_v13, 0  ;;  %v5933_v4 = vld [vmem:[%s7505_s8 + $0xc] sm:$0x3]  ;;  %v5940_v13 = vld [vmem:[%s7505_s8 + $0xe] sm:$0x3] }
 0x42c   :  { %4623 = vmatpush1.bf16.msra.mxu0 %v4556_v35  ;;  %v4703_v16 = vpop.permute.xlu0 %4702  ;;  %4640 = vmatprep.mubr.bf16.mxu0 %v6120_v3 }
 0x42d   :  { %v4713_v63 = vsel %vm920_vm6, %v4701_v26, %v4703_v16  ;;  %v4705_v60 = vpop.permute.xlu1 %4704 }
 0x42e   :  { %5920 = vmatprep.subr.msk.bf16.mxu0 %vm4066_vm11, %v4713_v63  ;;  %v4714_v59 = vsel %vm920_vm6, %v4703_v16, %v4705_v60 }
 0x42f   :  { %5914 = vmatmul.mubr.msk.bf16.vlgmr.msra.gmra.mxu1 %vm4062_vm12, %v5912_v52  ;;  %v4728_v37 = vsel %vm4066_vm11, %v4714_v59, 0 }
 0x430   :  { %v4707_v57 = vpop.permute.xlu0 %4706  ;;  %4681 = vmatprep.mubr.bf16.mxu1 %v6120_v3 }
 0x431   :  { %v4709_v8 = vpop.permute.xlu1 %4708  ;;  %v4715_v0 = vsel %vm920_vm6, %v4705_v60, %v4707_v57 }
 0x432   :  { %v4716_v23 = vsel %vm920_vm6, %v4707_v57, %v4709_v8 }
 0x433   :  { %5916 = vmatmul.mubr.msk.bf16.vlgmr.msra.gmra.mxu0 %vm4062_vm12, %v5912_v52  ;;  %v4734_v6 = vsel %vm4066_vm11, %v4716_v23, 0 }
 0x434   :  { %4754 = vmatpush1.bf16.msra.mxu0 %v4722_v28  ;;  %v4873_v5 = vpop.permute.xlu0 %4872  ;;  %4771 = vmatprep.mubr.bf16.mxu0 %v6120_v3 }
 0x435   :  { %v4539_v18 = vpop.permute.xlu1 %4538 }
 0x436   :  { %v4545_v14 = vsel %vm703_vm5, %v4537_v44, %v4539_v18 }
 0x437   :  { %5917 = vmatprep.subr.msk.bf16.mxu1 %vm4066_vm11, %v4545_v14 }
 0x438   :  { %4664 = vmatpush1.bf16.msra.mxu1 %v4562_v42  ;;  %v4877_v27 = vpop.permute.xlu0 %4876 }
 0x439   :  { %v4871_v1 = vpop.permute.xlu1 %4870  ;;  %5922 = vmatprep.subr.msk.bf16.mxu1 %vm4066_vm11, %v4715_v0 }
 0x43a   :  { %v4884_v31 = vsel %vm1137_vm7, %v4871_v1, %v4873_v5 }
 0x43b   :  { %5918 = vmatmul.mubr.msk.bf16.vlgmr.msra.gmra.mxu1 %vm4062_vm12, %v5912_v52  ;;  %5921 = vmatmul.mubr.msk.bf16.vlgmr.msra.gmra.mxu0 %vm4062_vm12, %v5919_v22  ;;  %v4894_v49 = vsel %vm4066_vm11, %v4884_v31, 0 }
 0x43c   :  { %4795 = vmatpush1.bf16.msra.mxu1 %v4728_v37  ;;  %v4711_v29 = vpop.permute.xlu0 %4710  ;;  %4812 = vmatprep.mubr.bf16.mxu1 %v6120_v3 }
 0x43d   :  { %v4717_v46 = vsel %vm920_vm6, %v4709_v8, %v4711_v29  ;;  %v4875_v61 = vpop.permute.xlu1 %4874  ;;  %4853 = vmatprep.mubr.bf16.mxu0 %v6120_v3 }
 0x43e   :  { %v4885_v21 = vsel %vm1137_vm7, %v4873_v5, %v4875_v61  ;;  %5924 = vmatprep.subr.msk.bf16.mxu0 %vm4066_vm11, %v4717_v46  ;;  %v4886_v58 = vsel %vm1137_vm7, %v4875_v61, %v4877_v27 }
 0x43f   :  { %5927 = vmatprep.subr.msk.bf16.mxu1 %vm4066_vm11, %v4885_v21  ;;  %4836 = vmatpush1.bf16.msra.mxu0 %v4734_v6  ;;  %v4900_v48 = vsel %vm4066_vm11, %v4886_v58, 0 }
 0x440   :  { %v4881_v24 = vpop.permute.xlu0 %4880 }
 0x441   :  { %v4879_v45 = vpop.permute.xlu1 %4878 }
 0x442   :  { %v4887_v12 = vsel %vm1137_vm7, %v4877_v27, %v4879_v45  ;;  %v4888_v36 = vsel %vm1137_vm7, %v4879_v45, %v4881_v24  ;;  %v5947_v27 = vld [vmem:[%s7505_s8 + $0x10] sm:$0x3] }
 0x443   :  { %5923 = vmatmul.mubr.msk.bf16.vlgmr.msra.gmra.mxu1 %vm4062_vm12, %v5919_v22  ;;  %5925 = vmatmul.mubr.msk.bf16.vlgmr.msra.gmra.mxu0 %vm4062_vm12, %v5919_v22  ;;  %v4906_v39 = vsel %vm4066_vm11, %v4888_v36, 0 }
 0x444   :  { %4926 = vmatpush1.bf16.msra.mxu1 %v4894_v49  ;;  %5929 = vmatprep.subr.msk.bf16.mxu0 %vm4066_vm11, %v4887_v12  ;;  %v5043_v10 = vpop.permute.xlu0 %5042 }
 0x445   :  { %4967 = vmatpush1.bf16.msra.mxu0 %v4900_v48  ;;  %v5045_v2 = vpop.permute.xlu1 %5044  ;;  %4943 = vmatprep.mubr.bf16.mxu1 %v6120_v3 }
 0x446   :  { %4984 = vmatprep.mubr.bf16.mxu0 %v6120_v3  ;;  %v5056_v20 = vsel %vm1354_vm8, %v5043_v10, %v5045_v2 }
 0x447   :  { %v5066_v7 = vsel %vm4066_vm11, %v5056_v20, 0 }
 0x448   :  { %v5047_v25 = vpop.permute.xlu0 %5046 }
 0x449   :  { %v5057_v17 = vsel %vm1354_vm8, %v5045_v2, %v5047_v25  ;;  %v5049_v19 = vpop.permute.xlu1 %5048 }
 0x44a   :  { %5934 = vmatprep.subr.msk.bf16.mxu0 %vm4066_vm11, %v5057_v17  ;;  %v5058_v41 = vsel %vm1354_vm8, %v5047_v25, %v5049_v19 }
 0x44b   :  { %5928 = vmatmul.mubr.msk.bf16.vlgmr.msra.gmra.mxu1 %vm4062_vm12, %v5926_v51  ;;  %5930 = vmatmul.mubr.msk.bf16.vlgmr.msra.gmra.mxu0 %vm4062_vm12, %v5926_v51  ;;  %v5072_v50 = vsel %vm4066_vm11, %v5058_v41, 0 }
 0x44c   :  { %5098 = vmatpush1.bf16.msra.mxu0 %v5066_v7  ;;  %v5051_v54 = vpop.permute.xlu0 %5050  ;;  %5025 = vmatprep.mubr.bf16.mxu1 %v6120_v3 }
 0x44d   :  { %v4883_v40 = vpop.permute.xlu1 %4882  ;;  %5115 = vmatprep.mubr.bf16.mxu0 %v6120_v3  ;;  %v5059_v47 = vsel %vm1354_vm8, %v5049_v19, %v5051_v54 }
 0x44e   :  { %v4889_v32 = vsel %vm1137_vm7, %v4881_v24, %v4883_v40 }
 0x44f   :  { %5931 = vmatprep.subr.msk.bf16.mxu1 %vm4066_vm11, %v4889_v32 }
 0x450   :  { %5008 = vmatpush1.bf16.msra.mxu1 %v4906_v39  ;;  %v5217_v44 = vpop.permute.xlu0 %5216 }
 0x451   :  { %v5053_v55 = vpop.permute.xlu1 %5052  ;;  %5936 = vmatprep.subr.msk.bf16.mxu1 %vm4066_vm11, %v5059_v47 }
 0x452   :  { %v5060_v34 = vsel %vm1354_vm8, %v5051_v54, %v5053_v55 }
 0x453   :  { %5932 = vmatmul.mubr.msk.bf16.vlgmr.msra.gmra.mxu1 %vm4062_vm12, %v5926_v51  ;;  %5935 = vmatmul.mubr.msk.bf16.vlgmr.msra.gmra.mxu0 %vm4062_vm12, %v5933_v4  ;;  %v5078_v43 = vsel %vm4066_vm11, %v5060_v34, 0 }
 0x454   :  { %5139 = vmatpush1.bf16.msra.mxu1 %v5072_v50  ;;  %v5055_v38 = vpop.permute.xlu0 %5054  ;;  %5156 = vmatprep.mubr.bf16.mxu1 %v6120_v3 }
 0x455   :  { %v5061_v11 = vsel %vm1354_vm8, %v5053_v55, %v5055_v38  ;;  %v5215_v53 = vpop.permute.xlu1 %5214  ;;  %5197 = vmatprep.mubr.bf16.mxu0 %v6120_v3 }
 0x456   :  { %5938 = vmatprep.subr.msk.bf16.mxu0 %vm4066_vm11, %v5061_v11  ;;  %v5228_v9 = vsel %vm1571_vm9, %v5215_v53, %v5217_v44 }
 0x457   :  { %5180 = vmatpush1.bf16.msra.mxu0 %v5078_v43  ;;  %v5238_v33 = vsel %vm4066_vm11, %v5228_v9, 0 }
 0x458   :  { %v5221_v62 = vpop.permute.xlu0 %5220 }
 0x459   :  { %v5219_v56 = vpop.permute.xlu1 %5218 }
 0x45a   :  { %v5229_v15 = vsel %vm1571_vm9, %v5217_v44, %v5219_v56  ;;  %v5230_v26 = vsel %vm1571_vm9, %v5219_v56, %v5221_v62 }
 0x45b   :  { %5937 = vmatmul.mubr.msk.bf16.vlgmr.msra.gmra.mxu1 %vm4062_vm12, %v5933_v4  ;;  %5939 = vmatmul.mubr.msk.bf16.vlgmr.msra.gmra.mxu0 %vm4062_vm12, %v5933_v4  ;;  %v5244_v63 = vsel %vm4066_vm11, %v5230_v26, 0 }
 0x45c   :  { %5941 = vmatprep.subr.msk.bf16.mxu1 %vm4066_vm11, %v5229_v15  ;;  %v5225_v35 = vpop.permute.xlu0 %5224  ;;  %5287 = vmatprep.mubr.bf16.mxu1 %v6120_v3 }
 0x45d   :  { %5270 = vmatpush1.bf16.msra.mxu1 %v5238_v33  ;;  %v5223_v16 = vpop.permute.xlu1 %5222  ;;  %5328 = vmatprep.mubr.bf16.mxu0 %v6120_v3 }
 0x45e   :  { %v5231_v52 = vsel %vm1571_vm9, %v5221_v62, %v5223_v16  ;;  %v5232_v28 = vsel %vm1571_vm9, %v5223_v16, %v5225_v35 }
 0x45f   :  { %5943 = vmatprep.subr.msk.bf16.mxu0 %vm4066_vm11, %v5231_v52  ;;  %v5250_v59 = vsel %vm4066_vm11, %v5232_v28, 0 }
 0x460   :  { %5311 = vmatpush1.bf16.msra.mxu0 %v5244_v63  ;;  %v5387_v60 = vpop.permute.xlu0 %5386 }
 0x461   :  { %v5389_v57 = vpop.permute.xlu1 %5388 }
 0x462   :  { %v5400_v8 = vsel %vm1788_vm10, %v5387_v60, %v5389_v57 }
 0x463   :  { %5942 = vmatmul.mubr.msk.bf16.vlgmr.msra.gmra.mxu1 %vm4062_vm12, %v5940_v13  ;;  %5944 = vmatmul.mubr.msk.bf16.vlgmr.msra.gmra.mxu0 %vm4062_vm12, %v5940_v13  ;;  %v5410_v14 = vsel %vm4066_vm11, %v5400_v8, 0 }
 0x464   :  { %v5391_v30 = vpop.permute.xlu0 %5390  ;;  %5369 = vmatprep.mubr.bf16.mxu1 %v6120_v3  ;;  %5459 = vmatprep.mubr.bf16.mxu0 %v6120_v3 }
 0x465   :  { %v5401_v5 = vsel %vm1788_vm10, %v5389_v57, %v5391_v30  ;;  %v5227_v18 = vpop.permute.xlu1 %5226 }
 0x466   :  { %v5233_v42 = vsel %vm1571_vm9, %v5225_v35, %v5227_v18  ;;  %5948 = vmatprep.subr.msk.bf16.mxu0 %vm4066_vm11, %v5401_v5 }
 0x467   :  { %5945 = vmatprep.subr.msk.bf16.mxu1 %vm4066_vm11, %v5233_v42  ;;  %5442 = vmatpush1.bf16.msra.mxu0 %v5410_v14 }
 0x468   :  { %5352 = vmatpush1.bf16.msra.mxu1 %v5250_v59  ;;  %v5395_v0 = vpop.permute.xlu0 %5394 }
 0x469   :  { %v5393_v22 = vpop.permute.xlu1 %5392 }
 0x46a   :  { %v5402_v1 = vsel %vm1788_vm10, %v5391_v30, %v5393_v22  ;;  %v5403_v37 = vsel %vm1788_vm10, %v5393_v22, %v5395_v0 }
 0x46b   :  { %v5416_v23 = vsel %vm4066_vm11, %v5402_v1, 0  ;;  %5946 = vmatmul.mubr.msk.bf16.vlgmr.msra.gmra.mxu1 %vm4062_vm12, %v5940_v13  ;;  %5949 = vmatmul.mubr.msk.bf16.vlgmr.msra.gmra.mxu0 %vm4062_vm12, %v5947_v27 }
 0x46c   :  { %5950 = vmatprep.subr.msk.bf16.mxu1 %vm4066_vm11, %v5403_v37  ;;  %v5399_v29 = vpop.permute.xlu0 %5398  ;;  %5500 = vmatprep.mubr.bf16.mxu1 %v6120_v3 }
 0x46d   :  { %5483 = vmatpush1.bf16.msra.mxu1 %v5416_v23  ;;  %v5397_v46 = vpop.permute.xlu1 %5396  ;;  %5541 = vmatprep.mubr.bf16.mxu0 %v6120_v3 }
 0x46e   :  { %v5404_v61 = vsel %vm1788_vm10, %v5395_v0, %v5397_v46  ;;  %v5405_v6 = vsel %vm1788_vm10, %v5397_v46, %v5399_v29 }
 0x46f   :  { %v5422_v21 = vsel %vm4066_vm11, %v5404_v61, 0  ;;  %5952 = vmatprep.subr.msk.bf16.mxu0 %vm4066_vm11, %v5405_v6 }
 0x470   :  { %5524 = vmatpush1.bf16.msra.mxu0 %v5422_v21 }
 0x473   :  { %5951 = vmatmul.mubr.msk.bf16.vlgmr.msra.gmra.mxu1 %vm4062_vm12, %v5947_v27  ;;  %5953 = vmatmul.mubr.msk.bf16.vlgmr.msra.gmra.mxu0 %vm4062_vm12, %v5947_v27 }
 0x474   :  { %5634 = vmatprep.mubr.bf16.mxu1 %v6120_v3  ;;  %5675 = vmatprep.mubr.bf16.mxu0 %v6120_v3 }
 0x4cb   :  { %v4119_v31 = vpop.f32.mrf.mxu0 }
 0x4cd   :  { %v4121_v24 = vpop.f32.mrf.mxu0 }
 0x4cf   :  { %v4123_v58 = vpop.f32.mrf.mxu0  ;;  %v4160_v45 = vpop.f32.mrf.mxu1 }
 0x4d1   :  { %v4124_v12 = vpop.f32.mrf.mxu0  ;;  %v4162_v49 = vpop.f32.mrf.mxu1 }
 0x4d3   :  { %v4164_v48 = vpop.f32.mrf.mxu1  ;;  %v4201_v10 = vpop.f32.mrf.mxu0 }
 0x4d5   :  { %v4165_v2 = vpop.f32.mrf.mxu1  ;;  %v4203_v20 = vpop.f32.mrf.mxu0 }
 0x4d7   :  { %v4205_v25 = vpop.f32.mrf.mxu0  ;;  %v4263_v51 = vpop.f32.mrf.mxu1 }
 0x4d8   :  { %v7432_v17 = vadd.f32 %v4263_v51, %v4119_v31 }
 0x4d9   :  { %v4206_v19 = vpop.f32.mrf.mxu0  ;;  %v4265_v7 = vpop.f32.mrf.mxu1 }
 0x4da   :  { %v7434_v36 = vadd.f32 %v4265_v7, %v4121_v24 }
 0x4db   :  { %v4267_v54 = vpop.f32.mrf.mxu1  ;;  %v4304_v40 = vpop.f32.mrf.mxu0 }
 0x4dc   :  { %v4305_v32 = vadd.f32 %v4304_v40, %v4160_v45 }
 0x4dd   :  { %v4268_v39 = vpop.f32.mrf.mxu1  ;;  %v4306_v41 = vpop.f32.mrf.mxu0 }
 0x4de   :  { %v4307_v47 = vadd.f32 %v4306_v41, %v4162_v49 }
 0x4df   :  { %v4308_v44 = vpop.f32.mrf.mxu0  ;;  %v4345_v4 = vpop.f32.mrf.mxu1 }
 0x4e0   :  { %v7436_v55 = vadd.f32 %v4345_v4, %v4201_v10 }
 0x4e1   :  { %v4309_v50 = vpop.f32.mrf.mxu0  ;;  %v4347_v34 = vpop.f32.mrf.mxu1 }
 0x4e2   :  { %v7438_v38 = vadd.f32 %v4347_v34, %v4203_v20 }
 0x4e3   :  { %v4349_v11 = vpop.f32.mrf.mxu1  ;;  %v4429_v53 = vpop.f32.mrf.mxu0 }
 0x4e5   :  { %v4350_v43 = vpop.f32.mrf.mxu1  ;;  %v4431_v62 = vpop.f32.mrf.mxu0 }
 0x4e7   :  { %v4433_v9 = vpop.f32.mrf.mxu0  ;;  %v4470_v56 = vpop.f32.mrf.mxu1 }
 0x4e8   :  { %v7440_v15 = vadd.f32 %v4470_v56, %v4305_v32  ;;  %v4518_v56 = vadd.f32 %v4429_v53, %v7432_v17 }
 0x4e9   :  { %v4434_v33 = vpop.f32.mrf.mxu0  ;;  %v4472_v26 = vpop.f32.mrf.mxu1 }
 0x4ea   :  { %v7442_v35 = vadd.f32 %v4472_v26, %v4307_v47 }
 0x4eb   :  { %v4474_v16 = vpop.f32.mrf.mxu1  ;;  %v7444_v52 = vpop.f32.mrf.mxu0 }
 0x4ec   :  { %v4519_v16 = vadd.f32 %v4431_v62, %v7434_v36 }
 0x4ed   :  { %v4475_v63 = vpop.f32.mrf.mxu1  ;;  %v7446_v60 = vpop.f32.mrf.mxu0 }
 0x4ee   :  { %v4523_v53 = vadd.f32 %v7446_v60, %v7438_v38 }
 0x4ef   :  { %v4515_v13 = vpop.f32.mrf.mxu0  ;;  %v4601_v57 = vpop.f32.mrf.mxu1 }
 0x4f0   :  { %v4690_v63 = vadd.f32 %v4601_v57, %v4518_v56 }
 0x4f1   :  { %v4516_v8 = vpop.f32.mrf.mxu0  ;;  %v4603_v28 = vpop.f32.mrf.mxu1 }
 0x4f3   :  { %v4605_v30 = vpop.f32.mrf.mxu1  ;;  %v7448_v5 = vpop.f32.mrf.mxu0 }
 0x4f4   :  { %v4691_v30 = vadd.f32 %v4603_v28, %v4519_v16  ;;  %v4692_v57 = vadd.f32 %v7448_v5, %v7440_v15 }
 0x4f5   :  { %v4606_v18 = vpop.f32.mrf.mxu1  ;;  %v7450_v14 = vpop.f32.mrf.mxu0 }
 0x4f7   :  { %v4646_v42 = vpop.f32.mrf.mxu0 }
 0x4f9   :  { %v4647_v59 = vpop.f32.mrf.mxu0 }
 0x4fb   :  { %v4683_v0 = vpop.f32.mrf.mxu1  ;;  %v4773_v27 = vpop.f32.mrf.mxu0 }
 0x4fc   :  { %v4862_v18 = vadd.f32 %v4773_v27, %v4690_v63 }
 0x4fd   :  { %v7452_v22 = vpop.f32.mrf.mxu1  ;;  %v4775_v1 = vpop.f32.mrf.mxu0 }
 0x4ff   :  { %v4687_v37 = vpop.f32.mrf.mxu1  ;;  %v4777_v23 = vpop.f32.mrf.mxu0 }
 0x500   :  { %v4863_v37 = vadd.f32 %v4775_v1, %v4691_v30  ;;  %v5560_v1 = vpop.permute.xlu1 %5559 }
 0x501   :  { %v4688_v29 = vpop.f32.mrf.mxu1  ;;  %v4778_v46 = vpop.f32.mrf.mxu0 }
 0x503   :  { %v4814_v61 = vpop.f32.mrf.mxu1  ;;  %v4855_v6 = vpop.f32.mrf.mxu0 }
 0x505   :  { %v4816_v21 = vpop.f32.mrf.mxu1  ;;  %v4857_v31 = vpop.f32.mrf.mxu0 }
 0x507   :  { %v4818_v24 = vpop.f32.mrf.mxu1  ;;  %v4859_v58 = vpop.f32.mrf.mxu0 }
 0x508   :  { %v4522_v24 = vadd.f32 %v7444_v52, %v7436_v55 }
 0x509   :  { %v4819_v45 = vpop.f32.mrf.mxu1  ;;  %v4860_v12 = vpop.f32.mrf.mxu0 }
 0x50a   :  { %v4694_v28 = vadd.f32 %v4683_v0, %v4522_v24  ;;  %v4693_v12 = vadd.f32 %v7450_v14, %v7442_v35 }
 0x50b   :  { %v4945_v49 = vpop.f32.mrf.mxu1  ;;  %v4986_v48 = vpop.f32.mrf.mxu0 }
 0x50c   :  { %v5034_v23 = vadd.f32 %v4945_v49, %v4862_v18  ;;  %v4695_v49 = vadd.f32 %v7452_v22, %v4523_v53  ;;  %v4865_v60 = vadd.f32 %v4816_v21, %v4693_v12 }
 0x50d   :  { %v4947_v10 = vpop.f32.mrf.mxu1  ;;  %v4988_v2 = vpop.f32.mrf.mxu0 }
 0x50e   :  { %v5035_v58 = vadd.f32 %v4947_v10, %v4863_v37  ;;  %v4864_v10 = vadd.f32 %v4814_v61, %v4692_v57  ;;  %v5579_v57 = vpop.permute.xlu0 %5578 }
 0x50f   :  { %v4949_v20 = vpop.f32.mrf.mxu1  ;;  %v4990_v25 = vpop.f32.mrf.mxu0 }
 0x510   :  { %v4866_v20 = vadd.f32 %v4855_v6, %v4694_v28  ;;  %v5036_v15 = vadd.f32 %v4986_v48, %v4864_v10 }
 0x511   :  { %v4950_v51 = vpop.f32.mrf.mxu1  ;;  %v4991_v19 = vpop.f32.mrf.mxu0 }
 0x512   :  { %v4867_v51 = vadd.f32 %v4857_v31, %v4695_v49 }
 0x513   :  { %v5027_v7 = vpop.f32.mrf.mxu1  ;;  %v5117_v54 = vpop.f32.mrf.mxu0 }
 0x514   :  { %v5206_v17 = vadd.f32 %v5117_v54, %v5034_v23  ;;  %v5038_v5 = vadd.f32 %v5027_v7, %v4866_v20 }
 0x515   :  { %v5029_v40 = vpop.f32.mrf.mxu1  ;;  %v5119_v32 = vpop.f32.mrf.mxu0 }
 0x516   :  { %v5207_v27 = vadd.f32 %v5119_v32, %v5035_v58 }
 0x517   :  { %v5031_v39 = vpop.f32.mrf.mxu1  ;;  %v5121_v41 = vpop.f32.mrf.mxu0 }
 0x518   :  { %v5037_v39 = vadd.f32 %v4988_v2, %v4865_v60  ;;  %v5039_v41 = vadd.f32 %v5029_v40, %v4867_v51 }
 0x519   :  { %v5032_v47 = vpop.f32.mrf.mxu1  ;;  %v5122_v44 = vpop.f32.mrf.mxu0 }
 0x51b   :  { %v5158_v4 = vpop.f32.mrf.mxu1  ;;  %v5199_v50 = vpop.f32.mrf.mxu0 }
 0x51c   :  { %v5208_v14 = vadd.f32 %v5158_v4, %v5036_v15  ;;  %v5210_v22 = vadd.f32 %v5199_v50, %v5038_v5  ;;  %v5727_v15 = vld [vmem:[%s7507_s1 + $0x10] sm:$0xff] }
 0x51d   :  { %v5160_v34 = vpop.f32.mrf.mxu1  ;;  %v5201_v11 = vpop.f32.mrf.mxu0 }
 0x51e   :  { %v5209_v61 = vadd.f32 %v5160_v34, %v5037_v39  ;;  %v5211_v56 = vadd.f32 %v5201_v11, %v5039_v41  ;;  %v5568_v34 = vld [vmem:[%s7506_s10] sm:$0x3] }
 0x51f   :  { %v5162_v43 = vpop.f32.mrf.mxu1  ;;  %v5203_v9 = vpop.f32.mrf.mxu0 }
 0x521   :  { %v5163_v33 = vpop.f32.mrf.mxu1  ;;  %v5204_v26 = vpop.f32.mrf.mxu0 }
 0x523   :  { %v5289_v13 = vpop.f32.mrf.mxu1  ;;  %v5330_v8 = vpop.f32.mrf.mxu0 }
 0x524   :  { %v5378_v45 = vadd.f32 %v5289_v13, %v5206_v17  ;;  %v5380_v21 = vadd.f32 %v5330_v8, %v5208_v14 }
 0x525   :  { %v5291_v42 = vpop.f32.mrf.mxu1  ;;  %v5332_v59 = vpop.f32.mrf.mxu0 }
 0x526   :  { %v5379_v25 = vadd.f32 %v5291_v42, %v5207_v27  ;;  %v5381_v26 = vadd.f32 %v5332_v59, %v5209_v61 }
 0x527   :  { %v5293_v29 = vpop.f32.mrf.mxu1  ;;  %v5334_v46 = vpop.f32.mrf.mxu0 }
 0x529   :  { %v5294_v36 = vpop.f32.mrf.mxu1  ;;  %v5335_v62 = vpop.f32.mrf.mxu0 }
 0x52b   :  { %v5371_v55 = vpop.f32.mrf.mxu1  ;;  %v5461_v52 = vpop.f32.mrf.mxu0 }
 0x52c   :  { %v5550_v38 = vadd.f32 %v5461_v52, %v5378_v45  ;;  %v5382_v31 = vadd.f32 %v5371_v55, %v5210_v22  ;;  %v5725_v45 = vld [vmem:[%s7507_s1] sm:$0xff] }
 0x52d   :  { %v5463_v19 = vpop.f32.mrf.mxu0  ;;  %v5373_v54 = vpop.f32.mrf.mxu1 }
 0x52e   :  { %v5551_v0 = vadd.f32 %v5463_v19, %v5379_v25  ;;  %v5562_v32 = vadd.f32 %v5560_v1, %v5550_v38  ;;  %v5383_v16 = vadd.f32 %v5373_v54, %v5211_v56  ;;  %v5726_v54 = vld [vmem:[%s7507_s1 + $0x8] sm:$0xff] }
 0x52f   :  { %v5375_v47 = vpop.f32.mrf.mxu1  ;;  %v5465_v35 = vpop.f32.mrf.mxu0 }
 0x530   :  { %v5563_v44 = vadd.f32 %v5560_v1, %v5551_v0  ;;  %v5569_v43 = vpack.c.bf16 %v5562_v32, %v5562_v32 }
 0x531   :  { %v5376_v6 = vpop.f32.mrf.mxu1  ;;  %v5466_v9 = vpop.f32.mrf.mxu0 }
 0x532   :  { %v5570_v33 = vpack.c.bf16 %v5563_v44, %v5563_v44  ;;  %v5585_v40 = vsel %vm98_vm1, %v5569_v43, 0 }
 0x533   :  { %v5502_v48 = vpop.f32.mrf.mxu1  ;;  %v5543_v7 = vpop.f32.mrf.mxu0 }
 0x534   :  { %v5552_v63 = vadd.f32 %v5502_v48, %v5380_v21  ;;  %v5554_v2 = vadd.f32 %v5543_v7, %v5382_v31  ;;  %5954 = vmatprep.subr.msk.bf16.mxu1 %vm98_vm1, %v5570_v33 }
 0x535   :  { %v5504_v4 = vpop.f32.mrf.mxu1  ;;  %v5545_v50 = vpop.f32.mrf.mxu0  ;;  %5617 = vmatpush1.bf16.msra.mxu1 %v5585_v40 }
 0x536   :  { %v5564_v11 = vadd.f32 %v5560_v1, %v5552_v63  ;;  %v5566_v13 = vadd.f32 %v5560_v1, %v5554_v2  ;;  %v5553_v8 = vadd.f32 %v5504_v4, %v5381_v26  ;;  %v5555_v30 = vadd.f32 %v5545_v50, %v5383_v16 }
 0x537   :  { %v5506_v18 = vpop.f32.mrf.mxu1  ;;  %v5547_v42 = vpop.f32.mrf.mxu0 }
 0x538   :  { %v5571_v59 = vpack.c.bf16 %v5564_v11, %v5564_v11  ;;  %v5573_v37 = vpack.c.bf16 %v5566_v13, %v5566_v13  ;;  %v5565_v23 = vadd.f32 %v5560_v1, %v5553_v8  ;;  %v5567_v29 = vadd.f32 %v5560_v1, %v5555_v30  ;;  %5955 = vmatmul.mubr.msk.bf16.vlgmr.msra.gmra.mxu1 %vm94_vm2, %v5568_v34 }
 0x539   :  { %v5507_v46 = vpop.f32.mrf.mxu1  ;;  %v5548_v24 = vpop.f32.mrf.mxu0  ;;  %5716 = vmatprep.mubr.bf16.mxu1 %v6120_v3 }
 0x53a   :  { %v5572_v58 = vpack.c.bf16 %v5565_v23, %v5565_v23  ;;  %v5574_v17 = vpack.c.bf16 %v5567_v29, %v5567_v29  ;;  %v5591_v53 = vsel %vm98_vm1, %v5571_v59, 0  ;;  %v5597_v36 = vsel %vm98_vm1, %v5573_v37, 0 }
 0x53c   :  { %5956 = vmatprep.subr.msk.bf16.mxu0 %vm98_vm1, %v5572_v58  ;;  %5958 = vmatprep.subr.msk.bf16.mxu1 %vm98_vm1, %v5574_v17 }
 0x53d   :  { %5658 = vmatpush1.bf16.msra.mxu0 %v5591_v53  ;;  %5699 = vmatpush1.bf16.msra.mxu1 %v5597_v36 }
 0x540   :  { %5957 = vmatmul.mubr.msk.bf16.vlgmr.msra.gmra.mxu0 %vm94_vm2, %v5568_v34  ;;  %5959 = vmatmul.mubr.msk.bf16.vlgmr.msra.gmra.mxu1 %vm94_vm2, %v5568_v34 }
 0x5f8   :  { %v5636_v62 = vpop.f32.mrf.mxu1 }
 0x5f9   :  { %v5637_v3 = vadd.f32 %v5636_v62, %v5579_v57 }
 0x5fa   :  { %v5638_v28 = vpop.f32.mrf.mxu1 }
 0x5fb   :  { %v5639_v27 = vadd.f32 %v5638_v28, %v5579_v57 }
 0x5fc   :  { %v5640_v1 = vpop.f32.mrf.mxu1 }
 0x5fd   :  { %v5734_v12 = vcombine.low %v5637_v3, %v5639_v27 }
 0x5fe   :  { %v5641_v49 = vpop.f32.mrf.mxu1 }
 0x5ff   :  { %v5740_v55 = vadd.f32 %v5734_v12, %v5725_v45 }
 0x600   :  { %v5677_v52 = vpop.f32.mrf.mxu0  ;;  %v5718_v10 = vpop.f32.mrf.mxu1 }
 0x601   :  { %5743 = vst [vmem:[%s7508_s12] sm:$0xff] %v5740_v55  ;;  %v5678_v38 = vadd.f32 %v5677_v52, %v5579_v57  ;;  %v5719_v60 = vadd.f32 %v5718_v10, %v5579_v57 }
 0x602   :  { %v5679_v20 = vpop.f32.mrf.mxu0  ;;  %v5720_v25 = vpop.f32.mrf.mxu1 }
 0x603   :  { %v5680_v51 = vadd.f32 %v5679_v20, %v5579_v57  ;;  %v5721_v19 = vadd.f32 %v5720_v25, %v5579_v57 }
 0x604   :  { %v5681_v5 = vpop.f32.mrf.mxu0  ;;  %v5722_v0 = vpop.f32.mrf.mxu1 }
 0x605   :  { %v5735_v32 = vcombine.low %v5678_v38, %v5680_v51  ;;  %v5736_v39 = vcombine.low %v5719_v60, %v5721_v19 }
 0x606   :  { %v5682_v41 = vpop.f32.mrf.mxu0  ;;  %v5723_v47 = vpop.f32.mrf.mxu1 }
 0x607   :  { %v5741_v35 = vadd.f32 %v5735_v32, %v5726_v54  ;;  %v5742_v14 = vadd.f32 %v5736_v39, %v5727_v15 }
 0x609   :  { %5744 = vst [vmem:[%s7508_s12 + $0x8] sm:$0xff] %v5741_v35  ;;  %5745 = vst [vmem:[%s7508_s12 + $0x10] sm:$0xff] %v5742_v14 }

</bundles_post_ra>
